<compile_context>
chip_gen: v7x
topology: tpu7x:2x2x1
jax: 0.10.0
libtpu: 0.0.40
codegen_flags: <defaults>
</compile_context>

<pallas_src>
import jax
import jax.numpy as jnp
from jax.experimental import pallas as pl
from jax.experimental.pallas import tpu as pltpu


# ------------------------------ Pallas kernel -------------------------------

def _convnet_kernel(cols_ref, w1_ref, b1_ref, w2_ref, b2_ref, wfc_ref, o_ref,
                    hpool_scr, pool_scr):
    # ---- conv1: im2col patches (576, 25) @ w1 (25, 128), + bias, ReLU ----
    cols = cols_ref[0]                                           # (576, 25) bf16
    y1 = jnp.dot(cols, w1_ref[...], preferred_element_type=jnp.float32)
    y1 = jnp.maximum(y1 + b1_ref[...], 0.0)                      # (576, 128) f32

    # ---- MaxPool2d(2, 2); rows of y1 are s = h*24 + w ----
    # Split h with a layout-preserving reshape (each 24-row plane = 3 vregs),
    # then reduce the even/odd-h planes with a static index.
    y1 = y1.reshape(12, 2, 24, 128)                              # (h', h&1, w, c)
    hpool_scr[...] = jnp.maximum(y1[:, 0], y1[:, 1])             # (12, 24, 128)
    # Split w with sublane-strided VMEM reads (pl.ds stride path).
    pool_scr[...] = jnp.maximum(hpool_scr[:, pl.ds(0, 12, 2), :],
                                hpool_scr[:, pl.ds(1, 12, 2), :])  # (12, 12, 128)

    # ---- conv2: sum over 25 (kh, kw) offsets of (64,128)@(128,128) matmuls ----
    acc2 = jnp.zeros((64, 128), jnp.float32)
    for kh in range(5):
        for kw in range(5):
            ps = pool_scr[kh:kh + 8, kw:kw + 8, :]               # (8, 8, 128)
            ps = ps.reshape(64, 128).astype(jnp.bfloat16)        # aligned merge
            acc2 = acc2 + jnp.dot(ps, w2_ref[kh * 5 + kw],
                                  preferred_element_type=jnp.float32)
    y2 = jnp.maximum(acc2 + b2_ref[...], 0.0)                    # (64, 128): s=h*8+w, cout

    # ---- fc1 (no bias): torch's NCHW flatten order is baked into wfc_ref ----
    y2t = y2.T.astype(jnp.bfloat16)                              # (128, 64): rows = cout
    acc = jnp.zeros((1, 128), jnp.float32)
    for c in range(20):
        acc = acc + jnp.dot(y2t[c:c + 1, :], wfc_ref[c],
                            preferred_element_type=jnp.float32)
    z = jnp.maximum(acc, 0.0)                                    # (1, 128): logits j < 10

    # ---- softmax over the 10 valid classes (padded lanes masked out) ----
    lane = jax.lax.broadcasted_iota(jnp.int32, (1, 128), 1)
    z = jnp.where(lane < 10, z, -1e30)
    z = z - jnp.max(z, axis=-1, keepdims=True)
    e = jnp.exp(z)
    denom = jnp.sum(e, axis=-1, keepdims=True)
    o_ref[0] = e * pl.reciprocal(denom, approx=True)


# ------------------------------- JAX wrapper ---------------------------------

def _im2col_conv1(x):
    """(N, 1, 28, 28) -> (N, 576, 25); column order k = kh*5 + kw,
    row order s = h*24 + w (matches torch Conv2d weight flatten)."""
    n = x.shape[0]
    xs = x[:, 0]
    cols = [xs[:, kh:kh + 24, kw:kw + 24].reshape(n, 576)
            for kh in range(5) for kw in range(5)]
    return jnp.stack(cols, axis=-1)


def _prepare_params(w1, b1, w2, b2, wfc):
    """Pad channel dims to 128 lanes and pre-permute so the kernel needs no
    in-kernel weight layout work.  One-off / trace-time cost."""
    w1p = jnp.zeros((25, 128), jnp.bfloat16).at[:, :10].set(
        w1.reshape(10, 25).T.astype(jnp.bfloat16))                     # (k, cout)
    b1p = jnp.zeros((1, 128), jnp.float32).at[0, :10].set(b1)
    w2p = jnp.zeros((25, 128, 128), jnp.bfloat16).at[:, :10, :20].set(
        jnp.transpose(w2, (2, 3, 1, 0)).reshape(25, 10, 20)
        .astype(jnp.bfloat16))                                         # (k, cin, cout)
    b2p = jnp.zeros((1, 128), jnp.float32).at[0, :20].set(b2)
    # wfc[j, c*64 + s]  ->  wfc_r[c, s, j]   (NCHW flatten handled here)
    wfc_r = jnp.zeros((20, 64, 128), jnp.bfloat16).at[:, :, :10].set(
        jnp.transpose(wfc.reshape(10, 20, 64), (1, 2, 0)).astype(jnp.bfloat16))
    return w1p, b1p, w2p, b2p, wfc_r


def convnet_forward(x, params):
    """Replicates ConvNet.forward for x of shape (N, 1, 28, 28); returns (N, 10)."""
    w1, b1, w2, b2, wfc = params
    n = x.shape[0]
    assert x.shape[1:] == (1, 28, 28)

    cols1 = _im2col_conv1(x).astype(jnp.bfloat16)                 # (N, 576, 25)
    w1p, b1p, w2p, b2p, wfc_r = _prepare_params(w1, b1, w2, b2, wfc)

    out = pl.pallas_call(
        _convnet_kernel,
        out_shape=jax.ShapeDtypeStruct((n, 1, 128), jnp.float32),
        grid=(n,),
        in_specs=[
            pl.BlockSpec((1, 576, 25), lambda i: (i, 0, 0)),      # per-sample patches
            pl.BlockSpec((25, 128), lambda i: (0, 0)),            # conv1 weight (resident)
            pl.BlockSpec((1, 128), lambda i: (0, 0)),             # conv1 bias
            pl.BlockSpec((25, 128, 128), lambda i: (0, 0, 0)),    # conv2 weight (resident)
            pl.BlockSpec((1, 128), lambda i: (0, 0)),             # conv2 bias
            pl.BlockSpec((20, 64, 128), lambda i: (0, 0, 0)),     # fc1 weight (permuted)
        ],
        out_specs=pl.BlockSpec((1, 1, 128), lambda i: (i, 0, 0)),
        scratch_shapes=[
            pltpu.VMEM((12, 24, 128), jnp.float32),   # h-pooled conv1 activations
            pltpu.VMEM((12, 12, 128), jnp.float32),   # fully pooled activations
        ],
        compiler_params=pltpu.CompilerParams(
            dimension_semantics=("parallel",),        # v7x: split batch over 2 TCs
            vmem_limit_bytes=32 * 1024 * 1024),       # explicit; usage ~5 MB
    )(cols1, w1p, b1p, w2p, b2p, wfc_r)

    return out[:, 0, :10]


# ------------------------------ pure-JAX reference ---------------------------

def _reference_forward(x, params):
    """Plain XLA reference replicating ConvNet.forward (for correctness check)."""
    w1, b1, w2, b2, wfc = params
    n = x.shape[0]
    dn = ('NCHW', 'OIHW', 'NCHW')
    y = jax.lax.conv_general_dilated(x, w1, (1, 1), 'VALID', dimension_numbers=dn)
    y = jax.nn.relu(y + b1[None, :, None, None])                  # (N, 10, 24, 24)
    y = y.reshape(n, 10, 12, 2, 12, 2).max(axis=(3, 5))           # (N, 10, 12, 12)
    y = jax.lax.conv_general_dilated(y, w2, (1, 1), 'VALID', dimension_numbers=dn)
    y = jax.nn.relu(y + b2[None, :, None, None])                  # (N, 20, 8, 8)
    y = y.reshape(n, 20 * 8 * 8)
    y = jax.nn.relu(y @ wfc.T)
    return jax.nn.softmax(y, axis=1)


# ----------------------------------- main ------------------------------------

if __name__ == "__main__":
    key = jax.random.PRNGKey(0)
    k1, k2, k3, k4, k5, kx = jax.random.split(key, 6)

    # Deterministic synthetic parameters (shapes match the PyTorch module).
    w1 = jax.random.normal(k1, (10, 1, 5, 5), jnp.float32) * 0.1     # conv1.weight
    b1 = jax.random.normal(k2, (10,), jnp.float32) * 0.1             # conv1.bias
    w2 = jax.random.normal(k3, (20, 10, 5, 5), jnp.float32) * 0.05   # conv2.weight
    b2 = jax.random.normal(k4, (20,), jnp.float32) * 0.05            # conv2.bias
    wfc = jax.random.normal(k5, (10, 20 * 8 * 8), jnp.float32) * 0.02  # fc1.weight

    # Input: batch=2, NCHW, 28x28 (spatial size fixed by ndf = 20*8*8).
    x = jax.random.normal(kx, (2, 1, 28, 28), jnp.float32)
    params = (w1, b1, w2, b2, wfc)

    out = jax.jit(convnet_forward)(x, params)
    out = jax.block_until_ready(out)

    assert out.shape == (2, 10)
    # softmax rows sum to ~1 (approx-reciprocal normalization -> loose atol)
    assert jnp.allclose(jnp.sum(out, axis=1), 1.0, atol=1e-2)
    # matches the pure-JAX reference within bf16-MXU tolerance
    ref = jax.jit(_reference_forward)(x, params)
    assert jnp.allclose(out, ref, atol=2e-2)
    print("KERNEL_OK")
</pallas_src>

<mosaic_0001>
module attributes {stable_mosaic.version = 11 : i64} {
  func.func @_convnet_kernel(%arg0: i32, %arg1: memref<1x576x25xbf16, #tpu.memory_space<vmem>>, %arg2: memref<25x128xbf16, #tpu.memory_space<vmem>>, %arg3: memref<1x128xf32, #tpu.memory_space<vmem>>, %arg4: memref<25x128x128xbf16, #tpu.memory_space<vmem>>, %arg5: memref<1x128xf32, #tpu.memory_space<vmem>>, %arg6: memref<20x64x128xbf16, #tpu.memory_space<vmem>>, %arg7: memref<1x1x128xf32, #tpu.memory_space<vmem>>, %arg8: memref<12x24x128xf32, #tpu.memory_space<vmem>>, %arg9: memref<12x12x128xf32, #tpu.memory_space<vmem>>) attributes {dimension_semantics = [#tpu.dimension_semantics<parallel>], iteration_bounds = array<i64: 2>, scalar_prefetch = 0 : i64, scratch_operands = 2 : i64, tpu.core_type = #tpu.core_type<tc>, window_params = [{transform_indices = @transform_0, window_bounds = array<i64: 1, 576, 25>}, {pipeline_mode = #tpu.pipeline_mode<synchronous>, transform_indices = @transform_1, window_bounds = array<i64: 25, 128>}, {pipeline_mode = #tpu.pipeline_mode<synchronous>, transform_indices = @transform_2, window_bounds = array<i64: 1, 128>}, {pipeline_mode = #tpu.pipeline_mode<synchronous>, transform_indices = @transform_3, window_bounds = array<i64: 25, 128, 128>}, {pipeline_mode = #tpu.pipeline_mode<synchronous>, transform_indices = @transform_4, window_bounds = array<i64: 1, 128>}, {pipeline_mode = #tpu.pipeline_mode<synchronous>, transform_indices = @transform_5, window_bounds = array<i64: 20, 64, 128>}, {transform_indices = @transform_6, window_bounds = array<i64: 1, 1, 128>}]} {
    %c0 = arith.constant 0 : index
    %c0_0 = arith.constant 0 : index
    %c0_1 = arith.constant 0 : index
    %0 = vector.load %arg1[%c0, %c0_0, %c0_1] : memref<1x576x25xbf16, #tpu.memory_space<vmem>>, vector<1x576x25xbf16>
    %1 = vector.shape_cast %0 : vector<1x576x25xbf16> to vector<576x25xbf16>
    %c0_2 = arith.constant 0 : index
    %c0_3 = arith.constant 0 : index
    %2 = vector.load %arg2[%c0_2, %c0_3] : memref<25x128xbf16, #tpu.memory_space<vmem>>, vector<25x128xbf16>
    %cst = arith.constant dense<0.000000e+00> : vector<576x128xf32>
    %3 = tpu.matmul %1, %2, %cst {dimension_numbers = #tpu.dot_dimension_numbers<[1], [0], [0], [1], [0, 0, 1, 1], [], []>} : vector<576x25xbf16>, vector<25x128xbf16>, vector<576x128xf32> -> vector<576x128xf32>
    %c0_4 = arith.constant 0 : index
    %c0_5 = arith.constant 0 : index
    %4 = vector.load %arg3[%c0_4, %c0_5] : memref<1x128xf32, #tpu.memory_space<vmem>>, vector<1x128xf32>
    %5 = vector.broadcast %4 : vector<1x128xf32> to vector<576x128xf32>
    %6 = arith.addf %3, %5 : vector<576x128xf32>
    %cst_6 = arith.constant 0.000000e+00 : f32
    %7 = vector.broadcast %cst_6 : f32 to vector<576x128xf32>
    %8 = arith.maximumf %6, %7 : vector<576x128xf32>
    %9 = vector.shape_cast %8 : vector<576x128xf32> to vector<12x2x24x128xf32>
    %10 = vector.extract_strided_slice %9 {offsets = [0, 0, 0, 0], sizes = [12, 1, 24, 128], strides = [1, 1, 1, 1]} : vector<12x2x24x128xf32> to vector<12x1x24x128xf32>
    %11 = vector.shape_cast %10 : vector<12x1x24x128xf32> to vector<12x24x128xf32>
    %12 = vector.extract_strided_slice %9 {offsets = [0, 1, 0, 0], sizes = [12, 1, 24, 128], strides = [1, 1, 1, 1]} : vector<12x2x24x128xf32> to vector<12x1x24x128xf32>
    %13 = vector.shape_cast %12 : vector<12x1x24x128xf32> to vector<12x24x128xf32>
    %14 = arith.maximumf %11, %13 : vector<12x24x128xf32>
    %c0_7 = arith.constant 0 : index
    %c0_8 = arith.constant 0 : index
    %c0_9 = arith.constant 0 : index
    %15 = vector.load %arg8[%c0_7, %c0_8, %c0_9] : memref<12x24x128xf32, #tpu.memory_space<vmem>>, vector<12x24x128xf32>
    tpu.vector_store %arg8[%c0_7, %c0_8, %c0_9], %14 {strides = array<i32>} : memref<12x24x128xf32, #tpu.memory_space<vmem>>, vector<12x24x128xf32>,
    %c0_10 = arith.constant 0 : index
    %c0_11 = arith.constant 0 : index
    %c0_12 = arith.constant 0 : index
    %16 = tpu.strided_load %arg8[%c0_10, %c0_11, %c0_12] {strides = array<i32: 1, 2, 1>} : memref<12x24x128xf32, #tpu.memory_space<vmem>>, vector<12x12x128xf32>
    %c0_13 = arith.constant 0 : index
    %c1 = arith.constant 1 : index
    %c0_14 = arith.constant 0 : index
    %17 = tpu.strided_load %arg8[%c0_13, %c1, %c0_14] {strides = array<i32: 1, 2, 1>} : memref<12x24x128xf32, #tpu.memory_space<vmem>>, vector<12x12x128xf32>
    %18 = arith.maximumf %16, %17 : vector<12x12x128xf32>
    %c0_15 = arith.constant 0 : index
    %c0_16 = arith.constant 0 : index
    %c0_17 = arith.constant 0 : index
    %19 = vector.load %arg9[%c0_15, %c0_16, %c0_17] : memref<12x12x128xf32, #tpu.memory_space<vmem>>, vector<12x12x128xf32>
    tpu.vector_store %arg9[%c0_15, %c0_16, %c0_17], %18 {strides = array<i32>} : memref<12x12x128xf32, #tpu.memory_space<vmem>>, vector<12x12x128xf32>,
    %cst_18 = arith.constant 0.000000e+00 : f32
    %20 = vector.broadcast %cst_18 : f32 to vector<64x128xf32>
    %c0_19 = arith.constant 0 : index
    %c0_20 = arith.constant 0 : index
    %c0_21 = arith.constant 0 : index
    %21 = vector.load %arg9[%c0_19, %c0_20, %c0_21] : memref<12x12x128xf32, #tpu.memory_space<vmem>>, vector<8x8x128xf32>
    %22 = vector.shape_cast %21 : vector<8x8x128xf32> to vector<64x128xf32>
    %23 = arith.truncf %22 : vector<64x128xf32> to vector<64x128xbf16>
    %c0_22 = arith.constant 0 : index
    %c0_23 = arith.constant 0 : index
    %c0_24 = arith.constant 0 : index
    %24 = vector.load %arg4[%c0_22, %c0_23, %c0_24] : memref<25x128x128xbf16, #tpu.memory_space<vmem>>, vector<1x128x128xbf16>
    %25 = vector.shape_cast %24 : vector<1x128x128xbf16> to vector<128x128xbf16>
    %cst_25 = arith.constant dense<0.000000e+00> : vector<64x128xf32>
    %26 = tpu.matmul %23, %25, %cst_25 {dimension_numbers = #tpu.dot_dimension_numbers<[1], [0], [0], [1], [0, 0, 1, 1], [], []>} : vector<64x128xbf16>, vector<128x128xbf16>, vector<64x128xf32> -> vector<64x128xf32>
    %27 = arith.addf %20, %26 : vector<64x128xf32>
    %c0_26 = arith.constant 0 : index
    %c1_27 = arith.constant 1 : index
    %c0_28 = arith.constant 0 : index
    %28 = vector.load %arg9[%c0_26, %c1_27, %c0_28] : memref<12x12x128xf32, #tpu.memory_space<vmem>>, vector<8x8x128xf32>
    %29 = vector.shape_cast %28 : vector<8x8x128xf32> to vector<64x128xf32>
    %30 = arith.truncf %29 : vector<64x128xf32> to vector<64x128xbf16>
    %c1_29 = arith.constant 1 : index
    %c0_30 = arith.constant 0 : index
    %c0_31 = arith.constant 0 : index
    %31 = vector.load %arg4[%c1_29, %c0_30, %c0_31] : memref<25x128x128xbf16, #tpu.memory_space<vmem>>, vector<1x128x128xbf16>
    %32 = vector.shape_cast %31 : vector<1x128x128xbf16> to vector<128x128xbf16>
    %cst_32 = arith.constant dense<0.000000e+00> : vector<64x128xf32>
    %33 = tpu.matmul %30, %32, %cst_32 {dimension_numbers = #tpu.dot_dimension_numbers<[1], [0], [0], [1], [0, 0, 1, 1], [], []>} : vector<64x128xbf16>, vector<128x128xbf16>, vector<64x128xf32> -> vector<64x128xf32>
    %34 = arith.addf %27, %33 : vector<64x128xf32>
    %c0_33 = arith.constant 0 : index
    %c2 = arith.constant 2 : index
    %c0_34 = arith.constant 0 : index
    %35 = vector.load %arg9[%c0_33, %c2, %c0_34] : memref<12x12x128xf32, #tpu.memory_space<vmem>>, vector<8x8x128xf32>
    %36 = vector.shape_cast %35 : vector<8x8x128xf32> to vector<64x128xf32>
    %37 = arith.truncf %36 : vector<64x128xf32> to vector<64x128xbf16>
    %c2_35 = arith.constant 2 : index
    %c0_36 = arith.constant 0 : index
    %c0_37 = arith.constant 0 : index
    %38 = vector.load %arg4[%c2_35, %c0_36, %c0_37] : memref<25x128x128xbf16, #tpu.memory_space<vmem>>, vector<1x128x128xbf16>
    %39 = vector.shape_cast %38 : vector<1x128x128xbf16> to vector<128x128xbf16>
    %cst_38 = arith.constant dense<0.000000e+00> : vector<64x128xf32>
    %40 = tpu.matmul %37, %39, %cst_38 {dimension_numbers = #tpu.dot_dimension_numbers<[1], [0], [0], [1], [0, 0, 1, 1], [], []>} : vector<64x128xbf16>, vector<128x128xbf16>, vector<64x128xf32> -> vector<64x128xf32>
    %41 = arith.addf %34, %40 : vector<64x128xf32>
    %c0_39 = arith.constant 0 : index
    %c3 = arith.constant 3 : index
    %c0_40 = arith.constant 0 : index
    %42 = vector.load %arg9[%c0_39, %c3, %c0_40] : memref<12x12x128xf32, #tpu.memory_space<vmem>>, vector<8x8x128xf32>
    %43 = vector.shape_cast %42 : vector<8x8x128xf32> to vector<64x128xf32>
    %44 = arith.truncf %43 : vector<64x128xf32> to vector<64x128xbf16>
    %c3_41 = arith.constant 3 : index
    %c0_42 = arith.constant 0 : index
    %c0_43 = arith.constant 0 : index
    %45 = vector.load %arg4[%c3_41, %c0_42, %c0_43] : memref<25x128x128xbf16, #tpu.memory_space<vmem>>, vector<1x128x128xbf16>
    %46 = vector.shape_cast %45 : vector<1x128x128xbf16> to vector<128x128xbf16>
    %cst_44 = arith.constant dense<0.000000e+00> : vector<64x128xf32>
    %47 = tpu.matmul %44, %46, %cst_44 {dimension_numbers = #tpu.dot_dimension_numbers<[1], [0], [0], [1], [0, 0, 1, 1], [], []>} : vector<64x128xbf16>, vector<128x128xbf16>, vector<64x128xf32> -> vector<64x128xf32>
    %48 = arith.addf %41, %47 : vector<64x128xf32>
    %c0_45 = arith.constant 0 : index
    %c4 = arith.constant 4 : index
    %c0_46 = arith.constant 0 : index
    %49 = vector.load %arg9[%c0_45, %c4, %c0_46] : memref<12x12x128xf32, #tpu.memory_space<vmem>>, vector<8x8x128xf32>
    %50 = vector.shape_cast %49 : vector<8x8x128xf32> to vector<64x128xf32>
    %51 = arith.truncf %50 : vector<64x128xf32> to vector<64x128xbf16>
    %c4_47 = arith.constant 4 : index
    %c0_48 = arith.constant 0 : index
    %c0_49 = arith.constant 0 : index
    %52 = vector.load %arg4[%c4_47, %c0_48, %c0_49] : memref<25x128x128xbf16, #tpu.memory_space<vmem>>, vector<1x128x128xbf16>
    %53 = vector.shape_cast %52 : vector<1x128x128xbf16> to vector<128x128xbf16>
    %cst_50 = arith.constant dense<0.000000e+00> : vector<64x128xf32>
    %54 = tpu.matmul %51, %53, %cst_50 {dimension_numbers = #tpu.dot_dimension_numbers<[1], [0], [0], [1], [0, 0, 1, 1], [], []>} : vector<64x128xbf16>, vector<128x128xbf16>, vector<64x128xf32> -> vector<64x128xf32>
    %55 = arith.addf %48, %54 : vector<64x128xf32>
    %c1_51 = arith.constant 1 : index
    %c0_52 = arith.constant 0 : index
    %c0_53 = arith.constant 0 : index
    %56 = vector.load %arg9[%c1_51, %c0_52, %c0_53] : memref<12x12x128xf32, #tpu.memory_space<vmem>>, vector<8x8x128xf32>
    %57 = vector.shape_cast %56 : vector<8x8x128xf32> to vector<64x128xf32>
    %58 = arith.truncf %57 : vector<64x128xf32> to vector<64x128xbf16>
    %c5 = arith.constant 5 : index
    %c0_54 = arith.constant 0 : index
    %c0_55 = arith.constant 0 : index
    %59 = vector.load %arg4[%c5, %c0_54, %c0_55] : memref<25x128x128xbf16, #tpu.memory_space<vmem>>, vector<1x128x128xbf16>
    %60 = vector.shape_cast %59 : vector<1x128x128xbf16> to vector<128x128xbf16>
    %cst_56 = arith.constant dense<0.000000e+00> : vector<64x128xf32>
    %61 = tpu.matmul %58, %60, %cst_56 {dimension_numbers = #tpu.dot_dimension_numbers<[1], [0], [0], [1], [0, 0, 1, 1], [], []>} : vector<64x128xbf16>, vector<128x128xbf16>, vector<64x128xf32> -> vector<64x128xf32>
    %62 = arith.addf %55, %61 : vector<64x128xf32>
    %c1_57 = arith.constant 1 : index
    %c1_58 = arith.constant 1 : index
    %c0_59 = arith.constant 0 : index
    %63 = vector.load %arg9[%c1_57, %c1_58, %c0_59] : memref<12x12x128xf32, #tpu.memory_space<vmem>>, vector<8x8x128xf32>
    %64 = vector.shape_cast %63 : vector<8x8x128xf32> to vector<64x128xf32>
    %65 = arith.truncf %64 : vector<64x128xf32> to vector<64x128xbf16>
    %c6 = arith.constant 6 : index
    %c0_60 = arith.constant 0 : index
    %c0_61 = arith.constant 0 : index
    %66 = vector.load %arg4[%c6, %c0_60, %c0_61] : memref<25x128x128xbf16, #tpu.memory_space<vmem>>, vector<1x128x128xbf16>
    %67 = vector.shape_cast %66 : vector<1x128x128xbf16> to vector<128x128xbf16>
    %cst_62 = arith.constant dense<0.000000e+00> : vector<64x128xf32>
    %68 = tpu.matmul %65, %67, %cst_62 {dimension_numbers = #tpu.dot_dimension_numbers<[1], [0], [0], [1], [0, 0, 1, 1], [], []>} : vector<64x128xbf16>, vector<128x128xbf16>, vector<64x128xf32> -> vector<64x128xf32>
    %69 = arith.addf %62, %68 : vector<64x128xf32>
    %c1_63 = arith.constant 1 : index
    %c2_64 = arith.constant 2 : index
    %c0_65 = arith.constant 0 : index
    %70 = vector.load %arg9[%c1_63, %c2_64, %c0_65] : memref<12x12x128xf32, #tpu.memory_space<vmem>>, vector<8x8x128xf32>
    %71 = vector.shape_cast %70 : vector<8x8x128xf32> to vector<64x128xf32>
    %72 = arith.truncf %71 : vector<64x128xf32> to vector<64x128xbf16>
    %c7 = arith.constant 7 : index
    %c0_66 = arith.constant 0 : index
    %c0_67 = arith.constant 0 : index
    %73 = vector.load %arg4[%c7, %c0_66, %c0_67] : memref<25x128x128xbf16, #tpu.memory_space<vmem>>, vector<1x128x128xbf16>
    %74 = vector.shape_cast %73 : vector<1x128x128xbf16> to vector<128x128xbf16>
    %cst_68 = arith.constant dense<0.000000e+00> : vector<64x128xf32>
    %75 = tpu.matmul %72, %74, %cst_68 {dimension_numbers = #tpu.dot_dimension_numbers<[1], [0], [0], [1], [0, 0, 1, 1], [], []>} : vector<64x128xbf16>, vector<128x128xbf16>, vector<64x128xf32> -> vector<64x128xf32>
    %76 = arith.addf %69, %75 : vector<64x128xf32>
    %c1_69 = arith.constant 1 : index
    %c3_70 = arith.constant 3 : index
    %c0_71 = arith.constant 0 : index
    %77 = vector.load %arg9[%c1_69, %c3_70, %c0_71] : memref<12x12x128xf32, #tpu.memory_space<vmem>>, vector<8x8x128xf32>
    %78 = vector.shape_cast %77 : vector<8x8x128xf32> to vector<64x128xf32>
    %79 = arith.truncf %78 : vector<64x128xf32> to vector<64x128xbf16>
    %c8 = arith.constant 8 : index
    %c0_72 = arith.constant 0 : index
    %c0_73 = arith.constant 0 : index
    %80 = vector.load %arg4[%c8, %c0_72, %c0_73] : memref<25x128x128xbf16, #tpu.memory_space<vmem>>, vector<1x128x128xbf16>
    %81 = vector.shape_cast %80 : vector<1x128x128xbf16> to vector<128x128xbf16>
    %cst_74 = arith.constant dense<0.000000e+00> : vector<64x128xf32>
    %82 = tpu.matmul %79, %81, %cst_74 {dimension_numbers = #tpu.dot_dimension_numbers<[1], [0], [0], [1], [0, 0, 1, 1], [], []>} : vector<64x128xbf16>, vector<128x128xbf16>, vector<64x128xf32> -> vector<64x128xf32>
    %83 = arith.addf %76, %82 : vector<64x128xf32>
    %c1_75 = arith.constant 1 : index
    %c4_76 = arith.constant 4 : index
    %c0_77 = arith.constant 0 : index
    %84 = vector.load %arg9[%c1_75, %c4_76, %c0_77] : memref<12x12x128xf32, #tpu.memory_space<vmem>>, vector<8x8x128xf32>
    %85 = vector.shape_cast %84 : vector<8x8x128xf32> to vector<64x128xf32>
    %86 = arith.truncf %85 : vector<64x128xf32> to vector<64x128xbf16>
    %c9 = arith.constant 9 : index
    %c0_78 = arith.constant 0 : index
    %c0_79 = arith.constant 0 : index
    %87 = vector.load %arg4[%c9, %c0_78, %c0_79] : memref<25x128x128xbf16, #tpu.memory_space<vmem>>, vector<1x128x128xbf16>
    %88 = vector.shape_cast %87 : vector<1x128x128xbf16> to vector<128x128xbf16>
    %cst_80 = arith.constant dense<0.000000e+00> : vector<64x128xf32>
    %89 = tpu.matmul %86, %88, %cst_80 {dimension_numbers = #tpu.dot_dimension_numbers<[1], [0], [0], [1], [0, 0, 1, 1], [], []>} : vector<64x128xbf16>, vector<128x128xbf16>, vector<64x128xf32> -> vector<64x128xf32>
    %90 = arith.addf %83, %89 : vector<64x128xf32>
    %c2_81 = arith.constant 2 : index
    %c0_82 = arith.constant 0 : index
    %c0_83 = arith.constant 0 : index
    %91 = vector.load %arg9[%c2_81, %c0_82, %c0_83] : memref<12x12x128xf32, #tpu.memory_space<vmem>>, vector<8x8x128xf32>
    %92 = vector.shape_cast %91 : vector<8x8x128xf32> to vector<64x128xf32>
    %93 = arith.truncf %92 : vector<64x128xf32> to vector<64x128xbf16>
    %c10 = arith.constant 10 : index
    %c0_84 = arith.constant 0 : index
    %c0_85 = arith.constant 0 : index
    %94 = vector.load %arg4[%c10, %c0_84, %c0_85] : memref<25x128x128xbf16, #tpu.memory_space<vmem>>, vector<1x128x128xbf16>
    %95 = vector.shape_cast %94 : vector<1x128x128xbf16> to vector<128x128xbf16>
    %cst_86 = arith.constant dense<0.000000e+00> : vector<64x128xf32>
    %96 = tpu.matmul %93, %95, %cst_86 {dimension_numbers = #tpu.dot_dimension_numbers<[1], [0], [0], [1], [0, 0, 1, 1], [], []>} : vector<64x128xbf16>, vector<128x128xbf16>, vector<64x128xf32> -> vector<64x128xf32>
    %97 = arith.addf %90, %96 : vector<64x128xf32>
    %c2_87 = arith.constant 2 : index
    %c1_88 = arith.constant 1 : index
    %c0_89 = arith.constant 0 : index
    %98 = vector.load %arg9[%c2_87, %c1_88, %c0_89] : memref<12x12x128xf32, #tpu.memory_space<vmem>>, vector<8x8x128xf32>
    %99 = vector.shape_cast %98 : vector<8x8x128xf32> to vector<64x128xf32>
    %100 = arith.truncf %99 : vector<64x128xf32> to vector<64x128xbf16>
    %c11 = arith.constant 11 : index
    %c0_90 = arith.constant 0 : index
    %c0_91 = arith.constant 0 : index
    %101 = vector.load %arg4[%c11, %c0_90, %c0_91] : memref<25x128x128xbf16, #tpu.memory_space<vmem>>, vector<1x128x128xbf16>
    %102 = vector.shape_cast %101 : vector<1x128x128xbf16> to vector<128x128xbf16>
    %cst_92 = arith.constant dense<0.000000e+00> : vector<64x128xf32>
    %103 = tpu.matmul %100, %102, %cst_92 {dimension_numbers = #tpu.dot_dimension_numbers<[1], [0], [0], [1], [0, 0, 1, 1], [], []>} : vector<64x128xbf16>, vector<128x128xbf16>, vector<64x128xf32> -> vector<64x128xf32>
    %104 = arith.addf %97, %103 : vector<64x128xf32>
    %c2_93 = arith.constant 2 : index
    %c2_94 = arith.constant 2 : index
    %c0_95 = arith.constant 0 : index
    %105 = vector.load %arg9[%c2_93, %c2_94, %c0_95] : memref<12x12x128xf32, #tpu.memory_space<vmem>>, vector<8x8x128xf32>
    %106 = vector.shape_cast %105 : vector<8x8x128xf32> to vector<64x128xf32>
    %107 = arith.truncf %106 : vector<64x128xf32> to vector<64x128xbf16>
    %c12 = arith.constant 12 : index
    %c0_96 = arith.constant 0 : index
    %c0_97 = arith.constant 0 : index
    %108 = vector.load %arg4[%c12, %c0_96, %c0_97] : memref<25x128x128xbf16, #tpu.memory_space<vmem>>, vector<1x128x128xbf16>
    %109 = vector.shape_cast %108 : vector<1x128x128xbf16> to vector<128x128xbf16>
    %cst_98 = arith.constant dense<0.000000e+00> : vector<64x128xf32>
    %110 = tpu.matmul %107, %109, %cst_98 {dimension_numbers = #tpu.dot_dimension_numbers<[1], [0], [0], [1], [0, 0, 1, 1], [], []>} : vector<64x128xbf16>, vector<128x128xbf16>, vector<64x128xf32> -> vector<64x128xf32>
    %111 = arith.addf %104, %110 : vector<64x128xf32>
    %c2_99 = arith.constant 2 : index
    %c3_100 = arith.constant 3 : index
    %c0_101 = arith.constant 0 : index
    %112 = vector.load %arg9[%c2_99, %c3_100, %c0_101] : memref<12x12x128xf32, #tpu.memory_space<vmem>>, vector<8x8x128xf32>
    %113 = vector.shape_cast %112 : vector<8x8x128xf32> to vector<64x128xf32>
    %114 = arith.truncf %113 : vector<64x128xf32> to vector<64x128xbf16>
    %c13 = arith.constant 13 : index
    %c0_102 = arith.constant 0 : index
    %c0_103 = arith.constant 0 : index
    %115 = vector.load %arg4[%c13, %c0_102, %c0_103] : memref<25x128x128xbf16, #tpu.memory_space<vmem>>, vector<1x128x128xbf16>
    %116 = vector.shape_cast %115 : vector<1x128x128xbf16> to vector<128x128xbf16>
    %cst_104 = arith.constant dense<0.000000e+00> : vector<64x128xf32>
    %117 = tpu.matmul %114, %116, %cst_104 {dimension_numbers = #tpu.dot_dimension_numbers<[1], [0], [0], [1], [0, 0, 1, 1], [], []>} : vector<64x128xbf16>, vector<128x128xbf16>, vector<64x128xf32> -> vector<64x128xf32>
    %118 = arith.addf %111, %117 : vector<64x128xf32>
    %c2_105 = arith.constant 2 : index
    %c4_106 = arith.constant 4 : index
    %c0_107 = arith.constant 0 : index
    %119 = vector.load %arg9[%c2_105, %c4_106, %c0_107] : memref<12x12x128xf32, #tpu.memory_space<vmem>>, vector<8x8x128xf32>
    %120 = vector.shape_cast %119 : vector<8x8x128xf32> to vector<64x128xf32>
    %121 = arith.truncf %120 : vector<64x128xf32> to vector<64x128xbf16>
    %c14 = arith.constant 14 : index
    %c0_108 = arith.constant 0 : index
    %c0_109 = arith.constant 0 : index
    %122 = vector.load %arg4[%c14, %c0_108, %c0_109] : memref<25x128x128xbf16, #tpu.memory_space<vmem>>, vector<1x128x128xbf16>
    %123 = vector.shape_cast %122 : vector<1x128x128xbf16> to vector<128x128xbf16>
    %cst_110 = arith.constant dense<0.000000e+00> : vector<64x128xf32>
    %124 = tpu.matmul %121, %123, %cst_110 {dimension_numbers = #tpu.dot_dimension_numbers<[1], [0], [0], [1], [0, 0, 1, 1], [], []>} : vector<64x128xbf16>, vector<128x128xbf16>, vector<64x128xf32> -> vector<64x128xf32>
    %125 = arith.addf %118, %124 : vector<64x128xf32>
    %c3_111 = arith.constant 3 : index
    %c0_112 = arith.constant 0 : index
    %c0_113 = arith.constant 0 : index
    %126 = vector.load %arg9[%c3_111, %c0_112, %c0_113] : memref<12x12x128xf32, #tpu.memory_space<vmem>>, vector<8x8x128xf32>
    %127 = vector.shape_cast %126 : vector<8x8x128xf32> to vector<64x128xf32>
    %128 = arith.truncf %127 : vector<64x128xf32> to vector<64x128xbf16>
    %c15 = arith.constant 15 : index
    %c0_114 = arith.constant 0 : index
    %c0_115 = arith.constant 0 : index
    %129 = vector.load %arg4[%c15, %c0_114, %c0_115] : memref<25x128x128xbf16, #tpu.memory_space<vmem>>, vector<1x128x128xbf16>
    %130 = vector.shape_cast %129 : vector<1x128x128xbf16> to vector<128x128xbf16>
    %cst_116 = arith.constant dense<0.000000e+00> : vector<64x128xf32>
    %131 = tpu.matmul %128, %130, %cst_116 {dimension_numbers = #tpu.dot_dimension_numbers<[1], [0], [0], [1], [0, 0, 1, 1], [], []>} : vector<64x128xbf16>, vector<128x128xbf16>, vector<64x128xf32> -> vector<64x128xf32>
    %132 = arith.addf %125, %131 : vector<64x128xf32>
    %c3_117 = arith.constant 3 : index
    %c1_118 = arith.constant 1 : index
    %c0_119 = arith.constant 0 : index
    %133 = vector.load %arg9[%c3_117, %c1_118, %c0_119] : memref<12x12x128xf32, #tpu.memory_space<vmem>>, vector<8x8x128xf32>
    %134 = vector.shape_cast %133 : vector<8x8x128xf32> to vector<64x128xf32>
    %135 = arith.truncf %134 : vector<64x128xf32> to vector<64x128xbf16>
    %c16 = arith.constant 16 : index
    %c0_120 = arith.constant 0 : index
    %c0_121 = arith.constant 0 : index
    %136 = vector.load %arg4[%c16, %c0_120, %c0_121] : memref<25x128x128xbf16, #tpu.memory_space<vmem>>, vector<1x128x128xbf16>
    %137 = vector.shape_cast %136 : vector<1x128x128xbf16> to vector<128x128xbf16>
    %cst_122 = arith.constant dense<0.000000e+00> : vector<64x128xf32>
    %138 = tpu.matmul %135, %137, %cst_122 {dimension_numbers = #tpu.dot_dimension_numbers<[1], [0], [0], [1], [0, 0, 1, 1], [], []>} : vector<64x128xbf16>, vector<128x128xbf16>, vector<64x128xf32> -> vector<64x128xf32>
    %139 = arith.addf %132, %138 : vector<64x128xf32>
    %c3_123 = arith.constant 3 : index
    %c2_124 = arith.constant 2 : index
    %c0_125 = arith.constant 0 : index
    %140 = vector.load %arg9[%c3_123, %c2_124, %c0_125] : memref<12x12x128xf32, #tpu.memory_space<vmem>>, vector<8x8x128xf32>
    %141 = vector.shape_cast %140 : vector<8x8x128xf32> to vector<64x128xf32>
    %142 = arith.truncf %141 : vector<64x128xf32> to vector<64x128xbf16>
    %c17 = arith.constant 17 : index
    %c0_126 = arith.constant 0 : index
    %c0_127 = arith.constant 0 : index
    %143 = vector.load %arg4[%c17, %c0_126, %c0_127] : memref<25x128x128xbf16, #tpu.memory_space<vmem>>, vector<1x128x128xbf16>
    %144 = vector.shape_cast %143 : vector<1x128x128xbf16> to vector<128x128xbf16>
    %cst_128 = arith.constant dense<0.000000e+00> : vector<64x128xf32>
    %145 = tpu.matmul %142, %144, %cst_128 {dimension_numbers = #tpu.dot_dimension_numbers<[1], [0], [0], [1], [0, 0, 1, 1], [], []>} : vector<64x128xbf16>, vector<128x128xbf16>, vector<64x128xf32> -> vector<64x128xf32>
    %146 = arith.addf %139, %145 : vector<64x128xf32>
    %c3_129 = arith.constant 3 : index
    %c3_130 = arith.constant 3 : index
    %c0_131 = arith.constant 0 : index
    %147 = vector.load %arg9[%c3_129, %c3_130, %c0_131] : memref<12x12x128xf32, #tpu.memory_space<vmem>>, vector<8x8x128xf32>
    %148 = vector.shape_cast %147 : vector<8x8x128xf32> to vector<64x128xf32>
    %149 = arith.truncf %148 : vector<64x128xf32> to vector<64x128xbf16>
    %c18 = arith.constant 18 : index
    %c0_132 = arith.constant 0 : index
    %c0_133 = arith.constant 0 : index
    %150 = vector.load %arg4[%c18, %c0_132, %c0_133] : memref<25x128x128xbf16, #tpu.memory_space<vmem>>, vector<1x128x128xbf16>
    %151 = vector.shape_cast %150 : vector<1x128x128xbf16> to vector<128x128xbf16>
    %cst_134 = arith.constant dense<0.000000e+00> : vector<64x128xf32>
    %152 = tpu.matmul %149, %151, %cst_134 {dimension_numbers = #tpu.dot_dimension_numbers<[1], [0], [0], [1], [0, 0, 1, 1], [], []>} : vector<64x128xbf16>, vector<128x128xbf16>, vector<64x128xf32> -> vector<64x128xf32>
    %153 = arith.addf %146, %152 : vector<64x128xf32>
    %c3_135 = arith.constant 3 : index
    %c4_136 = arith.constant 4 : index
    %c0_137 = arith.constant 0 : index
    %154 = vector.load %arg9[%c3_135, %c4_136, %c0_137] : memref<12x12x128xf32, #tpu.memory_space<vmem>>, vector<8x8x128xf32>
    %155 = vector.shape_cast %154 : vector<8x8x128xf32> to vector<64x128xf32>
    %156 = arith.truncf %155 : vector<64x128xf32> to vector<64x128xbf16>
    %c19 = arith.constant 19 : index
    %c0_138 = arith.constant 0 : index
    %c0_139 = arith.constant 0 : index
    %157 = vector.load %arg4[%c19, %c0_138, %c0_139] : memref<25x128x128xbf16, #tpu.memory_space<vmem>>, vector<1x128x128xbf16>
    %158 = vector.shape_cast %157 : vector<1x128x128xbf16> to vector<128x128xbf16>
    %cst_140 = arith.constant dense<0.000000e+00> : vector<64x128xf32>
    %159 = tpu.matmul %156, %158, %cst_140 {dimension_numbers = #tpu.dot_dimension_numbers<[1], [0], [0], [1], [0, 0, 1, 1], [], []>} : vector<64x128xbf16>, vector<128x128xbf16>, vector<64x128xf32> -> vector<64x128xf32>
    %160 = arith.addf %153, %159 : vector<64x128xf32>
    %c4_141 = arith.constant 4 : index
    %c0_142 = arith.constant 0 : index
    %c0_143 = arith.constant 0 : index
    %161 = vector.load %arg9[%c4_141, %c0_142, %c0_143] : memref<12x12x128xf32, #tpu.memory_space<vmem>>, vector<8x8x128xf32>
    %162 = vector.shape_cast %161 : vector<8x8x128xf32> to vector<64x128xf32>
    %163 = arith.truncf %162 : vector<64x128xf32> to vector<64x128xbf16>
    %c20 = arith.constant 20 : index
    %c0_144 = arith.constant 0 : index
    %c0_145 = arith.constant 0 : index
    %164 = vector.load %arg4[%c20, %c0_144, %c0_145] : memref<25x128x128xbf16, #tpu.memory_space<vmem>>, vector<1x128x128xbf16>
    %165 = vector.shape_cast %164 : vector<1x128x128xbf16> to vector<128x128xbf16>
    %cst_146 = arith.constant dense<0.000000e+00> : vector<64x128xf32>
    %166 = tpu.matmul %163, %165, %cst_146 {dimension_numbers = #tpu.dot_dimension_numbers<[1], [0], [0], [1], [0, 0, 1, 1], [], []>} : vector<64x128xbf16>, vector<128x128xbf16>, vector<64x128xf32> -> vector<64x128xf32>
    %167 = arith.addf %160, %166 : vector<64x128xf32>
    %c4_147 = arith.constant 4 : index
    %c1_148 = arith.constant 1 : index
    %c0_149 = arith.constant 0 : index
    %168 = vector.load %arg9[%c4_147, %c1_148, %c0_149] : memref<12x12x128xf32, #tpu.memory_space<vmem>>, vector<8x8x128xf32>
    %169 = vector.shape_cast %168 : vector<8x8x128xf32> to vector<64x128xf32>
    %170 = arith.truncf %169 : vector<64x128xf32> to vector<64x128xbf16>
    %c21 = arith.constant 21 : index
    %c0_150 = arith.constant 0 : index
    %c0_151 = arith.constant 0 : index
    %171 = vector.load %arg4[%c21, %c0_150, %c0_151] : memref<25x128x128xbf16, #tpu.memory_space<vmem>>, vector<1x128x128xbf16>
    %172 = vector.shape_cast %171 : vector<1x128x128xbf16> to vector<128x128xbf16>
    %cst_152 = arith.constant dense<0.000000e+00> : vector<64x128xf32>
    %173 = tpu.matmul %170, %172, %cst_152 {dimension_numbers = #tpu.dot_dimension_numbers<[1], [0], [0], [1], [0, 0, 1, 1], [], []>} : vector<64x128xbf16>, vector<128x128xbf16>, vector<64x128xf32> -> vector<64x128xf32>
    %174 = arith.addf %167, %173 : vector<64x128xf32>
    %c4_153 = arith.constant 4 : index
    %c2_154 = arith.constant 2 : index
    %c0_155 = arith.constant 0 : index
    %175 = vector.load %arg9[%c4_153, %c2_154, %c0_155] : memref<12x12x128xf32, #tpu.memory_space<vmem>>, vector<8x8x128xf32>
    %176 = vector.shape_cast %175 : vector<8x8x128xf32> to vector<64x128xf32>
    %177 = arith.truncf %176 : vector<64x128xf32> to vector<64x128xbf16>
    %c22 = arith.constant 22 : index
    %c0_156 = arith.constant 0 : index
    %c0_157 = arith.constant 0 : index
    %178 = vector.load %arg4[%c22, %c0_156, %c0_157] : memref<25x128x128xbf16, #tpu.memory_space<vmem>>, vector<1x128x128xbf16>
    %179 = vector.shape_cast %178 : vector<1x128x128xbf16> to vector<128x128xbf16>
    %cst_158 = arith.constant dense<0.000000e+00> : vector<64x128xf32>
    %180 = tpu.matmul %177, %179, %cst_158 {dimension_numbers = #tpu.dot_dimension_numbers<[1], [0], [0], [1], [0, 0, 1, 1], [], []>} : vector<64x128xbf16>, vector<128x128xbf16>, vector<64x128xf32> -> vector<64x128xf32>
    %181 = arith.addf %174, %180 : vector<64x128xf32>
    %c4_159 = arith.constant 4 : index
    %c3_160 = arith.constant 3 : index
    %c0_161 = arith.constant 0 : index
    %182 = vector.load %arg9[%c4_159, %c3_160, %c0_161] : memref<12x12x128xf32, #tpu.memory_space<vmem>>, vector<8x8x128xf32>
    %183 = vector.shape_cast %182 : vector<8x8x128xf32> to vector<64x128xf32>
    %184 = arith.truncf %183 : vector<64x128xf32> to vector<64x128xbf16>
    %c23 = arith.constant 23 : index
    %c0_162 = arith.constant 0 : index
    %c0_163 = arith.constant 0 : index
    %185 = vector.load %arg4[%c23, %c0_162, %c0_163] : memref<25x128x128xbf16, #tpu.memory_space<vmem>>, vector<1x128x128xbf16>
    %186 = vector.shape_cast %185 : vector<1x128x128xbf16> to vector<128x128xbf16>
    %cst_164 = arith.constant dense<0.000000e+00> : vector<64x128xf32>
    %187 = tpu.matmul %184, %186, %cst_164 {dimension_numbers = #tpu.dot_dimension_numbers<[1], [0], [0], [1], [0, 0, 1, 1], [], []>} : vector<64x128xbf16>, vector<128x128xbf16>, vector<64x128xf32> -> vector<64x128xf32>
    %188 = arith.addf %181, %187 : vector<64x128xf32>
    %c4_165 = arith.constant 4 : index
    %c4_166 = arith.constant 4 : index
    %c0_167 = arith.constant 0 : index
    %189 = vector.load %arg9[%c4_165, %c4_166, %c0_167] : memref<12x12x128xf32, #tpu.memory_space<vmem>>, vector<8x8x128xf32>
    %190 = vector.shape_cast %189 : vector<8x8x128xf32> to vector<64x128xf32>
    %191 = arith.truncf %190 : vector<64x128xf32> to vector<64x128xbf16>
    %c24 = arith.constant 24 : index
    %c0_168 = arith.constant 0 : index
    %c0_169 = arith.constant 0 : index
    %192 = vector.load %arg4[%c24, %c0_168, %c0_169] : memref<25x128x128xbf16, #tpu.memory_space<vmem>>, vector<1x128x128xbf16>
    %193 = vector.shape_cast %192 : vector<1x128x128xbf16> to vector<128x128xbf16>
    %cst_170 = arith.constant dense<0.000000e+00> : vector<64x128xf32>
    %194 = tpu.matmul %191, %193, %cst_170 {dimension_numbers = #tpu.dot_dimension_numbers<[1], [0], [0], [1], [0, 0, 1, 1], [], []>} : vector<64x128xbf16>, vector<128x128xbf16>, vector<64x128xf32> -> vector<64x128xf32>
    %195 = arith.addf %188, %194 : vector<64x128xf32>
    %c0_171 = arith.constant 0 : index
    %c0_172 = arith.constant 0 : index
    %196 = vector.load %arg5[%c0_171, %c0_172] : memref<1x128xf32, #tpu.memory_space<vmem>>, vector<1x128xf32>
    %197 = vector.broadcast %196 : vector<1x128xf32> to vector<64x128xf32>
    %198 = arith.addf %195, %197 : vector<64x128xf32>
    %cst_173 = arith.constant 0.000000e+00 : f32
    %199 = vector.broadcast %cst_173 : f32 to vector<64x128xf32>
    %200 = arith.maximumf %198, %199 : vector<64x128xf32>
    %201 = tpu.transpose %200, [1, 0] : vector<64x128xf32> -> vector<128x64xf32>
    %202 = arith.truncf %201 : vector<128x64xf32> to vector<128x64xbf16>
    %cst_174 = arith.constant 0.000000e+00 : f32
    %203 = vector.broadcast %cst_174 : f32 to vector<1x128xf32>
    %204 = vector.extract_strided_slice %202 {offsets = [0, 0], sizes = [1, 64], strides = [1, 1]} : vector<128x64xbf16> to vector<1x64xbf16>
    %c0_175 = arith.constant 0 : index
    %c0_176 = arith.constant 0 : index
    %c0_177 = arith.constant 0 : index
    %205 = vector.load %arg6[%c0_175, %c0_176, %c0_177] : memref<20x64x128xbf16, #tpu.memory_space<vmem>>, vector<1x64x128xbf16>
    %206 = vector.shape_cast %205 : vector<1x64x128xbf16> to vector<64x128xbf16>
    %cst_178 = arith.constant dense<0.000000e+00> : vector<1x128xf32>
    %207 = tpu.matmul %204, %206, %cst_178 {dimension_numbers = #tpu.dot_dimension_numbers<[1], [0], [0], [1], [0, 0, 1, 1], [], []>} : vector<1x64xbf16>, vector<64x128xbf16>, vector<1x128xf32> -> vector<1x128xf32>
    %208 = arith.addf %203, %207 : vector<1x128xf32>
    %209 = vector.extract_strided_slice %202 {offsets = [1, 0], sizes = [1, 64], strides = [1, 1]} : vector<128x64xbf16> to vector<1x64xbf16>
    %c1_179 = arith.constant 1 : index
    %c0_180 = arith.constant 0 : index
    %c0_181 = arith.constant 0 : index
    %210 = vector.load %arg6[%c1_179, %c0_180, %c0_181] : memref<20x64x128xbf16, #tpu.memory_space<vmem>>, vector<1x64x128xbf16>
    %211 = vector.shape_cast %210 : vector<1x64x128xbf16> to vector<64x128xbf16>
    %cst_182 = arith.constant dense<0.000000e+00> : vector<1x128xf32>
    %212 = tpu.matmul %209, %211, %cst_182 {dimension_numbers = #tpu.dot_dimension_numbers<[1], [0], [0], [1], [0, 0, 1, 1], [], []>} : vector<1x64xbf16>, vector<64x128xbf16>, vector<1x128xf32> -> vector<1x128xf32>
    %213 = arith.addf %208, %212 : vector<1x128xf32>
    %214 = vector.extract_strided_slice %202 {offsets = [2, 0], sizes = [1, 64], strides = [1, 1]} : vector<128x64xbf16> to vector<1x64xbf16>
    %c2_183 = arith.constant 2 : index
    %c0_184 = arith.constant 0 : index
    %c0_185 = arith.constant 0 : index
    %215 = vector.load %arg6[%c2_183, %c0_184, %c0_185] : memref<20x64x128xbf16, #tpu.memory_space<vmem>>, vector<1x64x128xbf16>
    %216 = vector.shape_cast %215 : vector<1x64x128xbf16> to vector<64x128xbf16>
    %cst_186 = arith.constant dense<0.000000e+00> : vector<1x128xf32>
    %217 = tpu.matmul %214, %216, %cst_186 {dimension_numbers = #tpu.dot_dimension_numbers<[1], [0], [0], [1], [0, 0, 1, 1], [], []>} : vector<1x64xbf16>, vector<64x128xbf16>, vector<1x128xf32> -> vector<1x128xf32>
    %218 = arith.addf %213, %217 : vector<1x128xf32>
    %219 = vector.extract_strided_slice %202 {offsets = [3, 0], sizes = [1, 64], strides = [1, 1]} : vector<128x64xbf16> to vector<1x64xbf16>
    %c3_187 = arith.constant 3 : index
    %c0_188 = arith.constant 0 : index
    %c0_189 = arith.constant 0 : index
    %220 = vector.load %arg6[%c3_187, %c0_188, %c0_189] : memref<20x64x128xbf16, #tpu.memory_space<vmem>>, vector<1x64x128xbf16>
    %221 = vector.shape_cast %220 : vector<1x64x128xbf16> to vector<64x128xbf16>
    %cst_190 = arith.constant dense<0.000000e+00> : vector<1x128xf32>
    %222 = tpu.matmul %219, %221, %cst_190 {dimension_numbers = #tpu.dot_dimension_numbers<[1], [0], [0], [1], [0, 0, 1, 1], [], []>} : vector<1x64xbf16>, vector<64x128xbf16>, vector<1x128xf32> -> vector<1x128xf32>
    %223 = arith.addf %218, %222 : vector<1x128xf32>
    %224 = vector.extract_strided_slice %202 {offsets = [4, 0], sizes = [1, 64], strides = [1, 1]} : vector<128x64xbf16> to vector<1x64xbf16>
    %c4_191 = arith.constant 4 : index
    %c0_192 = arith.constant 0 : index
    %c0_193 = arith.constant 0 : index
    %225 = vector.load %arg6[%c4_191, %c0_192, %c0_193] : memref<20x64x128xbf16, #tpu.memory_space<vmem>>, vector<1x64x128xbf16>
    %226 = vector.shape_cast %225 : vector<1x64x128xbf16> to vector<64x128xbf16>
    %cst_194 = arith.constant dense<0.000000e+00> : vector<1x128xf32>
    %227 = tpu.matmul %224, %226, %cst_194 {dimension_numbers = #tpu.dot_dimension_numbers<[1], [0], [0], [1], [0, 0, 1, 1], [], []>} : vector<1x64xbf16>, vector<64x128xbf16>, vector<1x128xf32> -> vector<1x128xf32>
    %228 = arith.addf %223, %227 : vector<1x128xf32>
    %229 = vector.extract_strided_slice %202 {offsets = [5, 0], sizes = [1, 64], strides = [1, 1]} : vector<128x64xbf16> to vector<1x64xbf16>
    %c5_195 = arith.constant 5 : index
    %c0_196 = arith.constant 0 : index
    %c0_197 = arith.constant 0 : index
    %230 = vector.load %arg6[%c5_195, %c0_196, %c0_197] : memref<20x64x128xbf16, #tpu.memory_space<vmem>>, vector<1x64x128xbf16>
    %231 = vector.shape_cast %230 : vector<1x64x128xbf16> to vector<64x128xbf16>
    %cst_198 = arith.constant dense<0.000000e+00> : vector<1x128xf32>
    %232 = tpu.matmul %229, %231, %cst_198 {dimension_numbers = #tpu.dot_dimension_numbers<[1], [0], [0], [1], [0, 0, 1, 1], [], []>} : vector<1x64xbf16>, vector<64x128xbf16>, vector<1x128xf32> -> vector<1x128xf32>
    %233 = arith.addf %228, %232 : vector<1x128xf32>
    %234 = vector.extract_strided_slice %202 {offsets = [6, 0], sizes = [1, 64], strides = [1, 1]} : vector<128x64xbf16> to vector<1x64xbf16>
    %c6_199 = arith.constant 6 : index
    %c0_200 = arith.constant 0 : index
    %c0_201 = arith.constant 0 : index
    %235 = vector.load %arg6[%c6_199, %c0_200, %c0_201] : memref<20x64x128xbf16, #tpu.memory_space<vmem>>, vector<1x64x128xbf16>
    %236 = vector.shape_cast %235 : vector<1x64x128xbf16> to vector<64x128xbf16>
    %cst_202 = arith.constant dense<0.000000e+00> : vector<1x128xf32>
    %237 = tpu.matmul %234, %236, %cst_202 {dimension_numbers = #tpu.dot_dimension_numbers<[1], [0], [0], [1], [0, 0, 1, 1], [], []>} : vector<1x64xbf16>, vector<64x128xbf16>, vector<1x128xf32> -> vector<1x128xf32>
    %238 = arith.addf %233, %237 : vector<1x128xf32>
    %239 = vector.extract_strided_slice %202 {offsets = [7, 0], sizes = [1, 64], strides = [1, 1]} : vector<128x64xbf16> to vector<1x64xbf16>
    %c7_203 = arith.constant 7 : index
    %c0_204 = arith.constant 0 : index
    %c0_205 = arith.constant 0 : index
    %240 = vector.load %arg6[%c7_203, %c0_204, %c0_205] : memref<20x64x128xbf16, #tpu.memory_space<vmem>>, vector<1x64x128xbf16>
    %241 = vector.shape_cast %240 : vector<1x64x128xbf16> to vector<64x128xbf16>
    %cst_206 = arith.constant dense<0.000000e+00> : vector<1x128xf32>
    %242 = tpu.matmul %239, %241, %cst_206 {dimension_numbers = #tpu.dot_dimension_numbers<[1], [0], [0], [1], [0, 0, 1, 1], [], []>} : vector<1x64xbf16>, vector<64x128xbf16>, vector<1x128xf32> -> vector<1x128xf32>
    %243 = arith.addf %238, %242 : vector<1x128xf32>
    %244 = vector.extract_strided_slice %202 {offsets = [8, 0], sizes = [1, 64], strides = [1, 1]} : vector<128x64xbf16> to vector<1x64xbf16>
    %c8_207 = arith.constant 8 : index
    %c0_208 = arith.constant 0 : index
    %c0_209 = arith.constant 0 : index
    %245 = vector.load %arg6[%c8_207, %c0_208, %c0_209] : memref<20x64x128xbf16, #tpu.memory_space<vmem>>, vector<1x64x128xbf16>
    %246 = vector.shape_cast %245 : vector<1x64x128xbf16> to vector<64x128xbf16>
    %cst_210 = arith.constant dense<0.000000e+00> : vector<1x128xf32>
    %247 = tpu.matmul %244, %246, %cst_210 {dimension_numbers = #tpu.dot_dimension_numbers<[1], [0], [0], [1], [0, 0, 1, 1], [], []>} : vector<1x64xbf16>, vector<64x128xbf16>, vector<1x128xf32> -> vector<1x128xf32>
    %248 = arith.addf %243, %247 : vector<1x128xf32>
    %249 = vector.extract_strided_slice %202 {offsets = [9, 0], sizes = [1, 64], strides = [1, 1]} : vector<128x64xbf16> to vector<1x64xbf16>
    %c9_211 = arith.constant 9 : index
    %c0_212 = arith.constant 0 : index
    %c0_213 = arith.constant 0 : index
    %250 = vector.load %arg6[%c9_211, %c0_212, %c0_213] : memref<20x64x128xbf16, #tpu.memory_space<vmem>>, vector<1x64x128xbf16>
    %251 = vector.shape_cast %250 : vector<1x64x128xbf16> to vector<64x128xbf16>
    %cst_214 = arith.constant dense<0.000000e+00> : vector<1x128xf32>
    %252 = tpu.matmul %249, %251, %cst_214 {dimension_numbers = #tpu.dot_dimension_numbers<[1], [0], [0], [1], [0, 0, 1, 1], [], []>} : vector<1x64xbf16>, vector<64x128xbf16>, vector<1x128xf32> -> vector<1x128xf32>
    %253 = arith.addf %248, %252 : vector<1x128xf32>
    %254 = vector.extract_strided_slice %202 {offsets = [10, 0], sizes = [1, 64], strides = [1, 1]} : vector<128x64xbf16> to vector<1x64xbf16>
    %c10_215 = arith.constant 10 : index
    %c0_216 = arith.constant 0 : index
    %c0_217 = arith.constant 0 : index
    %255 = vector.load %arg6[%c10_215, %c0_216, %c0_217] : memref<20x64x128xbf16, #tpu.memory_space<vmem>>, vector<1x64x128xbf16>
    %256 = vector.shape_cast %255 : vector<1x64x128xbf16> to vector<64x128xbf16>
    %cst_218 = arith.constant dense<0.000000e+00> : vector<1x128xf32>
    %257 = tpu.matmul %254, %256, %cst_218 {dimension_numbers = #tpu.dot_dimension_numbers<[1], [0], [0], [1], [0, 0, 1, 1], [], []>} : vector<1x64xbf16>, vector<64x128xbf16>, vector<1x128xf32> -> vector<1x128xf32>
    %258 = arith.addf %253, %257 : vector<1x128xf32>
    %259 = vector.extract_strided_slice %202 {offsets = [11, 0], sizes = [1, 64], strides = [1, 1]} : vector<128x64xbf16> to vector<1x64xbf16>
    %c11_219 = arith.constant 11 : index
    %c0_220 = arith.constant 0 : index
    %c0_221 = arith.constant 0 : index
    %260 = vector.load %arg6[%c11_219, %c0_220, %c0_221] : memref<20x64x128xbf16, #tpu.memory_space<vmem>>, vector<1x64x128xbf16>
    %261 = vector.shape_cast %260 : vector<1x64x128xbf16> to vector<64x128xbf16>
    %cst_222 = arith.constant dense<0.000000e+00> : vector<1x128xf32>
    %262 = tpu.matmul %259, %261, %cst_222 {dimension_numbers = #tpu.dot_dimension_numbers<[1], [0], [0], [1], [0, 0, 1, 1], [], []>} : vector<1x64xbf16>, vector<64x128xbf16>, vector<1x128xf32> -> vector<1x128xf32>
    %263 = arith.addf %258, %262 : vector<1x128xf32>
    %264 = vector.extract_strided_slice %202 {offsets = [12, 0], sizes = [1, 64], strides = [1, 1]} : vector<128x64xbf16> to vector<1x64xbf16>
    %c12_223 = arith.constant 12 : index
    %c0_224 = arith.constant 0 : index
    %c0_225 = arith.constant 0 : index
    %265 = vector.load %arg6[%c12_223, %c0_224, %c0_225] : memref<20x64x128xbf16, #tpu.memory_space<vmem>>, vector<1x64x128xbf16>
    %266 = vector.shape_cast %265 : vector<1x64x128xbf16> to vector<64x128xbf16>
    %cst_226 = arith.constant dense<0.000000e+00> : vector<1x128xf32>
    %267 = tpu.matmul %264, %266, %cst_226 {dimension_numbers = #tpu.dot_dimension_numbers<[1], [0], [0], [1], [0, 0, 1, 1], [], []>} : vector<1x64xbf16>, vector<64x128xbf16>, vector<1x128xf32> -> vector<1x128xf32>
    %268 = arith.addf %263, %267 : vector<1x128xf32>
    %269 = vector.extract_strided_slice %202 {offsets = [13, 0], sizes = [1, 64], strides = [1, 1]} : vector<128x64xbf16> to vector<1x64xbf16>
    %c13_227 = arith.constant 13 : index
    %c0_228 = arith.constant 0 : index
    %c0_229 = arith.constant 0 : index
    %270 = vector.load %arg6[%c13_227, %c0_228, %c0_229] : memref<20x64x128xbf16, #tpu.memory_space<vmem>>, vector<1x64x128xbf16>
    %271 = vector.shape_cast %270 : vector<1x64x128xbf16> to vector<64x128xbf16>
    %cst_230 = arith.constant dense<0.000000e+00> : vector<1x128xf32>
    %272 = tpu.matmul %269, %271, %cst_230 {dimension_numbers = #tpu.dot_dimension_numbers<[1], [0], [0], [1], [0, 0, 1, 1], [], []>} : vector<1x64xbf16>, vector<64x128xbf16>, vector<1x128xf32> -> vector<1x128xf32>
    %273 = arith.addf %268, %272 : vector<1x128xf32>
    %274 = vector.extract_strided_slice %202 {offsets = [14, 0], sizes = [1, 64], strides = [1, 1]} : vector<128x64xbf16> to vector<1x64xbf16>
    %c14_231 = arith.constant 14 : index
    %c0_232 = arith.constant 0 : index
    %c0_233 = arith.constant 0 : index
    %275 = vector.load %arg6[%c14_231, %c0_232, %c0_233] : memref<20x64x128xbf16, #tpu.memory_space<vmem>>, vector<1x64x128xbf16>
    %276 = vector.shape_cast %275 : vector<1x64x128xbf16> to vector<64x128xbf16>
    %cst_234 = arith.constant dense<0.000000e+00> : vector<1x128xf32>
    %277 = tpu.matmul %274, %276, %cst_234 {dimension_numbers = #tpu.dot_dimension_numbers<[1], [0], [0], [1], [0, 0, 1, 1], [], []>} : vector<1x64xbf16>, vector<64x128xbf16>, vector<1x128xf32> -> vector<1x128xf32>
    %278 = arith.addf %273, %277 : vector<1x128xf32>
    %279 = vector.extract_strided_slice %202 {offsets = [15, 0], sizes = [1, 64], strides = [1, 1]} : vector<128x64xbf16> to vector<1x64xbf16>
    %c15_235 = arith.constant 15 : index
    %c0_236 = arith.constant 0 : index
    %c0_237 = arith.constant 0 : index
    %280 = vector.load %arg6[%c15_235, %c0_236, %c0_237] : memref<20x64x128xbf16, #tpu.memory_space<vmem>>, vector<1x64x128xbf16>
    %281 = vector.shape_cast %280 : vector<1x64x128xbf16> to vector<64x128xbf16>
    %cst_238 = arith.constant dense<0.000000e+00> : vector<1x128xf32>
    %282 = tpu.matmul %279, %281, %cst_238 {dimension_numbers = #tpu.dot_dimension_numbers<[1], [0], [0], [1], [0, 0, 1, 1], [], []>} : vector<1x64xbf16>, vector<64x128xbf16>, vector<1x128xf32> -> vector<1x128xf32>
    %283 = arith.addf %278, %282 : vector<1x128xf32>
    %284 = vector.extract_strided_slice %202 {offsets = [16, 0], sizes = [1, 64], strides = [1, 1]} : vector<128x64xbf16> to vector<1x64xbf16>
    %c16_239 = arith.constant 16 : index
    %c0_240 = arith.constant 0 : index
    %c0_241 = arith.constant 0 : index
    %285 = vector.load %arg6[%c16_239, %c0_240, %c0_241] : memref<20x64x128xbf16, #tpu.memory_space<vmem>>, vector<1x64x128xbf16>
    %286 = vector.shape_cast %285 : vector<1x64x128xbf16> to vector<64x128xbf16>
    %cst_242 = arith.constant dense<0.000000e+00> : vector<1x128xf32>
    %287 = tpu.matmul %284, %286, %cst_242 {dimension_numbers = #tpu.dot_dimension_numbers<[1], [0], [0], [1], [0, 0, 1, 1], [], []>} : vector<1x64xbf16>, vector<64x128xbf16>, vector<1x128xf32> -> vector<1x128xf32>
    %288 = arith.addf %283, %287 : vector<1x128xf32>
    %289 = vector.extract_strided_slice %202 {offsets = [17, 0], sizes = [1, 64], strides = [1, 1]} : vector<128x64xbf16> to vector<1x64xbf16>
    %c17_243 = arith.constant 17 : index
    %c0_244 = arith.constant 0 : index
    %c0_245 = arith.constant 0 : index
    %290 = vector.load %arg6[%c17_243, %c0_244, %c0_245] : memref<20x64x128xbf16, #tpu.memory_space<vmem>>, vector<1x64x128xbf16>
    %291 = vector.shape_cast %290 : vector<1x64x128xbf16> to vector<64x128xbf16>
    %cst_246 = arith.constant dense<0.000000e+00> : vector<1x128xf32>
    %292 = tpu.matmul %289, %291, %cst_246 {dimension_numbers = #tpu.dot_dimension_numbers<[1], [0], [0], [1], [0, 0, 1, 1], [], []>} : vector<1x64xbf16>, vector<64x128xbf16>, vector<1x128xf32> -> vector<1x128xf32>
    %293 = arith.addf %288, %292 : vector<1x128xf32>
    %294 = vector.extract_strided_slice %202 {offsets = [18, 0], sizes = [1, 64], strides = [1, 1]} : vector<128x64xbf16> to vector<1x64xbf16>
    %c18_247 = arith.constant 18 : index
    %c0_248 = arith.constant 0 : index
    %c0_249 = arith.constant 0 : index
    %295 = vector.load %arg6[%c18_247, %c0_248, %c0_249] : memref<20x64x128xbf16, #tpu.memory_space<vmem>>, vector<1x64x128xbf16>
    %296 = vector.shape_cast %295 : vector<1x64x128xbf16> to vector<64x128xbf16>
    %cst_250 = arith.constant dense<0.000000e+00> : vector<1x128xf32>
    %297 = tpu.matmul %294, %296, %cst_250 {dimension_numbers = #tpu.dot_dimension_numbers<[1], [0], [0], [1], [0, 0, 1, 1], [], []>} : vector<1x64xbf16>, vector<64x128xbf16>, vector<1x128xf32> -> vector<1x128xf32>
    %298 = arith.addf %293, %297 : vector<1x128xf32>
    %299 = vector.extract_strided_slice %202 {offsets = [19, 0], sizes = [1, 64], strides = [1, 1]} : vector<128x64xbf16> to vector<1x64xbf16>
    %c19_251 = arith.constant 19 : index
    %c0_252 = arith.constant 0 : index
    %c0_253 = arith.constant 0 : index
    %300 = vector.load %arg6[%c19_251, %c0_252, %c0_253] : memref<20x64x128xbf16, #tpu.memory_space<vmem>>, vector<1x64x128xbf16>
    %301 = vector.shape_cast %300 : vector<1x64x128xbf16> to vector<64x128xbf16>
    %cst_254 = arith.constant dense<0.000000e+00> : vector<1x128xf32>
    %302 = tpu.matmul %299, %301, %cst_254 {dimension_numbers = #tpu.dot_dimension_numbers<[1], [0], [0], [1], [0, 0, 1, 1], [], []>} : vector<1x64xbf16>, vector<64x128xbf16>, vector<1x128xf32> -> vector<1x128xf32>
    %303 = arith.addf %298, %302 : vector<1x128xf32>
    %cst_255 = arith.constant 0.000000e+00 : f32
    %304 = vector.broadcast %cst_255 : f32 to vector<1x128xf32>
    %305 = arith.maximumf %303, %304 : vector<1x128xf32>
    %306 = tpu.iota {dimensions = array<i32: 1>} : vector<1x128xi32>
    %c10_i32 = arith.constant 10 : i32
    %307 = vector.broadcast %c10_i32 : i32 to vector<1x128xi32>
    %308 = arith.cmpi slt, %306, %307 : vector<1x128xi32>
    %cst_256 = arith.constant -1.000000e+30 : f32
    %309 = vector.broadcast %cst_256 : f32 to vector<1x128xf32>
    %310 = arith.select %308, %305, %309 : vector<1x128xi1>, vector<1x128xf32>
    %cst_257 = arith.constant dense<0xFF800000> : vector<1xf32>
    %311 = vector.multi_reduction <maximumf>, %310, %cst_257 [1] : vector<1x128xf32> to vector<1xf32>
    %312 = vector.shape_cast %311 : vector<1xf32> to vector<1x1xf32>
    %313 = vector.broadcast %312 : vector<1x1xf32> to vector<1x128xf32>
    %314 = arith.subf %310, %313 : vector<1x128xf32>
    %315 = math.exp %314 : vector<1x128xf32>
    %cst_258 = arith.constant dense<0.000000e+00> : vector<1xf32>
    %316 = vector.multi_reduction <add>, %315, %cst_258 [1] : vector<1x128xf32> to vector<1xf32>
    %317 = vector.shape_cast %316 : vector<1xf32> to vector<1x1xf32>
    %318 = tpu.reciprocal %317 {approx = true} : vector<1x1xf32> -> vector<1x1xf32>
    %319 = vector.broadcast %318 : vector<1x1xf32> to vector<1x128xf32>
    %320 = arith.mulf %315, %319 : vector<1x128xf32>
    %c0_259 = arith.constant 0 : index
    %c0_260 = arith.constant 0 : index
    %c0_261 = arith.constant 0 : index
    %321 = vector.load %arg7[%c0_259, %c0_260, %c0_261] : memref<1x1x128xf32, #tpu.memory_space<vmem>>, vector<1x1x128xf32>
    %322 = vector.shape_cast %321 : vector<1x1x128xf32> to vector<1x128xf32>
    %323 = vector.shape_cast %320 : vector<1x128xf32> to vector<1x1x128xf32>
    tpu.vector_store %arg7[%c0_259, %c0_260, %c0_261], %323 {strides = array<i32>} : memref<1x1x128xf32, #tpu.memory_space<vmem>>, vector<1x1x128xf32>,
    return
  }
  func.func @transform_0(%arg0: i32) -> (i32, i32, i32) {
    %c0_i32 = arith.constant 0 : i32
    %c0_i32_0 = arith.constant 0 : i32
    %c0_i32_1 = arith.constant 0 : i32
    return %arg0, %c0_i32, %c0_i32_0 : i32, i32, i32
  }
  func.func @transform_1(%arg0: i32) -> (i32, i32) {
    %c0_i32 = arith.constant 0 : i32
    %c0_i32_0 = arith.constant 0 : i32
    %c0_i32_1 = arith.constant 0 : i32
    return %c0_i32, %c0_i32_0 : i32, i32
  }
  func.func @transform_2(%arg0: i32) -> (i32, i32) {
    %c0_i32 = arith.constant 0 : i32
    %c0_i32_0 = arith.constant 0 : i32
    %c0_i32_1 = arith.constant 0 : i32
    return %c0_i32, %c0_i32_0 : i32, i32
  }
  func.func @transform_3(%arg0: i32) -> (i32, i32, i32) {
    %c0_i32 = arith.constant 0 : i32
    %c0_i32_0 = arith.constant 0 : i32
    %c0_i32_1 = arith.constant 0 : i32
    %c0_i32_2 = arith.constant 0 : i32
    return %c0_i32, %c0_i32_0, %c0_i32_1 : i32, i32, i32
  }
  func.func @transform_4(%arg0: i32) -> (i32, i32) {
    %c0_i32 = arith.constant 0 : i32
    %c0_i32_0 = arith.constant 0 : i32
    %c0_i32_1 = arith.constant 0 : i32
    return %c0_i32, %c0_i32_0 : i32, i32
  }
  func.func @transform_5(%arg0: i32) -> (i32, i32, i32) {
    %c0_i32 = arith.constant 0 : i32
    %c0_i32_0 = arith.constant 0 : i32
    %c0_i32_1 = arith.constant 0 : i32
    %c0_i32_2 = arith.constant 0 : i32
    return %c0_i32, %c0_i32_0, %c0_i32_1 : i32, i32, i32
  }
  func.func @transform_6(%arg0: i32) -> (i32, i32, i32) {
    %c0_i32 = arith.constant 0 : i32
    %c0_i32_0 = arith.constant 0 : i32
    %c0_i32_1 = arith.constant 0 : i32
    return %arg0, %c0_i32, %c0_i32_0 : i32, i32, i32
  }
}

</mosaic_0001>

<bundles_post_ra>
// kernel: convnet_forward.1
= control target key start
LH: loop header
LB: loop body
LE: loop exit
PB: predicated region body
PF: predicated region fallthrough
CT: control target
= control target key end

     0   :  { %11 = vsyncpa [#allocation5], 0  ;;  %s11289_s0 = inlined_call_operand.vmem [shape: bf16[2,576,25], index: 0, kind: input, shape index: {}]   ;;  %s11290_s1 = inlined_call_operand.vmem [shape: bf16[25,128], index: 1, kind: input, shape index: {}]   ;;  %s11291_s2 = inlined_call_operand.vmem [shape: f32[1,128], index: 2, kind: input, shape index: {}]   ;;  %s11292_s3 = inlined_call_operand.vmem [shape: bf16[25,128,128], index: 3, kind: input, shape index: {}]   ;;  %s11293_s4 = inlined_call_operand.vmem [shape: f32[1,128], index: 4, kind: input, shape index: {}]   ;;  %s11294_s5 = inlined_call_operand.vmem [shape: bf16[20,64,128], index: 5, kind: input, shape index: {}]   ;;  %s11295_s6 = inlined_call_operand.hbm [shape: f32[2,1,128], index: 6, kind: output, shape index: {}]  }
   0x1   :  { %13 = vsyncpa [#allocation5 + $0x1], 0  ;;  %s9709_s21 = smov 0   ;;  %s9711_s22 = smov 0  }
   0x2   :  { %s9713_s23 = smov 0   ;;  %s9715_s24 = smov 0  }
   0x3 LB: > { %s9730_s25 = sadd.s32 4294967295, %s9668_s24   ;;  %s6688_s26 = sadd.s32 4294967294, %s9668_s24   ;;  %s9668_s24 = sphi %s9715_s24, %s11301_s24   ;;  %s9664_s23 = sphi %s9713_s23, %s11300_s23   ;;  %s9660_s22 = sphi %s9711_s22, %s11299_s22   ;;  %s9656_s21 = sphi %s9709_s21, %s11298_s21  }
   0x4   : > { %s9734_s27 = sadd.s32 1, %s9668_s24   ;;  %s157_s28 = sadd.s32 1, %s9664_s23 }
   0x5   : > { %s154_s29 = ssub.s32 %s9668_s24, %s9734_s27  ;;  %p167_p0 = scmp.ne.s32.totalorder %s9664_s23, %s9660_s22 }
   0x6   : > { %p155_p1 = scmp.eq.s32.totalorder %s154_s29, 0  ;;  %p168_p2 = scmp.eq.s32.totalorder %s9730_s25, 1 }
   0x7   : > { %p173_p3 = scmp.ne.s32.totalorder %s9660_s22, %s9656_s21  ;;  %p174_p4 = scmp.eq.s32.totalorder %s6688_s26, 1 }
   0x8   : > { %s9745_s30 = scalar_select %p155_p1, %s9664_s23, %s157_s28  }
   0x9   : > { %p9747_p5 = por %p168_p2, %p167_p0  ;;  %p9751_p6 = por %p174_p4, %p173_p3 }
   0xa   : > { %p6691_p7 = scmp.ge.s32.totalorder %s9668_s24, 1  ;;  %p215_p8 = scmp.lt.s32.totalorder %s9668_s24, 3 }
   0xc   : > { %p216_p9 = pnand %p6691_p7, %p215_p8 }
   0xd   : > { %v9270_v0 = vld [vmem:[%s11290_s1] sm:$0xff] (!%p216_p9)   ;;  %vm633_vm0 = vcmask (!%p216_p9), 1043456   ;;  %v9271_v1 = vld [vmem:[%s11290_s1 + $0x8] sm:$0x1f] (!%p216_p9)   ;;  %vm634_vm1 = vcmask (!%p216_p9), 1044480   ;;  %p244_p10 = scmp.lt.s32.totalorder (!%p216_p9), %s9730_s25, 1 }
   0xe   : > { %219 = sbr.rel (%p216_p9) target bundleno = 2114 (0x842), region = 44  ;;  %8046 = vmatprep.subr.bf16.mxu0 (!%p216_p9), %v9270_v0  ;;  %v9670_v2 = vmov (!%p216_p9), 65535   ;;  %vm524_vm2 = vcmask (!%p216_p9), 203776   ;;  %v9306_v39 = vld [vmem:[%s11292_s3 + $0x40] sm:$0xff] (!%p216_p9)   ;;  %v9307_v41 = vld [vmem:[%s11292_s3 + $0x48] sm:$0xff] (!%p216_p9)   ;;  %v9310_v43 = vld [vmem:[%s11292_s3 + $0x50] sm:$0xff] (!%p216_p9)  }
   0xf   : > { %8047 = vmatpush3.bf16.msra.mxu0 (!%p216_p9), %v9270_v0  ;;  %v635_v3 = vsel (!%p216_p9), %vm633_vm0, 4294967295, %v9670_v2  ;;  %v9311_v45 = vld [vmem:[%s11292_s3 + $0x58] sm:$0xff] (!%p216_p9)   ;;  %v9312_v46 = vld [vmem:[%s11292_s3 + $0x60] sm:$0xff] (!%p216_p9)   ;;  %v9314_v48 = vld [vmem:[%s11292_s3 + $0x68] sm:$0xff] (!%p216_p9)   ;;  %vm9672_vm3 = vmmov (!%p216_p9), 0   ;;  %vm5086_vm4 = vcmask (!%p216_p9), 523264  }
  0x10   : > { %v636_v4 = vsel (!%p216_p9), %vm634_vm1, %v635_v3, 0  ;;  %v9313_v47 = vld [vmem:[%s11292_s3 + $0x180] sm:$0xff] (!%p216_p9)   ;;  %v9315_v49 = vld [vmem:[%s11292_s3 + $0x188] sm:$0xff] (!%p216_p9)   ;;  %v9316_v50 = vld [vmem:[%s11292_s3 + $0x70] sm:$0xff] (!%p216_p9)   ;;  %vm6607_vm6 = vcmask (!%p216_p9), 1040384   ;;  %s7605_s15 = sshll.u32 (!%p216_p9), %s9730_s25, 4 }
  0x11   : > { %v638_v5 = vand.u32 (!%p216_p9), %v9271_v1, %v636_v4  ;;  %8266 = vmatprep.subr.bf16.mxu1 (!%p216_p9), %v9313_v47  ;;  %v9317_v51 = vld [vmem:[%s11292_s3 + $0x190] sm:$0xff] (!%p216_p9)   ;;  %v9318_v52 = vld [vmem:[%s11292_s3 + $0x78] sm:$0xff] (!%p216_p9)   ;;  %v9320_v54 = vld [vmem:[%s11292_s3 + $0x1a0] sm:$0xff] (!%p216_p9)   ;;  %s11247_s20 = scalar_lea.hbm (!%p216_p9), %s11295_s6, %s7605_s15 }
  0x12   : > { %8267 = vmatpush3.bf16.msra.mxu1 (!%p216_p9), %v9313_v47  ;;  %v9319_v53 = vld [vmem:[%s11292_s3 + $0x198] sm:$0xff] (!%p216_p9)   ;;  %v9321_v55 = vld [vmem:[%s11292_s3 + $0x1a8] sm:$0xff] (!%p216_p9)   ;;  %v9322_v56 = vld [vmem:[%s11292_s3 + $0x1b0] sm:$0xff] (!%p216_p9)  }
  0x13   : > { %8048 = vmatprep.subr.bf16.mxu0 (!%p216_p9), %v638_v5  ;;  %8268 = vmatprep.subr.bf16.mxu1 (!%p216_p9), %v9315_v49  ;;  %v9323_v57 = vld [vmem:[%s11292_s3 + $0x1b8] sm:$0xff] (!%p216_p9)   ;;  %v9893_v58 = vld [vmem:[%s11292_s3] sm:$0xff] (!%p216_p9)  }
  0x14   : > { %8049 = vmatpush3.bf16.msra.mxu0 (!%p216_p9), %v638_v5  ;;  %v9899_v59 = vld [vmem:[%s11292_s3 + $0x1c0] sm:$0xff] (!%p216_p9)  }
  0x15   : > { %s245_s13 = scalar_select %p244_p10, %s9730_s25, 1  ;;  %8122 = vmatprep.subr.bf16.mxu0 %v9306_v39  ;;  %v9905_v60 = vld [vmem:[%s11291_s2] ss:$0 sm:$0xff] }
  0x16   : > { %8269 = vmatpush3.bf16.msra.mxu1 %v9315_v49  ;;  %s9673_s25 = smov [#allocation4]  }
  0x17   : > { %s9227_s14 = smul.u32 288, %s245_s13  ;;  %8270 = vmatprep.subr.bf16.mxu1 %v9317_v51  ;;  %s9610_s29 = sshll.u32 %s9673_s25, 4  ;;  %s9611_s29 = int_to_ptr.vmem [resolvable:$false] %s9610_s29 }
  0x18   : > { %s9612_s9 = scalar_lea.vmem %s9611_s29, 32 }
  0x19   : > { %s9768_s17 = scalar_lea.vmem %s11289_s0, %s9227_s14  ;;  %s242_s14 = sand.u32 1, %s9660_s22  }
  0x1a   : > { %v9272_v6 = vld [vmem:[%s9768_s17] sm:$0xff]   ;;  %v9273_v7 = vld [vmem:[%s9768_s17 + $0x8] sm:$0xff]   ;;  %v9274_v8 = vld [vmem:[%s9768_s17 + $0x10] sm:$0xff]   ;;  %8271 = vmatpush3.bf16.msra.mxu1 %v9317_v51  ;;  %s243_s16 = scalar_lea.vmem [#allocation4], %s242_s14  ;;  %s6621_s26 = scalar_lea.sflag [#allocation5], %s242_s14 }
  0x1b   : > { %8050 = vmatprep.mubr.msk.bf16.mxu0 %vm524_vm2, %v9272_v6  ;;  %v9275_v9 = vld [vmem:[%s9768_s17 + $0x18] sm:$0xff]   ;;  %v9276_v10 = vld [vmem:[%s9768_s17 + $0x20] sm:$0xff]   ;;  %v9277_v11 = vld [vmem:[%s9768_s17 + $0x28] sm:$0xff]   ;;  %8272 = vmatprep.subr.bf16.mxu1 %v9319_v53 }
  0x1c   : > { %8051 = vmatmul.mubr.msk.bf16.vlgmr.msra.gmra.mrb[0].mxu0 %vm524_vm2, %v9273_v7  ;;  %v9278_v12 = vld [vmem:[%s9768_s17 + $0x30] sm:$0xff]   ;;  %v9279_v13 = vld [vmem:[%s9768_s17 + $0x38] sm:$0xff]   ;;  %v9280_v14 = vld [vmem:[%s9768_s17 + $0x40] sm:$0xff]  }
  0x1d   : > { %8054 = vmatprep.mubr.msk.bf16.mxu0 %vm524_vm2, %v9274_v8  ;;  %v9281_v15 = vld [vmem:[%s9768_s17 + $0x48] sm:$0xff]   ;;  %v9282_v16 = vld [vmem:[%s9768_s17 + $0x50] sm:$0xff]   ;;  %v9283_v17 = vld [vmem:[%s9768_s17 + $0x58] sm:$0xff]   ;;  %8123 = vmatpush3.bf16.msra.mxu0 %v9306_v39 }
  0x1e   : > { %v9284_v18 = vld [vmem:[%s9768_s17 + $0x60] sm:$0xff]   ;;  %v9285_v19 = vld [vmem:[%s9768_s17 + $0x68] sm:$0xff]   ;;  %v9286_v20 = vld [vmem:[%s9768_s17 + $0x70] sm:$0xff]   ;;  %8124 = vmatprep.subr.bf16.mxu0 %v9307_v41  ;;  %8273 = vmatpush3.bf16.msra.mxu1 %v9319_v53 }
  0x1f   : > { %v9287_v21 = vld [vmem:[%s9768_s17 + $0x78] sm:$0xff]   ;;  %v9288_v22 = vld [vmem:[%s9768_s17 + $0x80] sm:$0xff]   ;;  %v9289_v23 = vld [vmem:[%s9768_s17 + $0x88] sm:$0xff]   ;;  %8274 = vmatprep.subr.bf16.mxu1 %v9320_v54 }
  0x20   : > { %v9290_v24 = vld [vmem:[%s9768_s17 + $0x90] sm:$0xff]   ;;  %v9291_v25 = vld [vmem:[%s9768_s17 + $0x98] sm:$0xff]   ;;  %v9292_v26 = vld [vmem:[%s9768_s17 + $0xa0] sm:$0xff]  }
  0x21   : > { %v9293_v27 = vld [vmem:[%s9768_s17 + $0xa8] sm:$0xff]   ;;  %v9294_v28 = vld [vmem:[%s9768_s17 + $0xb0] sm:$0xff]   ;;  %v9295_v29 = vld [vmem:[%s9768_s17 + $0xb8] sm:$0xff]   ;;  %8125 = vmatpush3.bf16.msra.mxu0 %v9307_v41 }
  0x22   : > { %v9296_v30 = vld [vmem:[%s9768_s17 + $0xc0] sm:$0xff]   ;;  %v9297_v31 = vld [vmem:[%s9768_s17 + $0xc8] sm:$0xff]   ;;  %v9298_v32 = vld [vmem:[%s9768_s17 + $0xd0] sm:$0xff]   ;;  %8126 = vmatprep.subr.bf16.mxu0 %v9310_v43  ;;  %8275 = vmatpush3.bf16.msra.mxu1 %v9320_v54 }
  0x23   : > { %v9299_v33 = vld [vmem:[%s9768_s17 + $0xd8] sm:$0xff]   ;;  %v9300_v34 = vld [vmem:[%s9768_s17 + $0xe0] sm:$0xff]   ;;  %v9301_v35 = vld [vmem:[%s9768_s17 + $0xe8] sm:$0xff]   ;;  %8276 = vmatprep.subr.bf16.mxu1 %v9321_v55 }
  0x24   : > { %8055 = vmatmul.mubr.msk.bf16.gmra.mrb[4].mxu0 %vm524_vm2, %v9275_v9  ;;  %v9302_v36 = vld [vmem:[%s9768_s17 + $0xf0] sm:$0xff]   ;;  %v9303_v37 = vld [vmem:[%s9768_s17 + $0xf8] sm:$0xff]   ;;  %v9304_v38 = vld [vmem:[%s9768_s17 + $0x100] sm:$0xff]  }
  0x25   : > { %8058 = vmatprep.mubr.msk.bf16.mxu0 %vm524_vm2, %v9276_v10  ;;  %v9305_v40 = vld [vmem:[%s9768_s17 + $0x108] sm:$0xff]   ;;  %v9308_v42 = vld [vmem:[%s9768_s17 + $0x110] sm:$0xff]   ;;  %v9309_v44 = vld [vmem:[%s9768_s17 + $0x118] sm:$0xff]   ;;  %8127 = vmatpush3.bf16.msra.mxu0 %v9310_v43  ;;  %s6633_s17 = sshll.u32 %s243_s16, 4  ;;  %s11249_s17 = int_to_ptr.vmem [resolvable:$true] %s6633_s17 }
  0x26   : > { %8128 = vmatprep.subr.bf16.mxu0 %v9311_v45  ;;  %8277 = vmatpush3.bf16.msra.mxu1 %v9321_v55  ;;  %s9606_s28 = scalar_lea.vmem %s11249_s17, 16  ;;  %p9613_p0 = scmp.lt.s32.totalorder %s11249_s17, %s9611_s29 }
  0x27   : > { %8278 = vmatprep.subr.bf16.mxu1 %v9322_v56  ;;  %p9607_p11 = scmp.ne.s32.totalorder %s11249_s17, %s9606_s28  ;;  %p9614_p1 = scmp.lt.s32.totalorder %s9612_s9, %s9606_s28 }
  0x29   : > { %8129 = vmatpush3.bf16.msra.mxu0 %v9311_v45  ;;  %p9608_p12 = pnand %p9607_p11, %p9747_p5  ;;  %p9615_p2 = por %p9614_p1, %p9613_p0 }
  0x2a   : > { %8130 = vmatprep.subr.bf16.mxu0 %v9312_v46  ;;  %8279 = vmatpush3.bf16.msra.mxu1 %v9322_v56 }
  0x2b   : > { %8280 = vmatprep.subr.bf16.mxu1 %v9323_v57  ;;  %p9609_p13 = pneg %p9608_p12 }
  0x2c   : > { %8059 = vmatmul.mubr.msk.bf16.gmra.mrb[8].mxu0 %vm524_vm2, %v9277_v11 }
  0x2d   : > { %8062 = vmatprep.mubr.msk.bf16.mxu0 %vm524_vm2, %v9278_v12  ;;  %8131 = vmatpush3.bf16.msra.mxu0 %v9312_v46  ;;  %p9616_p3 = pnand %p9615_p2, %p9609_p13 }
  0x2e   : > { %8132 = vmatprep.subr.bf16.mxu0 %v9314_v48  ;;  %8281 = vmatpush3.bf16.msra.mxu1 %v9323_v57 }
  0x2f   : > { %8290 = vmatprep.subr.bf16.mxu1 %v9899_v59 }
  0x31   : > { %8133 = vmatpush3.bf16.msra.mxu0 %v9314_v48 }
  0x32   : > { %8134 = vmatprep.subr.bf16.mxu0 %v9316_v50 }
  0x34   : > { %8063 = vmatmul.mubr.msk.bf16.gmra.mrb[12].mxu0 %vm524_vm2, %v9279_v13 }
  0x35   : > { %8066 = vmatprep.mubr.msk.bf16.mxu0 %vm524_vm2, %v9280_v14  ;;  %8135 = vmatpush3.bf16.msra.mxu0 %v9316_v50 }
  0x36   : > { %8136 = vmatprep.subr.bf16.mxu0 %v9318_v52 }
  0x39   : > { %8137 = vmatpush3.bf16.msra.mxu0 %v9318_v52 }
  0x3a   : > { %8146 = vmatprep.subr.bf16.mxu0 %v9893_v58 }
  0x3c   : > { %8067 = vmatmul.mubr.msk.bf16.gmra.mrb[16].mxu0 %vm524_vm2, %v9281_v15 }
  0x3d   : > { %8070 = vmatprep.mubr.msk.bf16.mxu0 %vm524_vm2, %v9282_v16 }
  0x44   : > { %8071 = vmatmul.mubr.msk.bf16.gmra.mrb[20].mxu0 %vm524_vm2, %v9283_v17 }
  0x45   : > { %8074 = vmatprep.mubr.msk.bf16.mxu0 %vm524_vm2, %v9284_v18 }
  0x4c   : > { %8075 = vmatmul.mubr.msk.bf16.gmra.mrb[24].mxu0 %vm524_vm2, %v9285_v19 }
  0x4d   : > { %8078 = vmatprep.mubr.msk.bf16.mxu0 %vm524_vm2, %v9286_v20 }
  0x54   : > { %8079 = vmatmul.mubr.msk.bf16.gmra.mrb[28].mxu0 %vm524_vm2, %v9287_v21 }
  0x55   : > { %8082 = vmatprep.mubr.msk.bf16.mxu0 %vm524_vm2, %v9288_v22 }
  0x5c   : > { %8083 = vmatmul.mubr.msk.bf16.gmra.mrb[32].mxu0 %vm524_vm2, %v9289_v23 }
  0x5d   : > { %8086 = vmatprep.mubr.msk.bf16.mxu0 %vm524_vm2, %v9290_v24 }
  0x64   : > { %8087 = vmatmul.mubr.msk.bf16.gmra.mrb[36].mxu0 %vm524_vm2, %v9291_v25 }
  0x65   : > { %8090 = vmatprep.mubr.msk.bf16.mxu0 %vm524_vm2, %v9292_v26 }
  0x6c   : > { %8091 = vmatmul.mubr.msk.bf16.gmra.mrb[40].mxu0 %vm524_vm2, %v9293_v27 }
  0x6d   : > { %8094 = vmatprep.mubr.msk.bf16.mxu0 %vm524_vm2, %v9294_v28 }
  0x74   : > { %8095 = vmatmul.mubr.msk.bf16.gmra.mrb[44].mxu0 %vm524_vm2, %v9295_v29 }
  0x75   : > { %8098 = vmatprep.mubr.msk.bf16.mxu0 %vm524_vm2, %v9296_v30 }
  0x7c   : > { %8099 = vmatmul.mubr.msk.bf16.gmra.mrb[48].mxu0 %vm524_vm2, %v9297_v31 }
  0x7d   : > { %8102 = vmatprep.mubr.msk.bf16.mxu0 %vm524_vm2, %v9298_v32 }
  0x84   : > { %8103 = vmatmul.mubr.msk.bf16.gmra.mrb[52].mxu0 %vm524_vm2, %v9299_v33 }
  0x85   : > { %8106 = vmatprep.mubr.msk.bf16.mxu0 %vm524_vm2, %v9300_v34 }
  0x8c   : > { %8107 = vmatmul.mubr.msk.bf16.gmra.mrb[56].mxu0 %vm524_vm2, %v9301_v35 }
  0x8d   : > { %8110 = vmatprep.mubr.msk.bf16.mxu0 %vm524_vm2, %v9302_v36 }
  0x94   : > { %8111 = vmatmul.mubr.msk.bf16.gmra.mrb[60].mxu0 %vm524_vm2, %v9303_v37 }
  0x95   : > { %8114 = vmatprep.mubr.msk.bf16.mxu0 %vm524_vm2, %v9304_v38 }
  0x9c   : > { %8115 = vmatmul.mubr.msk.bf16.gmra.mrb[64].mxu0 %vm524_vm2, %v9305_v40 }
  0x9d   : > { %8118 = vmatprep.mubr.msk.bf16.mxu0 %vm524_vm2, %v9308_v42 }
  0xa4   : > { %8119 = vmatmul.mubr.msk.bf16.gmra.mrb[68].mxu0 %vm524_vm2, %v9309_v44 }
  0xef   : > { %v8052_v61 = vpop.f32.mrb[0].mxu0 }
  0xf0   : > { %v674_v62 = vpop.f32.mrb[1].mxu0  ;;  %v683_v9 = vadd.f32 %v8052_v61, %v9905_v60 }
  0xf1   : > { %v675_v63 = vadd.f32 %v9905_v60, %v674_v62  ;;  %v8053_v0 = vpop.f32.mrb[2].mxu0 }
  0xf2   : > { %v686_v1 = vadd.f32 %v8053_v0, %v9905_v60  ;;  %v677_v2 = vpop.f32.mrb[3].mxu0  ;;  %v963_v16 = vmax.f32 %v683_v9, 0.0 }
  0xf3   : > { %v961_v3 = vmax.f32 %v675_v63, 0.0  ;;  %v678_v6 = vadd.f32 %v9905_v60, %v677_v2 }
  0xf4   : > { %v964_v4 = vmax.f32 %v686_v1, 0.0 }
  0xf5   : > { %v962_v13 = vmax.f32 %v678_v6, 0.0 }
  0xf6   : > { %v1033_v5 = vmax.f32 %v961_v3, %v964_v4 }
  0xf7   : > { %v8056_v7 = vpop.f32.mrb[4].mxu0 }
  0xf8   : > { %1069 = vst [vmem:[#allocation2] sm:$0xff] %v1033_v5  ;;  %v690_v8 = vpop.f32.mrb[5].mxu0  ;;  %v699_v24 = vadd.f32 %v8056_v7, %v9905_v60 }
  0xf9   : > { %v691_v10 = vadd.f32 %v9905_v60, %v690_v8  ;;  %v8057_v11 = vpop.f32.mrb[6].mxu0 }
  0xfa   : > { %v693_v12 = vpop.f32.mrb[7].mxu0  ;;  %v702_v18 = vadd.f32 %v8057_v11, %v9905_v60  ;;  %v967_v35 = vmax.f32 %v699_v24, 0.0 }
  0xfb   : > { %v965_v14 = vmax.f32 %v691_v10, 0.0  ;;  %v694_v15 = vadd.f32 %v9905_v60, %v693_v12 }
  0xfc   : > { %v968_v25 = vmax.f32 %v702_v18, 0.0 }
  0xfd   : > { %v1034_v17 = vmax.f32 %v962_v13, %v965_v14  ;;  %v966_v19 = vmax.f32 %v694_v15, 0.0 }
  0xff   : > { %1070 = vst [vmem:[#allocation2 + $0x8] sm:$0xff] %v1034_v17  ;;  %v1035_v20 = vmax.f32 %v963_v16, %v966_v19  ;;  %v8060_v21 = vpop.f32.mrb[8].mxu0 }
 0x100   : > { %v715_v22 = vadd.f32 %v8060_v21, %v9905_v60  ;;  %v706_v23 = vpop.f32.mrb[9].mxu0 }
 0x101   : > { %1071 = vst [vmem:[#allocation2 + $0x10] sm:$0xff] %v1035_v20  ;;  %v707_v26 = vadd.f32 %v9905_v60, %v706_v23  ;;  %v8061_v27 = vpop.f32.mrb[10].mxu0 }
 0x102   : > { %v971_v28 = vmax.f32 %v715_v22, 0.0  ;;  %v718_v29 = vadd.f32 %v8061_v27, %v9905_v60  ;;  %v709_v30 = vpop.f32.mrb[11].mxu0 }
 0x103   : > { %v969_v31 = vmax.f32 %v707_v26, 0.0  ;;  %v710_v32 = vadd.f32 %v9905_v60, %v709_v30 }
 0x104   : > { %v1037_v33 = vmax.f32 %v968_v25, %v971_v28  ;;  %v972_v34 = vmax.f32 %v718_v29, 0.0 }
 0x105   : > { %v970_v36 = vmax.f32 %v710_v32, 0.0 }
 0x106   : > { %v1105_v37 = vld [vmem:[#allocation2] ss:$2 sm:$0xff]  ;;  %v1153_v38 = vld [vmem:[#allocation2 + $0x1] ss:$2 sm:$0xff]  ;;  %1073 = vst [vmem:[#allocation2 + $0x20] sm:$0xff] %v1037_v33  ;;  %v1038_v39 = vmax.f32 %v969_v31, %v972_v34 }
 0x107   : > { %v9919_v40 = vmax.f32 %v1105_v37, %v1153_v38  ;;  %v1036_v41 = vmax.f32 %v967_v35, %v970_v36  ;;  %v8064_v42 = vpop.f32.mrb[12].mxu0 }
 0x108   : > { %v1107_v43 = vld [vmem:[#allocation2 + $0x10] ss:$2 sm:$0xf]  ;;  %v1155_v44 = vld [vmem:[#allocation2 + $0x11] ss:$2 sm:$0xf]  ;;  %v731_v2 = vadd.f32 %v8064_v42, %v9905_v60 }
 0x109   : > { %1074 = vst [vmem:[#allocation2 + $0x28] sm:$0xff] %v1038_v39  ;;  %1224 = vst [vmem:[#allocation3] sm:$0xff] %v9919_v40  ;;  %v1201_v45 = vmax.f32 %v1107_v43, %v1155_v44  ;;  %v722_v46 = vpop.f32.mrb[13].mxu0 }
 0x10a   : > { %1072 = vst [vmem:[#allocation2 + $0x18] sm:$0xff] %v1036_v41  ;;  %v723_v47 = vadd.f32 %v9905_v60, %v722_v46  ;;  %v8065_v48 = vpop.f32.mrb[14].mxu0  ;;  %v975_v10 = vmax.f32 %v731_v2, 0.0 }
 0x10b   : > { %1225 = vst [vmem:[#allocation3 + $0x8] sm:$0xf] %v1201_v45  ;;  %v734_v49 = vadd.f32 %v8065_v48, %v9905_v60  ;;  %v725_v50 = vpop.f32.mrb[15].mxu0 }
 0x10c   : > { %v973_v51 = vmax.f32 %v723_v47, 0.0  ;;  %v726_v62 = vadd.f32 %v9905_v60, %v725_v50 }
 0x10d   : > { %v976_v52 = vmax.f32 %v734_v49, 0.0 }
 0x10e   : > { %v974_v7 = vmax.f32 %v726_v62, 0.0 }
 0x10f   : > { %v1039_v55 = vmax.f32 %v973_v51, %v976_v52  ;;  %v8068_v63 = vpop.f32.mrb[16].mxu0 }
 0x110   : > { %v1111_v53 = vld [vmem:[#allocation2 + $0x28] ss:$2 sm:$0xf]  ;;  %v1159_v54 = vld [vmem:[#allocation2 + $0x29] ss:$2 sm:$0xf]  ;;  %v747_v18 = vadd.f32 %v8068_v63, %v9905_v60 }
 0x111   : > { %v1203_v56 = vmax.f32 %v1111_v53, %v1159_v54  ;;  %v1109_v57 = vld [vmem:[#allocation2 + $0x18] ss:$2 sm:$0xff]  ;;  %v1157_v61 = vld [vmem:[#allocation2 + $0x19] ss:$2 sm:$0xff]  ;;  %1075 = vst [vmem:[#allocation2 + $0x30] sm:$0xff] %v1039_v55  ;;  %v738_v1 = vpop.f32.mrb[17].mxu0 }
 0x112   : > { %v9925_v0 = vmax.f32 %v1109_v57, %v1157_v61  ;;  %v739_v3 = vadd.f32 %v9905_v60, %v738_v1  ;;  %v8069_v4 = vpop.f32.mrb[18].mxu0  ;;  %v1276_v25 = vld [vmem:[#allocation3 + $0x1] sm:$0xff]  ;;  %v979_v32 = vmax.f32 %v747_v18, 0.0 }
 0x113   : > { %1227 = vst [vmem:[#allocation3 + $0x18] sm:$0xf] %v1203_v56  ;;  %v741_v5 = vpop.f32.mrb[19].mxu0  ;;  %v750_v12 = vadd.f32 %v8069_v4, %v9905_v60 }
 0x114   : > { %1226 = vst [vmem:[#allocation3 + $0x10] sm:$0xff] %v9925_v0  ;;  %v1256_v6 = vpack.c.bf16 %v9925_v0, %v9919_v40  ;;  %v977_v8 = vmax.f32 %v739_v3, 0.0  ;;  %v742_v9 = vadd.f32 %v9905_v60, %v741_v5 }
 0x115   : > { %v980_v21 = vmax.f32 %v750_v12, 0.0 }
 0x116   : > { %v1040_v11 = vmax.f32 %v974_v7, %v977_v8  ;;  %v978_v13 = vmax.f32 %v742_v9, 0.0 }
 0x117   : > { %v8072_v14 = vpop.f32.mrb[20].mxu0 }
 0x118   : > { %1076 = vst [vmem:[#allocation2 + $0x38] sm:$0xff] %v1040_v11  ;;  %v1041_v15 = vmax.f32 %v975_v10, %v978_v13  ;;  %v763_v16 = vadd.f32 %v8072_v14, %v9905_v60  ;;  %v754_v17 = vpop.f32.mrb[21].mxu0 }
 0x119   : > { %v755_v19 = vadd.f32 %v9905_v60, %v754_v17  ;;  %v8073_v20 = vpop.f32.mrb[22].mxu0 }
 0x11a   : > { %1077 = vst [vmem:[#allocation2 + $0x40] sm:$0xff] %v1041_v15  ;;  %v983_v22 = vmax.f32 %v763_v16, 0.0  ;;  %v766_v23 = vadd.f32 %v8073_v20, %v9905_v60  ;;  %v757_v24 = vpop.f32.mrb[23].mxu0 }
 0x11b   : > { %v1277_v26 = vld [vmem:[#allocation3 + $0x11] sm:$0xff]  ;;  %v981_v27 = vmax.f32 %v755_v19, 0.0  ;;  %v758_v28 = vadd.f32 %v9905_v60, %v757_v24 }
 0x11c   : > { %v1284_v29 = vpack.c.bf16 %v1277_v26, %v1276_v25  ;;  %v1043_v30 = vmax.f32 %v980_v21, %v983_v22  ;;  %v984_v31 = vmax.f32 %v766_v23, 0.0 }
 0x11d   : > { %v982_v33 = vmax.f32 %v758_v28, 0.0 }
 0x11e   : > { %8138 = vmatprep.mubr.bf16.mxu0 %v1284_v29  ;;  %1079 = vst [vmem:[#allocation2 + $0x50] sm:$0xff] %v1043_v30  ;;  %v1044_v34 = vmax.f32 %v981_v27, %v984_v31  ;;  %v9325_v31 = vld [vmem:[%s11292_s3 + $0x8] sm:$0xff]  }
 0x11f   : > { %v1042_v35 = vmax.f32 %v979_v32, %v982_v33  ;;  %v8076_v36 = vpop.f32.mrb[24].mxu0  ;;  %v1113_v37 = vld [vmem:[#allocation2 + $0x30] ss:$2 sm:$0xff]  ;;  %v1161_v38 = vld [vmem:[#allocation2 + $0x31] ss:$2 sm:$0xff] }
 0x120   : > { %1080 = vst [vmem:[#allocation2 + $0x58] sm:$0xff] %v1044_v34  ;;  %v770_v39 = vpop.f32.mrb[25].mxu0  ;;  %v9939_v41 = vmax.f32 %v1113_v37, %v1161_v38  ;;  %v779_v1 = vadd.f32 %v8076_v36, %v9905_v60 }
 0x121   : > { %1078 = vst [vmem:[#allocation2 + $0x48] sm:$0xff] %v1042_v35  ;;  %v771_v42 = vadd.f32 %v9905_v60, %v770_v39  ;;  %v8077_v43 = vpop.f32.mrb[26].mxu0  ;;  %v1115_v44 = vld [vmem:[#allocation2 + $0x40] ss:$2 sm:$0xf] }
 0x122   : > { %v782_v45 = vadd.f32 %v8077_v43, %v9905_v60  ;;  %v773_v46 = vpop.f32.mrb[27].mxu0  ;;  %v1163_v47 = vld [vmem:[#allocation2 + $0x41] ss:$2 sm:$0xf]  ;;  %1228 = vst [vmem:[#allocation3 + $0x20] sm:$0xff] %v9939_v41  ;;  %v987_v12 = vmax.f32 %v779_v1, 0.0 }
 0x123   : > { %v985_v48 = vmax.f32 %v771_v42, 0.0  ;;  %v1205_v49 = vmax.f32 %v1115_v44, %v1163_v47  ;;  %v774_v57 = vadd.f32 %v9905_v60, %v773_v46  ;;  %v9326_v43 = vld [vmem:[%s11292_s3 + $0x10] sm:$0xff]  }
 0x124   : > { %v988_v50 = vmax.f32 %v782_v45, 0.0 }
 0x125   : > { %1229 = vst [vmem:[#allocation3 + $0x28] sm:$0xf] %v1205_v49  ;;  %v986_v7 = vmax.f32 %v774_v57, 0.0 }
 0x126   : > { %v1045_v51 = vmax.f32 %v985_v48, %v988_v50 }
 0x127   : > { %v1119_v52 = vld [vmem:[#allocation2 + $0x58] ss:$2 sm:$0xf]  ;;  %v1167_v53 = vld [vmem:[#allocation2 + $0x59] ss:$2 sm:$0xf] }
 0x128   : > { %v1207_v54 = vmax.f32 %v1119_v52, %v1167_v53  ;;  %v1117_v55 = vld [vmem:[#allocation2 + $0x48] ss:$2 sm:$0xff]  ;;  %v1165_v56 = vld [vmem:[#allocation2 + $0x49] ss:$2 sm:$0xff]  ;;  %1081 = vst [vmem:[#allocation2 + $0x60] sm:$0xff] %v1045_v51  ;;  %v8080_v61 = vpop.f32.mrb[28].mxu0 }
 0x129   : > { %v9945_v62 = vmax.f32 %v1117_v55, %v1165_v56  ;;  %v786_v63 = vpop.f32.mrb[29].mxu0  ;;  %v795_v20 = vadd.f32 %v8080_v61, %v9905_v60  ;;  %v9327_v53 = vld [vmem:[%s11292_s3 + $0x18] sm:$0xff]   ;;  %v9328_v55 = vld [vmem:[%s11292_s3 + $0x20] sm:$0xff]  }
 0x12a   : > { %1231 = vst [vmem:[#allocation3 + $0x38] sm:$0xf] %v1207_v54  ;;  %v787_v2 = vadd.f32 %v9905_v60, %v786_v63  ;;  %v8081_v3 = vpop.f32.mrb[30].mxu0 }
 0x12b   : > { %1230 = vst [vmem:[#allocation3 + $0x30] sm:$0xff] %v9945_v62  ;;  %v789_v4 = vpop.f32.mrb[31].mxu0  ;;  %v1257_v5 = vpack.c.bf16 %v9945_v62, %v9939_v41  ;;  %v798_v14 = vadd.f32 %v8081_v3, %v9905_v60  ;;  %v991_v34 = vmax.f32 %v795_v20, 0.0 }
 0x12c   : > { %v989_v8 = vmax.f32 %v787_v2, 0.0  ;;  %v790_v9 = vadd.f32 %v9905_v60, %v789_v4  ;;  %v2133_v10 = vld [vmem:[#allocation3 + $0x21] sm:$0xff] }
 0x12d   : > { %v2140_v11 = vpack.c.bf16 %v2133_v10, %v1277_v26  ;;  %v992_v23 = vmax.f32 %v798_v14, 0.0  ;;  %v9330_v14 = vld [vmem:[%s11292_s3 + $0x28] sm:$0xff]  }
 0x12e   : > { %v1046_v13 = vmax.f32 %v986_v7, %v989_v8  ;;  %v990_v15 = vmax.f32 %v790_v9, 0.0 }
 0x12f   : > { %8282 = vmatprep.mubr.bf16.mxu1 %v2140_v11  ;;  %v8084_v16 = vpop.f32.mrb[32].mxu0 }
 0x130   : > { %1082 = vst [vmem:[#allocation2 + $0x68] sm:$0xff] %v1046_v13  ;;  %v1047_v17 = vmax.f32 %v987_v12, %v990_v15  ;;  %v811_v18 = vadd.f32 %v8084_v16, %v9905_v60  ;;  %v802_v19 = vpop.f32.mrb[33].mxu0 }
 0x131   : > { %v803_v21 = vadd.f32 %v9905_v60, %v802_v19  ;;  %v8085_v22 = vpop.f32.mrb[34].mxu0  ;;  %v9331_v19 = vld [vmem:[%s11292_s3 + $0x1c8] sm:$0xff]  }
 0x132   : > { %1083 = vst [vmem:[#allocation2 + $0x70] sm:$0xff] %v1047_v17  ;;  %v995_v24 = vmax.f32 %v811_v18, 0.0  ;;  %v814_v25 = vadd.f32 %v8085_v22, %v9905_v60  ;;  %v805_v26 = vpop.f32.mrb[35].mxu0  ;;  %v9958_v27 = vld [vmem:[#allocation3 + $0x31] sm:$0xff] }
 0x133   : > { %v993_v28 = vmax.f32 %v803_v21, 0.0  ;;  %v806_v29 = vadd.f32 %v9905_v60, %v805_v26  ;;  %v1285_v30 = vpack.c.bf16 %v9958_v27, %v2133_v10  ;;  %v9994_v20 = vld [vmem:[#allocation3 + $0x31] sm:$0xff] }
 0x134   : > { %v1049_v32 = vmax.f32 %v992_v23, %v995_v24  ;;  %v996_v33 = vmax.f32 %v814_v25, 0.0 }
 0x135   : > { %v994_v35 = vmax.f32 %v806_v29, 0.0  ;;  %8139 = vmatmul.mubr.bf16.vlgmr.msra.gmra.mrb[72].mxu0 %v1285_v30 }
 0x136   : > { %1085 = vst [vmem:[#allocation2 + $0x80] sm:$0xff] %v1049_v32  ;;  %v1050_v36 = vmax.f32 %v993_v28, %v996_v33  ;;  %8147 = vmatpush3.bf16.msra.mxu0 %v9893_v58  ;;  %v9333_v32 = vld [vmem:[%s11292_s3 + $0x1d0] sm:$0xff]  }
 0x137   : > { %v1121_v37 = vld [vmem:[#allocation2 + $0x60] ss:$2 sm:$0xff]  ;;  %v1169_v38 = vld [vmem:[#allocation2 + $0x61] ss:$2 sm:$0xff]  ;;  %v1048_v39 = vmax.f32 %v991_v34, %v994_v35  ;;  %v8088_v42 = vpop.f32.mrb[36].mxu0  ;;  %8148 = vmatprep.subr.bf16.mxu0 %v9325_v31 }
 0x138   : > { %v9969_v44 = vmax.f32 %v1121_v37, %v1169_v38  ;;  %1086 = vst [vmem:[#allocation2 + $0x88] sm:$0xff] %v1050_v36  ;;  %v818_v45 = vpop.f32.mrb[37].mxu0  ;;  %v827_v9 = vadd.f32 %v8088_v42, %v9905_v60 }
 0x139   : > { %v1123_v46 = vld [vmem:[#allocation2 + $0x70] ss:$2 sm:$0xf]  ;;  %v1171_v47 = vld [vmem:[#allocation2 + $0x71] ss:$2 sm:$0xf]  ;;  %v819_v48 = vadd.f32 %v9905_v60, %v818_v45 }
 0x13a   : > { %1084 = vst [vmem:[#allocation2 + $0x78] sm:$0xff] %v1048_v39  ;;  %1232 = vst [vmem:[#allocation3 + $0x40] sm:$0xff] %v9969_v44  ;;  %v1209_v58 = vmax.f32 %v1123_v46, %v1171_v47  ;;  %v8089_v49 = vpop.f32.mrb[38].mxu0  ;;  %8149 = vmatpush3.bf16.msra.mxu0 %v9325_v31  ;;  %v999_v23 = vmax.f32 %v827_v9, 0.0  ;;  %v9334_v46 = vld [vmem:[%s11292_s3 + $0x38] sm:$0xff]   ;;  %v10043_v9 = vld [vmem:[%s11292_s3 + $0x80] sm:$0xff]  }
 0x13b   : > { %v997_v50 = vmax.f32 %v819_v48, 0.0  ;;  %v830_v51 = vadd.f32 %v8089_v49, %v9905_v60  ;;  %v821_v52 = vpop.f32.mrb[39].mxu0  ;;  %8150 = vmatprep.subr.bf16.mxu0 %v9326_v43  ;;  %v9335_v47 = vld [vmem:[%s11292_s3 + $0x1d8] sm:$0xff]  }
 0x13c   : > { %1233 = vst [vmem:[#allocation3 + $0x48] sm:$0xf] %v1209_v58  ;;  %v822_v3 = vadd.f32 %v9905_v60, %v821_v52 }
 0x13d   : > { %v1000_v54 = vmax.f32 %v830_v51, 0.0 }
 0x13e   : > { %8151 = vmatpush3.bf16.msra.mxu0 %v9326_v43  ;;  %v998_v15 = vmax.f32 %v822_v3, 0.0 }
 0x13f   : > { %v1127_v56 = vld [vmem:[#allocation2 + $0x88] ss:$2 sm:$0xf]  ;;  %v1175_v57 = vld [vmem:[#allocation2 + $0x89] ss:$2 sm:$0xf]  ;;  %v1051_v61 = vmax.f32 %v997_v50, %v1000_v54  ;;  %8152 = vmatprep.subr.bf16.mxu0 %v9327_v53 }
 0x140   : > { %v1211_v63 = vmax.f32 %v1127_v56, %v1175_v57  ;;  %v8092_v4 = vpop.f32.mrb[40].mxu0 }
 0x141   : > { %v1125_v1 = vld [vmem:[#allocation2 + $0x78] ss:$2 sm:$0xff]  ;;  %v1173_v2 = vld [vmem:[#allocation2 + $0x79] ss:$2 sm:$0xff]  ;;  %1087 = vst [vmem:[#allocation2 + $0x90] sm:$0xff] %v1051_v61  ;;  %v834_v8 = vpop.f32.mrb[41].mxu0  ;;  %v843_v33 = vadd.f32 %v8092_v4, %v9905_v60 }
 0x142   : > { %v9981_v7 = vmax.f32 %v1125_v1, %v1173_v2  ;;  %1235 = vst [vmem:[#allocation3 + $0x58] sm:$0xf] %v1211_v63  ;;  %v835_v10 = vadd.f32 %v9905_v60, %v834_v8  ;;  %v8093_v11 = vpop.f32.mrb[42].mxu0  ;;  %8153 = vmatpush3.bf16.msra.mxu0 %v9327_v53 }
 0x143   : > { %v837_v12 = vpop.f32.mrb[43].mxu0  ;;  %v2135_v13 = vld [vmem:[#allocation3 + $0x41] sm:$0xff]  ;;  %8154 = vmatprep.subr.bf16.mxu0 %v9328_v55  ;;  %v846_v25 = vadd.f32 %v8093_v11, %v9905_v60  ;;  %v1003_v53 = vmax.f32 %v843_v33, 0.0 }
 0x144   : > { %1234 = vst [vmem:[#allocation3 + $0x50] sm:$0xff] %v9981_v7  ;;  %v1001_v16 = vmax.f32 %v835_v10, 0.0  ;;  %v838_v17 = vadd.f32 %v9905_v60, %v837_v12  ;;  %v2141_v18 = vpack.c.bf16 %v2135_v13, %v9958_v27  ;;  %v9996_v21 = vld [vmem:[#allocation3 + $0x41] sm:$0xff]  ;;  %v9332_v27 = vld [vmem:[%s11292_s3 + $0x30] sm:$0xff]  }
 0x145   : > { %v3642_v22 = vpack.c.bf16 %v9996_v21, %v9994_v20  ;;  %v1004_v35 = vmax.f32 %v846_v25, 0.0  ;;  %v10022_v48 = vld [vmem:[#allocation3 + $0x42] sm:$0xff] }
 0x146   : > { %v1052_v24 = vmax.f32 %v998_v15, %v1001_v16  ;;  %v1002_v26 = vmax.f32 %v838_v17, 0.0  ;;  %8283 = vmatmul.mubr.bf16.vlgmr.msra.gmra.mrb[0].mxu1 %v2141_v18  ;;  %8155 = vmatpush3.bf16.msra.mxu0 %v9328_v55  ;;  %v10030_v55 = vld [vmem:[#allocation3 + $0x43] sm:$0xff] }
 0x147   : > { %v8096_v28 = vpop.f32.mrb[44].mxu0  ;;  %8291 = vmatpush3.bf16.msra.mxu1 %v9899_v59  ;;  %8156 = vmatprep.subr.bf16.mxu0 %v9330_v14  ;;  %v10032_v56 = vld [vmem:[#allocation3 + $0x44] sm:$0xff] }
 0x148   : > { %1088 = vst [vmem:[#allocation2 + $0x98] sm:$0xff] %v1052_v24  ;;  %v1053_v29 = vmax.f32 %v999_v23, %v1002_v26  ;;  %v859_v30 = vadd.f32 %v8096_v28, %v9905_v60  ;;  %v850_v31 = vpop.f32.mrb[45].mxu0  ;;  %8292 = vmatprep.subr.bf16.mxu1 %v9331_v19  ;;  %v9337_v12 = vld [vmem:[%s11292_s3 + $0x1e0] sm:$0xff]   ;;  %v9339_v24 = vld [vmem:[%s11292_s3 + $0x1e8] sm:$0xff]  }
 0x149   : > { %v851_v34 = vadd.f32 %v9905_v60, %v850_v31  ;;  %v8097_v59 = vpop.f32.mrb[46].mxu0  ;;  %v9444_v21 = vld [vmem:[%s11292_s3 + $0x440] sm:$0xff]  }
 0x14a   : > { %1089 = vst [vmem:[#allocation2 + $0xa0] sm:$0xff] %v1053_v29  ;;  %v1007_v36 = vmax.f32 %v859_v30, 0.0  ;;  %v862_v37 = vadd.f32 %v8097_v59, %v9905_v60  ;;  %v853_v38 = vpop.f32.mrb[47].mxu0  ;;  %8157 = vmatpush3.bf16.msra.mxu0 %v9330_v14 }
 0x14b   : > { %v10012_v39 = vld [vmem:[#allocation3 + $0x51] sm:$0xff]  ;;  %v1005_v42 = vmax.f32 %v851_v34, 0.0  ;;  %v854_v43 = vadd.f32 %v9905_v60, %v853_v38  ;;  %8293 = vmatpush3.bf16.msra.mxu1 %v9331_v19  ;;  %8158 = vmatprep.subr.bf16.mxu0 %v9332_v27 }
 0x14c   : > { %v1286_v45 = vpack.c.bf16 %v10012_v39, %v2135_v13  ;;  %v1055_v58 = vmax.f32 %v1004_v35, %v1007_v36  ;;  %v1008_v49 = vmax.f32 %v862_v37, 0.0  ;;  %8294 = vmatprep.subr.bf16.mxu1 %v9333_v32  ;;  %v10024_v50 = vld [vmem:[#allocation3 + $0x52] sm:$0xff] }
 0x14d   : > { %v10026_v51 = vld [vmem:[#allocation3 + $0x53] sm:$0xff]  ;;  %v1006_v54 = vmax.f32 %v854_v43, 0.0  ;;  %v4543_v57 = vpack.c.bf16 %v10024_v50, %v10022_v48  ;;  %v9492_v50 = vld [vmem:[%s11292_s3 + $0x5c0] sm:$0xff]  }
 0x14e   : > { %v10028_v52 = vld [vmem:[#allocation3 + $0x54] sm:$0xff]  ;;  %8142 = vmatprep.mubr.bf16.mxu0 %v1286_v45  ;;  %1091 = vst [vmem:[#allocation2 + $0xb0] sm:$0xff] %v1055_v58  ;;  %v1056_v61 = vmax.f32 %v1005_v42, %v1008_v49  ;;  %8159 = vmatpush3.bf16.msra.mxu0 %v9332_v27  ;;  %v4693_v63 = vpack.c.bf16 %v10026_v51, %v10030_v55  ;;  %v9500_v55 = vld [vmem:[%s11292_s3 + $0x600] sm:$0xff]  }
 0x14f   : > { %v4843_v1 = vpack.c.bf16 %v10028_v52, %v10032_v56  ;;  %v1129_v2 = vld [vmem:[#allocation2 + $0x90] ss:$2 sm:$0xff]  ;;  %v1177_v3 = vld [vmem:[#allocation2 + $0x91] ss:$2 sm:$0xff]  ;;  %v1054_v4 = vmax.f32 %v1003_v53, %v1006_v54  ;;  %v8100_v8 = vpop.f32.mrb[48].mxu0  ;;  %8295 = vmatpush3.bf16.msra.mxu1 %v9333_v32  ;;  %8160 = vmatprep.subr.bf16.mxu0 %v9334_v46 }
 0x150   : > { %v10045_v10 = vmax.f32 %v1129_v2, %v1177_v3  ;;  %1092 = vst [vmem:[#allocation2 + $0xb8] sm:$0xff] %v1056_v61  ;;  %v866_v11 = vpop.f32.mrb[49].mxu0  ;;  %8296 = vmatprep.subr.bf16.mxu1 %v9335_v47  ;;  %v9341_v34 = vld [vmem:[%s11292_s3 + $0x1f0] sm:$0xff]   ;;  %v875_v36 = vadd.f32 %v8100_v8, %v9905_v60  ;;  %v9343_v49 = vld [vmem:[%s11292_s3 + $0x1f8] sm:$0xff]  }
 0x151   : > { %v1131_v13 = vld [vmem:[#allocation2 + $0xa0] ss:$2 sm:$0xf]  ;;  %v1179_v14 = vld [vmem:[#allocation2 + $0xa1] ss:$2 sm:$0xf]  ;;  %v867_v15 = vadd.f32 %v9905_v60, %v866_v11 }
 0x152   : > { %1090 = vst [vmem:[#allocation2 + $0xa8] sm:$0xff] %v1054_v4  ;;  %1236 = vst [vmem:[#allocation3 + $0x60] sm:$0xff] %v10045_v10  ;;  %v1213_v16 = vmax.f32 %v1131_v13, %v1179_v14  ;;  %v8101_v17 = vpop.f32.mrb[50].mxu0  ;;  %8161 = vmatpush3.bf16.msra.mxu0 %v9334_v46  ;;  %v10071_v53 = vld [vmem:[#allocation3 + $0x51] sm:$0xff]  ;;  %v1011_v2 = vmax.f32 %v875_v36, 0.0  ;;  %v10082_v14 = vld [vmem:[%s11292_s3 + $0x200] sm:$0xff]  }
 0x153   : > { %v1009_v18 = vmax.f32 %v867_v15, 0.0  ;;  %v878_v19 = vadd.f32 %v8101_v17, %v9905_v60  ;;  %v869_v23 = vpop.f32.mrb[51].mxu0  ;;  %8297 = vmatpush3.bf16.msra.mxu1 %v9335_v47  ;;  %8170 = vmatprep.subr.bf16.mxu0 %v10043_v9  ;;  %v9491_v48 = vld [vmem:[%s11292_s3 + $0x5b8] sm:$0xff]  }
 0x154   : > { %1237 = vst [vmem:[#allocation3 + $0x68] sm:$0xf] %v1213_v16  ;;  %8298 = vmatprep.subr.bf16.mxu1 %v9337_v12  ;;  %v870_v32 = vadd.f32 %v9905_v60, %v869_v23  ;;  %v9499_v51 = vld [vmem:[%s11292_s3 + $0x5f8] sm:$0xff]  }
 0x155   : > { %v1012_v25 = vmax.f32 %v878_v19, 0.0  ;;  %v9507_v52 = vld [vmem:[%s11292_s3 + $0x638] sm:$0xff]  }
 0x156   : > { %v1010_v45 = vmax.f32 %v870_v32, 0.0 }
 0x157   : > { %v1135_v26 = vld [vmem:[#allocation2 + $0xb8] ss:$2 sm:$0xf]  ;;  %v1183_v28 = vld [vmem:[#allocation2 + $0xb9] ss:$2 sm:$0xf]  ;;  %v1057_v27 = vmax.f32 %v1009_v18, %v1012_v25  ;;  %8299 = vmatpush3.bf16.msra.mxu1 %v9337_v12 }
 0x158   : > { %v1215_v29 = vmax.f32 %v1135_v26, %v1183_v28  ;;  %v8104_v33 = vpop.f32.mrb[52].mxu0  ;;  %8300 = vmatprep.subr.bf16.mxu1 %v9339_v24 }
 0x159   : > { %v1133_v30 = vld [vmem:[#allocation2 + $0xa8] ss:$2 sm:$0xff]  ;;  %v1181_v31 = vld [vmem:[#allocation2 + $0xa9] ss:$2 sm:$0xff]  ;;  %1093 = vst [vmem:[#allocation2 + $0xc0] sm:$0xff] %v1057_v27  ;;  %v882_v35 = vpop.f32.mrb[53].mxu0  ;;  %v891_v15 = vadd.f32 %v8104_v33, %v9905_v60 }
 0x15a   : > { %v10061_v59 = vmax.f32 %v1133_v30, %v1181_v31  ;;  %1239 = vst [vmem:[#allocation3 + $0x78] sm:$0xf] %v1215_v29  ;;  %v883_v37 = vadd.f32 %v9905_v60, %v882_v35  ;;  %v8105_v38 = vpop.f32.mrb[54].mxu0 }
 0x15b   : > { %v885_v42 = vpop.f32.mrb[55].mxu0  ;;  %v2137_v43 = vld [vmem:[#allocation3 + $0x61] sm:$0xff]  ;;  %8301 = vmatpush3.bf16.msra.mxu1 %v9339_v24  ;;  %v894_v4 = vadd.f32 %v8105_v38, %v9905_v60 }
 0x15c   : > { %1238 = vst [vmem:[#allocation3 + $0x70] sm:$0xff] %v10061_v59  ;;  %v1013_v46 = vmax.f32 %v883_v37, 0.0  ;;  %v886_v47 = vadd.f32 %v9905_v60, %v885_v42  ;;  %v2142_v58 = vpack.c.bf16 %v2137_v43, %v10012_v39  ;;  %8302 = vmatprep.subr.bf16.mxu1 %v9341_v34  ;;  %v10073_v54 = vld [vmem:[#allocation3 + $0x61] sm:$0xff] }
 0x15d   : > { %v3643_v61 = vpack.c.bf16 %v10073_v54, %v10071_v53  ;;  %v1016_v18 = vmax.f32 %v894_v4, 0.0  ;;  %v10092_v31 = vld [vmem:[#allocation3 + $0x62] sm:$0xff] }
 0x15e   : > { %v1058_v3 = vmax.f32 %v1010_v45, %v1013_v46  ;;  %v1014_v8 = vmax.f32 %v886_v47, 0.0  ;;  %8286 = vmatprep.mubr.bf16.mxu1 %v2142_v58  ;;  %v10098_v36 = vld [vmem:[#allocation3 + $0x63] sm:$0xff] }
 0x15f   : > { %v8108_v11 = vpop.f32.mrb[56].mxu0  ;;  %8303 = vmatpush3.bf16.msra.mxu1 %v9341_v34  ;;  %v1015_v34 = vmax.f32 %v891_v15, 0.0  ;;  %v10100_v37 = vld [vmem:[#allocation3 + $0x64] sm:$0xff] }
 0x160   : > { %1094 = vst [vmem:[#allocation2 + $0xc8] sm:$0xff] %v1058_v3  ;;  %v1059_v39 = vmax.f32 %v1011_v2, %v1014_v8  ;;  %v907_v12 = vadd.f32 %v8108_v11, %v9905_v60  ;;  %v898_v13 = vpop.f32.mrb[57].mxu0  ;;  %8304 = vmatprep.subr.bf16.mxu1 %v9343_v49  ;;  %v9338_v15 = vld [vmem:[%s11292_s3 + $0x88] sm:$0xff]  }
 0x161   : > { %v899_v16 = vadd.f32 %v9905_v60, %v898_v13  ;;  %v8109_v17 = vpop.f32.mrb[58].mxu0 }
 0x162   : > { %1095 = vst [vmem:[#allocation2 + $0xd0] sm:$0xff] %v1059_v39  ;;  %v1019_v19 = vmax.f32 %v907_v12, 0.0  ;;  %v910_v23 = vadd.f32 %v8109_v17, %v9905_v60  ;;  %v901_v24 = vpop.f32.mrb[59].mxu0 }
 0x163   : > { %v10087_v25 = vld [vmem:[#allocation3 + $0x71] sm:$0xff]  ;;  %v1017_v26 = vmax.f32 %v899_v16, 0.0  ;;  %v902_v28 = vadd.f32 %v9905_v60, %v901_v24  ;;  %8305 = vmatpush3.bf16.msra.mxu1 %v9343_v49  ;;  %v1258_v16 = vpack.c.bf16 %v9981_v7, %v9969_v44 }
 0x164   : > { %v1287_v27 = vpack.c.bf16 %v10087_v25, %v2137_v43  ;;  %v1061_v29 = vmax.f32 %v1016_v18, %v1019_v19  ;;  %v1020_v30 = vmax.f32 %v910_v23, 0.0  ;;  %8314 = vmatprep.subr.bf16.mxu1 %v10082_v14  ;;  %v10094_v32 = vld [vmem:[#allocation3 + $0x72] sm:$0xff] }
 0x165   : > { %v10096_v33 = vld [vmem:[#allocation3 + $0x73] sm:$0xff]  ;;  %v1018_v35 = vmax.f32 %v902_v28, 0.0  ;;  %v4544_v42 = vpack.c.bf16 %v10094_v32, %v10092_v31  ;;  %v9496_v31 = vld [vmem:[%s11292_s3 + $0x5e0] sm:$0xff]   ;;  %v9497_v32 = vld [vmem:[%s11292_s3 + $0x5e8] sm:$0xff]  }
 0x166   : > { %8143 = vmatmul.mubr.bf16.gmra.mrb[76].mxu0 %v1287_v27  ;;  %v10102_v38 = vld [vmem:[#allocation3 + $0x74] sm:$0xff]  ;;  %1097 = vst [vmem:[#allocation2 + $0xe0] sm:$0xff] %v1061_v29  ;;  %v1062_v43 = vmax.f32 %v1017_v26, %v1020_v30  ;;  %v4694_v45 = vpack.c.bf16 %v10096_v33, %v10098_v36  ;;  %v9504_v33 = vld [vmem:[%s11292_s3 + $0x620] sm:$0xff]   ;;  %v9505_v36 = vld [vmem:[%s11292_s3 + $0x628] sm:$0xff]  }
 0x167   : > { %8162 = vmatprep.mubr.bf16.mxu0 %v1256_v6  ;;  %v4844_v46 = vpack.c.bf16 %v10102_v38, %v10100_v37  ;;  %v1137_v47 = vld [vmem:[#allocation2 + $0xc0] ss:$2 sm:$0xff]  ;;  %v1185_v58 = vld [vmem:[#allocation2 + $0xc1] ss:$2 sm:$0xff]  ;;  %v1060_v49 = vmax.f32 %v1015_v34, %v1018_v35  ;;  %v8112_v2 = vpop.f32.mrb[60].mxu0  ;;  %v9340_v19 = vld [vmem:[%s11292_s3 + $0x90] sm:$0xff]  }
 0x168   : > { %v1216_v3 = vmax.f32 %v1137_v47, %v1185_v58  ;;  %1098 = vst [vmem:[#allocation2 + $0xe8] sm:$0xff] %v1062_v43  ;;  %v914_v4 = vpop.f32.mrb[61].mxu0  ;;  %v923_v27 = vadd.f32 %v8112_v2, %v9905_v60  ;;  %v1532_v34 = vld [vmem:[#allocation3 + $0x12] sm:$0xff]  ;;  %v10136_v35 = vld [vmem:[#allocation3 + $0x22] sm:$0xff]  ;;  %v1259_v47 = vpack.c.bf16 %v10061_v59, %v10045_v10 }
 0x169   : > { %v1139_v8 = vld [vmem:[#allocation2 + $0xd0] ss:$2 sm:$0xf]  ;;  %v1187_v11 = vld [vmem:[#allocation2 + $0xd1] ss:$2 sm:$0xf]  ;;  %v915_v39 = vadd.f32 %v9905_v60, %v914_v4 }
 0x16a   : > { %1096 = vst [vmem:[#allocation2 + $0xd8] sm:$0xff] %v1060_v49  ;;  %1240 = vst [vmem:[#allocation3 + $0x80] sm:$0xff] %v1216_v3  ;;  %v1217_v40 = vmax.f32 %v1139_v8, %v1187_v11  ;;  %v8113_v0 = vpop.f32.mrb[62].mxu0  ;;  %v1023_v49 = vmax.f32 %v923_v27, 0.0  ;;  %v1531_v8 = vld [vmem:[#allocation3 + $0x2] sm:$0xff]  ;;  %v9342_v11 = vld [vmem:[%s11292_s3 + $0x98] sm:$0xff]  }
 0x16b   : > { %v1021_v6 = vmax.f32 %v915_v39, 0.0  ;;  %v926_v12 = vadd.f32 %v8113_v0, %v9905_v60  ;;  %v917_v13 = vpop.f32.mrb[63].mxu0  ;;  %v1539_v39 = vpack.c.bf16 %v1532_v34, %v1531_v8  ;;  %v9354_v8 = vld [vmem:[%s11292_s3 + $0xc8] sm:$0xff]  }
 0x16c   : > { %1241 = vst [vmem:[#allocation3 + $0x88] sm:$0xf] %v1217_v40  ;;  %v918_v18 = vadd.f32 %v9905_v60, %v917_v13  ;;  %v2290_v40 = vpack.c.bf16 %v10136_v35, %v1532_v34  ;;  %v2432_v34 = vld [vmem:[#allocation3 + $0x13] sm:$0xff]  ;;  %v9510_v37 = vld [vmem:[%s11294_s5 + $0x8] sm:$0xff]  }
 0x16d   : > { %v1024_v17 = vmax.f32 %v926_v12, 0.0  ;;  %v2284_v12 = vld [vmem:[#allocation3 + $0x32] sm:$0xff]  ;;  %v9511_v38 = vld [vmem:[%s11294_s5 + $0x28] sm:$0xff]  }
 0x16e   : > { %8163 = vmatmul.mubr.bf16.vlgmr.msra.gmra.mrb[72].mxu0 %v1257_v5 }
 0x16f   : > { %8171 = vmatpush3.bf16.msra.mxu0 %v10043_v9  ;;  %8166 = vmatprep.mubr.bf16.mxu0 %v1258_v16  ;;  %v1143_v23 = vld [vmem:[#allocation2 + $0xe8] ss:$2 sm:$0xf]  ;;  %v1191_v24 = vld [vmem:[#allocation2 + $0xe9] ss:$2 sm:$0xf]  ;;  %v1063_v26 = vmax.f32 %v1021_v6, %v1024_v17 }
 0x170   : > { %8172 = vmatprep.subr.bf16.mxu0 %v9338_v15  ;;  %v1219_v28 = vmax.f32 %v1143_v23, %v1191_v24  ;;  %v10129_v41 = vpop.f32.mrb[64].mxu0  ;;  %v1022_v9 = vmax.f32 %v918_v18, 0.0  ;;  %v2287_v6 = vld [vmem:[#allocation3 + $0x62] sm:$0xff]  ;;  %v9348_v24 = vld [vmem:[%s11292_s3 + $0xb0] sm:$0xff]  }
 0x171   : > { %v1141_v44 = vld [vmem:[#allocation2 + $0xd8] ss:$2 sm:$0xff]  ;;  %v1189_v7 = vld [vmem:[#allocation2 + $0xd9] ss:$2 sm:$0xff]  ;;  %1099 = vst [vmem:[#allocation2 + $0xf0] sm:$0xff] %v1063_v26  ;;  %v930_v5 = vpop.f32.mrb[65].mxu0 }
 0x172   : > { %v10131_v62 = vmax.f32 %v1141_v44, %v1189_v7  ;;  %1243 = vst [vmem:[#allocation3 + $0x98] sm:$0xf] %v1219_v28  ;;  %v931_v29 = vadd.f32 %v9905_v60, %v930_v5  ;;  %v10134_v30 = vpop.f32.mrb[66].mxu0  ;;  %v9346_v16 = vld [vmem:[%s11292_s3 + $0xa8] sm:$0xff]   ;;  %v9349_v28 = vld [vmem:[%s11292_s3 + $0x210] sm:$0xff]  }
 0x173   : > { %8173 = vmatpush3.bf16.msra.mxu0 %v9338_v15  ;;  %v933_v43 = vpop.f32.mrb[67].mxu0  ;;  %v10141_v58 = vld [vmem:[#allocation3 + $0x81] sm:$0xff]  ;;  %v2286_v15 = vld [vmem:[#allocation3 + $0x52] sm:$0xff] }
 0x174   : > { %1242 = vst [vmem:[#allocation3 + $0x90] sm:$0xff] %v10131_v62  ;;  %8174 = vmatprep.subr.bf16.mxu0 %v9340_v19  ;;  %v1025_v2 = vmax.f32 %v931_v29, 0.0  ;;  %v934_v3 = vadd.f32 %v9905_v60, %v933_v43  ;;  %v2143_v4 = vpack.c.bf16 %v10141_v58, %v10087_v25  ;;  %v9344_v60 = vld [vmem:[%s11292_s3 + $0xa0] sm:$0xff]   ;;  %v9347_v17 = vld [vmem:[%s11292_s3 + $0x208] sm:$0xff]   ;;  %v2292_v18 = vpack.c.bf16 %v2287_v6, %v2286_v15  ;;  %v9350_v43 = vld [vmem:[%s11292_s3 + $0xb8] sm:$0xff]  }
 0x175   : > { %v2285_v25 = vld [vmem:[#allocation3 + $0x42] sm:$0xff] }
 0x176   : > { %8167 = vmatmul.mubr.bf16.gmra.mrb[76].mxu0 %v1259_v47  ;;  %v1064_v0 = vmax.f32 %v1022_v9, %v1025_v2  ;;  %v1026_v10 = vmax.f32 %v934_v3, 0.0  ;;  %8287 = vmatmul.mubr.bf16.gmra.mrb[4].mxu1 %v2143_v4  ;;  %v2291_v13 = vpack.c.bf16 %v2285_v25, %v2284_v12  ;;  %v10166_v44 = vld [vmem:[#allocation3 + $0x82] sm:$0xff]  ;;  %v2288_v9 = vld [vmem:[#allocation3 + $0x72] sm:$0xff]  ;;  %v10185_v4 = vpack.c.bf16 %v2284_v12, %v10136_v35 }
 0x177   : > { %8175 = vmatpush3.bf16.msra.mxu0 %v9340_v19  ;;  %8186 = vmatprep.mubr.bf16.mxu0 %v1539_v39  ;;  %v2293_v29 = vpack.c.bf16 %v10166_v44, %v2288_v9  ;;  %v9351_v47 = vld [vmem:[%s11292_s3 + $0x218] sm:$0xff]   ;;  %v9352_v2 = vld [vmem:[%s11292_s3 + $0xc0] sm:$0xff]   ;;  %v9355_v39 = vld [vmem:[%s11292_s3 + $0x228] sm:$0xff]  }
 0x178   : > { %8306 = vmatprep.mubr.bf16.mxu1 %v2290_v40  ;;  %1100 = vst [vmem:[#allocation2 + $0xf8] sm:$0xff] %v1064_v0  ;;  %v1065_v59 = vmax.f32 %v1023_v49, %v1026_v10  ;;  %8176 = vmatprep.subr.bf16.mxu0 %v9342_v11  ;;  %v9353_v3 = vld [vmem:[%s11292_s3 + $0x220] sm:$0xff]   ;;  %v9356_v35 = vld [vmem:[%s11292_s3 + $0xd0] sm:$0xff]   ;;  %v10203_v0 = vpack.c.bf16 %v2288_v9, %v2287_v6 }
 0x179   : > { %v9357_v40 = vld [vmem:[%s11292_s3 + $0x230] sm:$0xff]   ;;  %v1681_v10 = vld [vmem:[#allocation3 + $0x3] sm:$0xff] }
 0x17a   : > { %1101 = vst [vmem:[#allocation2 + $0x100] sm:$0xff] %v1065_v59  ;;  %v1689_v59 = vpack.c.bf16 %v2432_v34, %v1681_v10  ;;  %v9360_v6 = vld [vmem:[%s11292_s3 + $0xe0] sm:$0xff]  }
 0x17b   : > { %8177 = vmatpush3.bf16.msra.mxu0 %v9342_v11  ;;  %v10190_v11 = vpack.c.bf16 %v2286_v15, %v2285_v25  ;;  %v9359_v25 = vld [vmem:[%s11292_s3 + $0x238] sm:$0xff]   ;;  %v9361_v12 = vld [vmem:[%s11292_s3 + $0x240] sm:$0xff]  }
 0x17c   : > { %8178 = vmatprep.subr.bf16.mxu0 %v9344_v60  ;;  %v2437_v15 = vld [vmem:[#allocation3 + $0x63] sm:$0xff]  ;;  %v4840_v56 = vld [vmem:[#allocation3 + $0x94] sm:$0xff] }
 0x17e   : > { %8307 = vmatmul.mubr.bf16.vlgmr.msra.gmra.mrb[0].mxu1 %v2291_v13  ;;  %v2435_v13 = vld [vmem:[#allocation3 + $0x43] sm:$0xff] }
 0x17f   : > { %8179 = vmatpush3.bf16.msra.mxu0 %v9344_v60  ;;  %v1145_v19 = vld [vmem:[#allocation2 + $0xf0] ss:$2 sm:$0xff]  ;;  %v1193_v23 = vld [vmem:[#allocation2 + $0xf1] ss:$2 sm:$0xff]  ;;  %8315 = vmatpush3.bf16.msra.mxu1 %v10082_v14  ;;  %v10168_v14 = vld [vmem:[#allocation3 + $0x23] sm:$0xff] }
 0x180   : > { %8310 = vmatprep.mubr.bf16.mxu1 %v2292_v18  ;;  %v1220_v26 = vmax.f32 %v1145_v19, %v1193_v23  ;;  %8180 = vmatprep.subr.bf16.mxu0 %v9346_v16  ;;  %v2440_v49 = vpack.c.bf16 %v10168_v14, %v2432_v34  ;;  %v9358_v60 = vld [vmem:[%s11292_s3 + $0xd8] sm:$0xff]   ;;  %v9362_v19 = vld [vmem:[%s11292_s3 + $0xe8] sm:$0xff]  }
 0x181   : > { %8316 = vmatprep.subr.bf16.mxu1 %v9347_v17  ;;  %v1147_v7 = vld [vmem:[#allocation2 + $0x100] ss:$2 sm:$0xf]  ;;  %v1195_v27 = vld [vmem:[#allocation2 + $0x101] ss:$2 sm:$0xf] }
 0x182   : > { %1244 = vst [vmem:[#allocation3 + $0xa0] sm:$0xff] %v1220_v26  ;;  %v1221_v5 = vmax.f32 %v1147_v7, %v1195_v27  ;;  %v2436_v18 = vld [vmem:[#allocation3 + $0x53] sm:$0xff]  ;;  %v9363_v23 = vld [vmem:[%s11292_s3 + $0x248] sm:$0xff]  }
 0x183   : > { %8181 = vmatpush3.bf16.msra.mxu0 %v9346_v16  ;;  %8317 = vmatpush3.bf16.msra.mxu1 %v9347_v17  ;;  %v2434_v16 = vld [vmem:[#allocation3 + $0x33] sm:$0xff]  ;;  %v10230_v7 = vld [vmem:[#allocation3 + $0x83] sm:$0xff] }
 0x184   : > { %8182 = vmatprep.subr.bf16.mxu0 %v9348_v24  ;;  %1245 = vst [vmem:[#allocation3 + $0xa8] sm:$0xf] %v1221_v5  ;;  %8318 = vmatprep.subr.bf16.mxu1 %v9349_v28  ;;  %v2441_v17 = vpack.c.bf16 %v2435_v13, %v2434_v16  ;;  %v9364_v26 = vld [vmem:[%s11292_s3 + $0xf0] sm:$0xff]   ;;  %v10232_v27 = vld [vmem:[#allocation3 + $0x24] sm:$0xff]  ;;  %v9366_v34 = vld [vmem:[%s11292_s3 + $0xf8] sm:$0xff]  }
 0x185   : > { %v2438_v5 = vld [vmem:[#allocation3 + $0x73] sm:$0xff] }
 0x186   : > { %8311 = vmatmul.mubr.bf16.gmra.mrb[4].mxu1 %v2293_v29  ;;  %v2443_v9 = vpack.c.bf16 %v10230_v7, %v2438_v5  ;;  %v2582_v29 = vld [vmem:[#allocation3 + $0x14] sm:$0xff]  ;;  %v10267_v10 = vpack.c.bf16 %v2438_v5, %v2437_v15 }
 0x187   : > { %8183 = vmatpush3.bf16.msra.mxu0 %v9348_v24  ;;  %8319 = vmatpush3.bf16.msra.mxu1 %v9349_v28  ;;  %v2442_v24 = vpack.c.bf16 %v2437_v15, %v2436_v18  ;;  %v9365_v28 = vld [vmem:[%s11292_s3 + $0x250] sm:$0xff]   ;;  %v2585_v15 = vld [vmem:[#allocation3 + $0x44] sm:$0xff] }
 0x188   : > { %8330 = vmatprep.mubr.bf16.mxu1 %v2440_v49  ;;  %8184 = vmatprep.subr.bf16.mxu0 %v9350_v43  ;;  %v9368_v49 = vld [vmem:[%s11292_s3 + $0x100] sm:$0xff]   ;;  %v9381_v5 = vld [vmem:[%s11292_s3 + $0x290] sm:$0xff]  }
 0x189   : > { %8320 = vmatprep.subr.bf16.mxu1 %v9351_v47 }
 0x18b   : > { %8185 = vmatpush3.bf16.msra.mxu0 %v9350_v43  ;;  %8321 = vmatpush3.bf16.msra.mxu1 %v9351_v47  ;;  %v9367_v43 = vld [vmem:[%s11292_s3 + $0x258] sm:$0xff]   ;;  %v2590_v47 = vpack.c.bf16 %v10232_v27, %v2582_v29 }
 0x18c   : > { %8194 = vmatprep.subr.bf16.mxu0 %v9352_v2  ;;  %8322 = vmatprep.subr.bf16.mxu1 %v9353_v3 }
 0x18e   : > { %8187 = vmatmul.mubr.bf16.vlgmr.msra.gmra.mrb[72].mxu0 %v10185_v4 }
 0x18f   : > { %8190 = vmatprep.mubr.bf16.mxu0 %v10190_v11  ;;  %8195 = vmatpush3.bf16.msra.mxu0 %v9352_v2  ;;  %v9369_v2 = vld [vmem:[%s11292_s3 + $0x260] sm:$0xff]  }
 0x190   : > { %8323 = vmatpush3.bf16.msra.mxu1 %v9353_v3  ;;  %8196 = vmatprep.subr.bf16.mxu0 %v9354_v8  ;;  %v10249_v3 = vpack.c.bf16 %v2434_v16, %v10168_v14  ;;  %v9372_v14 = vld [vmem:[%s11292_s3 + $0x110] sm:$0xff]   ;;  %v2587_v16 = vld [vmem:[#allocation3 + $0x64] sm:$0xff] }
 0x191   : > { %8324 = vmatprep.subr.bf16.mxu1 %v9355_v39 }
 0x193   : > { %8197 = vmatpush3.bf16.msra.mxu0 %v9354_v8  ;;  %v9370_v8 = vld [vmem:[%s11292_s3 + $0x108] sm:$0xff]  }
 0x194   : > { %8325 = vmatpush3.bf16.msra.mxu1 %v9355_v39  ;;  %8198 = vmatprep.subr.bf16.mxu0 %v9356_v35  ;;  %v10254_v39 = vpack.c.bf16 %v2436_v18, %v2435_v13  ;;  %v9377_v13 = vld [vmem:[%s11292_s3 + $0x280] sm:$0xff]  }
 0x195   : > { %8326 = vmatprep.subr.bf16.mxu1 %v9357_v40 }
 0x196   : > { %8191 = vmatmul.mubr.bf16.gmra.mrb[76].mxu0 %v10203_v0 }
 0x197   : > { %8199 = vmatpush3.bf16.msra.mxu0 %v9356_v35  ;;  %8210 = vmatprep.mubr.bf16.mxu0 %v1689_v59  ;;  %v9371_v35 = vld [vmem:[%s11292_s3 + $0x268] sm:$0xff]   ;;  %v9374_v59 = vld [vmem:[%s11292_s3 + $0x118] sm:$0xff]  }
 0x198   : > { %8327 = vmatpush3.bf16.msra.mxu1 %v9357_v40  ;;  %8200 = vmatprep.subr.bf16.mxu0 %v9358_v60  ;;  %v9373_v40 = vld [vmem:[%s11292_s3 + $0x270] sm:$0xff]  }
 0x199   : > { %8328 = vmatprep.subr.bf16.mxu1 %v9359_v25 }
 0x19b   : > { %8201 = vmatpush3.bf16.msra.mxu0 %v9358_v60  ;;  %v1831_v60 = vld [vmem:[#allocation3 + $0x4] sm:$0xff] }
 0x19c   : > { %8329 = vmatpush3.bf16.msra.mxu1 %v9359_v25  ;;  %8202 = vmatprep.subr.bf16.mxu0 %v9360_v6  ;;  %v1839_v25 = vpack.c.bf16 %v2582_v29, %v1831_v60  ;;  %v10296_v29 = vld [vmem:[#allocation3 + $0x30] sm:$0xff]  ;;  %v9386_v60 = vld [vmem:[%s11292_s3 + $0x148] sm:$0xff]  }
 0x19d   : > { %8338 = vmatprep.subr.bf16.mxu1 %v9361_v12 }
 0x19f   : > { %8331 = vmatmul.mubr.bf16.vlgmr.msra.gmra.mrb[0].mxu1 %v2441_v17  ;;  %8203 = vmatpush3.bf16.msra.mxu0 %v9360_v6  ;;  %v9375_v6 = vld [vmem:[%s11292_s3 + $0x278] sm:$0xff]  }
 0x1a0   : > { %8334 = vmatprep.mubr.bf16.mxu1 %v2442_v24  ;;  %8339 = vmatpush3.bf16.msra.mxu1 %v9361_v12  ;;  %v9376_v12 = vld [vmem:[%s11292_s3 + $0x120] sm:$0xff]   ;;  %v2584_v17 = vld [vmem:[#allocation3 + $0x34] sm:$0xff]  ;;  %v9379_v24 = vld [vmem:[%s11292_s3 + $0x288] sm:$0xff]  }
 0x1a1   : > { %8204 = vmatprep.subr.bf16.mxu0 %v9362_v19  ;;  %8340 = vmatprep.subr.bf16.mxu1 %v9363_v23  ;;  %v2591_v18 = vpack.c.bf16 %v2585_v15, %v2584_v17 }
 0x1a3   : > { %8205 = vmatpush3.bf16.msra.mxu0 %v9362_v19  ;;  %v2586_v19 = vld [vmem:[#allocation3 + $0x54] sm:$0xff] }
 0x1a4   : > { %8341 = vmatpush3.bf16.msra.mxu1 %v9363_v23  ;;  %8206 = vmatprep.subr.bf16.mxu0 %v9364_v26  ;;  %v9378_v23 = vld [vmem:[%s11292_s3 + $0x128] sm:$0xff]  }
 0x1a5   : > { %8342 = vmatprep.subr.bf16.mxu1 %v9365_v28 }
 0x1a7   : > { %8335 = vmatmul.mubr.bf16.gmra.mrb[4].mxu1 %v2443_v9  ;;  %8207 = vmatpush3.bf16.msra.mxu0 %v9364_v26  ;;  %v2592_v26 = vpack.c.bf16 %v2587_v16, %v2586_v19  ;;  %v10294_v9 = vld [vmem:[#allocation3 + $0x84] sm:$0xff] }
 0x1a8   : > { %8343 = vmatpush3.bf16.msra.mxu1 %v9365_v28  ;;  %8354 = vmatprep.mubr.bf16.mxu1 %v2590_v47  ;;  %v9380_v28 = vld [vmem:[%s11292_s3 + $0x130] sm:$0xff]   ;;  %v2733_v47 = vld [vmem:[#allocation3 + $0x20] sm:$0xff] }
 0x1a9   : > { %8208 = vmatprep.subr.bf16.mxu0 %v9366_v34  ;;  %8344 = vmatprep.subr.bf16.mxu1 %v9367_v43 }
 0x1ab   : > { %8209 = vmatpush3.bf16.msra.mxu0 %v9366_v34  ;;  %v2588_v34 = vld [vmem:[#allocation3 + $0x74] sm:$0xff] }
 0x1ac   : > { %8345 = vmatpush3.bf16.msra.mxu1 %v9367_v43  ;;  %8218 = vmatprep.subr.bf16.mxu0 %v9368_v49  ;;  %v2593_v43 = vpack.c.bf16 %v10294_v9, %v2588_v34 }
 0x1ad   : > { %8346 = vmatprep.subr.bf16.mxu1 %v9369_v2 }
 0x1ae   : > { %8211 = vmatmul.mubr.bf16.vlgmr.msra.gmra.mrb[72].mxu0 %v10249_v3 }
 0x1af   : > { %8214 = vmatprep.mubr.bf16.mxu0 %v10254_v39  ;;  %8219 = vmatpush3.bf16.msra.mxu0 %v9368_v49  ;;  %v9382_v49 = vld [vmem:[%s11292_s3 + $0x138] sm:$0xff]  }
 0x1b0   : > { %8347 = vmatpush3.bf16.msra.mxu1 %v9369_v2  ;;  %8220 = vmatprep.subr.bf16.mxu0 %v9370_v8  ;;  %v9383_v2 = vld [vmem:[%s11292_s3 + $0x298] sm:$0xff]  }
 0x1b1   : > { %8348 = vmatprep.subr.bf16.mxu1 %v9371_v35 }
 0x1b3   : > { %8221 = vmatpush3.bf16.msra.mxu0 %v9370_v8  ;;  %v2741_v8 = vpack.c.bf16 %v10296_v29, %v2733_v47 }
 0x1b4   : > { %8349 = vmatpush3.bf16.msra.mxu1 %v9371_v35  ;;  %8222 = vmatprep.subr.bf16.mxu0 %v9372_v14  ;;  %v9384_v35 = vld [vmem:[%s11292_s3 + $0x140] sm:$0xff]  }
 0x1b5   : > { %8350 = vmatprep.subr.bf16.mxu1 %v9373_v40 }
 0x1b6   : > { %8215 = vmatmul.mubr.bf16.gmra.mrb[76].mxu0 %v10267_v10 }
 0x1b7   : > { %8223 = vmatpush3.bf16.msra.mxu0 %v9372_v14  ;;  %8234 = vmatprep.mubr.bf16.mxu0 %v1839_v25  ;;  %v9385_v14 = vld [vmem:[%s11292_s3 + $0x2a0] sm:$0xff]   ;;  %v9387_v25 = vld [vmem:[%s11292_s3 + $0x2a8] sm:$0xff]  }
 0x1b8   : > { %8351 = vmatpush3.bf16.msra.mxu1 %v9373_v40  ;;  %8224 = vmatprep.subr.bf16.mxu0 %v9374_v59  ;;  %v10313_v40 = vpack.c.bf16 %v2584_v17, %v10232_v27  ;;  %v9388_v27 = vld [vmem:[%s11292_s3 + $0x150] sm:$0xff]  }
 0x1b9   : > { %8352 = vmatprep.subr.bf16.mxu1 %v9375_v6 }
 0x1bb   : > { %8225 = vmatpush3.bf16.msra.mxu0 %v9374_v59  ;;  %v10318_v59 = vpack.c.bf16 %v2586_v19, %v2585_v15  ;;  %v9390_v15 = vld [vmem:[%s11292_s3 + $0x158] sm:$0xff]   ;;  %v9393_v19 = vld [vmem:[%s11292_s3 + $0x2c0] sm:$0xff]  }
 0x1bc   : > { %8353 = vmatpush3.bf16.msra.mxu1 %v9375_v6  ;;  %8226 = vmatprep.subr.bf16.mxu0 %v9376_v12  ;;  %v9389_v6 = vld [vmem:[%s11292_s3 + $0x2b0] sm:$0xff]  }
 0x1bd   : > { %8362 = vmatprep.subr.bf16.mxu1 %v9377_v13 }
 0x1bf   : > { %8355 = vmatmul.mubr.bf16.vlgmr.msra.gmra.mrb[0].mxu1 %v2591_v18  ;;  %8227 = vmatpush3.bf16.msra.mxu0 %v9376_v12  ;;  %v10331_v12 = vpack.c.bf16 %v2588_v34, %v2587_v16  ;;  %v9391_v18 = vld [vmem:[%s11292_s3 + $0x2b8] sm:$0xff]   ;;  %v9392_v16 = vld [vmem:[%s11292_s3 + $0x160] sm:$0xff]   ;;  %v9394_v34 = vld [vmem:[%s11292_s3 + $0x168] sm:$0xff]  }
 0x1c0   : > { %8358 = vmatprep.mubr.bf16.mxu1 %v2592_v26  ;;  %8363 = vmatpush3.bf16.msra.mxu1 %v9377_v13  ;;  %v1982_v13 = vld [vmem:[#allocation3 + $0x10] sm:$0xff]  ;;  %v2735_v26 = vld [vmem:[#allocation3 + $0x40] sm:$0xff] }
 0x1c1   : > { %8228 = vmatprep.subr.bf16.mxu0 %v9378_v23  ;;  %8364 = vmatprep.subr.bf16.mxu1 %v9379_v24  ;;  %v1990_v17 = vpack.c.bf16 %v2733_v47, %v1982_v13  ;;  %v9592_v13 = vld [vmem:[%s11291_s2] ss:$0 sm:$0xff] }
 0x1c3   : > { %8229 = vmatpush3.bf16.msra.mxu0 %v9378_v23  ;;  %v2736_v23 = vld [vmem:[#allocation3 + $0x50] sm:$0xff] }
 0x1c4   : > { %8365 = vmatpush3.bf16.msra.mxu1 %v9379_v24  ;;  %8230 = vmatprep.subr.bf16.mxu0 %v9380_v28  ;;  %v2738_v24 = vld [vmem:[#allocation3 + $0x70] sm:$0xff] }
 0x1c5   : > { %8366 = vmatprep.subr.bf16.mxu1 %v9381_v5 }
 0x1c7   : > { %8359 = vmatmul.mubr.bf16.gmra.mrb[4].mxu1 %v2593_v43  ;;  %8231 = vmatpush3.bf16.msra.mxu0 %v9380_v28  ;;  %v2742_v28 = vpack.c.bf16 %v2736_v23, %v2735_v26  ;;  %v9395_v43 = vld [vmem:[%s11292_s3 + $0x2c8] sm:$0xff]  }
 0x1c8   : > { %8367 = vmatpush3.bf16.msra.mxu1 %v9381_v5  ;;  %8378 = vmatprep.mubr.bf16.mxu1 %v2741_v8  ;;  %v2737_v5 = vld [vmem:[#allocation3 + $0x60] sm:$0xff] }
 0x1c9   : > { %8232 = vmatprep.subr.bf16.mxu0 %v9382_v49  ;;  %8368 = vmatprep.subr.bf16.mxu1 %v9383_v2  ;;  %v2743_v47 = vpack.c.bf16 %v2738_v24, %v2737_v5  ;;  %v2739_v8 = vld [vmem:[#allocation3 + $0x80] sm:$0xff] }
 0x1cb   : > { %8233 = vmatpush3.bf16.msra.mxu0 %v9382_v49  ;;  %v9396_v49 = vld [vmem:[%s11292_s3 + $0x170] sm:$0xff]  }
 0x1cc   : > { %8369 = vmatpush3.bf16.msra.mxu1 %v9383_v2  ;;  %8242 = vmatprep.subr.bf16.mxu0 %v9384_v35  ;;  %v9397_v2 = vld [vmem:[%s11292_s3 + $0x2d0] sm:$0xff]  }
 0x1cd   : > { %8370 = vmatprep.subr.bf16.mxu1 %v9385_v14 }
 0x1ce   : > { %8235 = vmatmul.mubr.bf16.vlgmr.msra.gmra.mrb[72].mxu0 %v10313_v40 }
 0x1cf   : > { %8238 = vmatprep.mubr.bf16.mxu0 %v10318_v59  ;;  %8243 = vmatpush3.bf16.msra.mxu0 %v9384_v35  ;;  %v2744_v35 = vpack.c.bf16 %v10131_v62, %v2739_v8  ;;  %v9400_v62 = vld [vmem:[%s11292_s3 + $0x2e0] sm:$0xff]  }
 0x1d0   : > { %8371 = vmatpush3.bf16.msra.mxu1 %v9385_v14  ;;  %8244 = vmatprep.subr.bf16.mxu0 %v9386_v60  ;;  %v2883_v14 = vld [vmem:[#allocation3 + $0x21] sm:$0xff] }
 0x1d1   : > { %8372 = vmatprep.subr.bf16.mxu1 %v9387_v25 }
 0x1d3   : > { %8245 = vmatpush3.bf16.msra.mxu0 %v9386_v60  ;;  %v9398_v60 = vld [vmem:[%s11292_s3 + $0x178] sm:$0xff]  }
 0x1d4   : > { %8373 = vmatpush3.bf16.msra.mxu1 %v9387_v25  ;;  %8246 = vmatprep.subr.bf16.mxu0 %v9388_v27  ;;  %v9399_v25 = vld [vmem:[%s11292_s3 + $0x2d8] sm:$0xff]  }
 0x1d5   : > { %8374 = vmatprep.subr.bf16.mxu1 %v9389_v6 }
 0x1d6   : > { %8239 = vmatmul.mubr.bf16.gmra.mrb[76].mxu0 %v10331_v12 }
 0x1d7   : > { %8247 = vmatpush3.bf16.msra.mxu0 %v9388_v27  ;;  %8258 = vmatprep.mubr.bf16.mxu0 %v1990_v17  ;;  %v2891_v27 = vpack.c.bf16 %v9994_v20, %v2883_v14  ;;  %v10376_v17 = vpack.c.bf16 %v2737_v5, %v2736_v23  ;;  %v9403_v14 = vld [vmem:[%s11292_s3 + $0x2f8] sm:$0xff]  }
 0x1d8   : > { %8375 = vmatpush3.bf16.msra.mxu1 %v9389_v6  ;;  %8248 = vmatprep.subr.bf16.mxu0 %v9390_v15  ;;  %v10370_v6 = vpack.c.bf16 %v2735_v26, %v10296_v29  ;;  %v939_v29 = vadd.f32 %v9592_v13, %v10129_v41  ;;  %v9443_v20 = vld [vmem:[%s11292_s3 + $0x438] sm:$0xff]  }
 0x1d9   : > { %8376 = vmatprep.subr.bf16.mxu1 %v9391_v18 }
 0x1db   : > { %8249 = vmatpush3.bf16.msra.mxu0 %v9390_v15  ;;  %v942_v15 = vadd.f32 %v9592_v13, %v10134_v30  ;;  %v9402_v30 = vld [vmem:[%s11292_s3 + $0x2f0] sm:$0xff]  }
 0x1dc   : > { %8377 = vmatpush3.bf16.msra.mxu1 %v9391_v18  ;;  %8250 = vmatprep.subr.bf16.mxu0 %v9392_v16  ;;  %v9401_v18 = vld [vmem:[%s11292_s3 + $0x2e8] sm:$0xff]  }
 0x1dd   : > { %8386 = vmatprep.subr.bf16.mxu1 %v9393_v19 }
 0x1df   : > { %8379 = vmatmul.mubr.bf16.vlgmr.msra.gmra.mrb[0].mxu1 %v2742_v28  ;;  %8251 = vmatpush3.bf16.msra.mxu0 %v9392_v16  ;;  %v8120_v16 = vpop.f32.mrb[68].mxu0 }
 0x1e0   : > { %8382 = vmatprep.mubr.bf16.mxu1 %v2743_v47  ;;  %8387 = vmatpush3.bf16.msra.mxu1 %v9393_v19  ;;  %v1028_v19 = vmax.f32 %v942_v15, 0.0  ;;  %v955_v23 = vadd.f32 %v9592_v13, %v8120_v16  ;;  %v946_v26 = vpop.f32.mrb[69].mxu0 }
 0x1e1   : > { %8252 = vmatprep.subr.bf16.mxu0 %v9394_v34  ;;  %8388 = vmatprep.subr.bf16.mxu1 %v9395_v43  ;;  %v947_v28 = vadd.f32 %v9592_v13, %v946_v26  ;;  %v8121_v5 = vpop.f32.mrb[70].mxu0 }
 0x1e2   : > { %v949_v47 = vpop.f32.mrb[71].mxu0 }
 0x1e3   : > { %8253 = vmatpush3.bf16.msra.mxu0 %v9394_v34  ;;  %v1031_v34 = vmax.f32 %v955_v23, 0.0  ;;  %v1029_v41 = vmax.f32 %v947_v28, 0.0  ;;  %v9406_v23 = vld [vmem:[%s11292_s3 + $0x310] sm:$0xff]  }
 0x1e4   : > { %8389 = vmatpush3.bf16.msra.mxu1 %v9395_v43  ;;  %8254 = vmatprep.subr.bf16.mxu0 %v9396_v49  ;;  %v958_v43 = vadd.f32 %v9592_v13, %v8121_v5 }
 0x1e5   : > { %8390 = vmatprep.subr.bf16.mxu1 %v9397_v2 }
 0x1e7   : > { %8383 = vmatmul.mubr.bf16.gmra.mrb[4].mxu1 %v2744_v35  ;;  %8255 = vmatpush3.bf16.msra.mxu0 %v9396_v49  ;;  %v1027_v49 = vmax.f32 %v939_v29, 0.0  ;;  %v950_v35 = vadd.f32 %v9592_v13, %v949_v47  ;;  %v9593_v13 = vld [vmem:[#allocation3 + $0x41] sm:$0xff] }
 0x1e8   : > { %8391 = vmatpush3.bf16.msra.mxu1 %v9397_v2  ;;  %8402 = vmatprep.mubr.bf16.mxu1 %v2891_v27  ;;  %v10387_v2 = vpack.c.bf16 %v2739_v8, %v2738_v24  ;;  %v9404_v24 = vld [vmem:[%s11292_s3 + $0x300] sm:$0xff]   ;;  %v10396_v8 = vld [vmem:[#allocation3 + $0x71] sm:$0xff]  ;;  %v9405_v29 = vld [vmem:[%s11292_s3 + $0x308] sm:$0xff]  }
 0x1e9   : > { %8256 = vmatprep.subr.bf16.mxu0 %v9398_v60  ;;  %8392 = vmatprep.subr.bf16.mxu1 %v9399_v25  ;;  %v1030_v27 = vmax.f32 %v950_v35, 0.0  ;;  %v2893_v16 = vpack.c.bf16 %v10396_v8, %v10073_v54  ;;  %v9410_v35 = vld [vmem:[%s11292_s3 + $0x330] sm:$0xff]   ;;  %v9594_v54 = vld [vmem:[#allocation3 + $0x42] sm:$0xff] }
 0x1eb   : > { %8257 = vmatpush3.bf16.msra.mxu0 %v9398_v60  ;;  %v1067_v60 = vmax.f32 %v1028_v19, %v1031_v34  ;;  %v1066_v15 = vmax.f32 %v1027_v49, %v1030_v27  ;;  %v10407_v34 = vld [vmem:[#allocation3 + $0x91] sm:$0xff] }
 0x1ec   : > { %8393 = vmatpush3.bf16.msra.mxu1 %v9399_v25  ;;  %v1032_v25 = vmax.f32 %v958_v43, 0.0  ;;  %v2894_v47 = vpack.c.bf16 %v10407_v34, %v10141_v58  ;;  %v9407_v49 = vld [vmem:[%s11292_s3 + $0x318] sm:$0xff]   ;;  %v9409_v58 = vld [vmem:[%s11292_s3 + $0x328] sm:$0xff]  }
 0x1ed   : > { %8394 = vmatprep.subr.bf16.mxu1 %v9400_v62  ;;  %1103 = vst [vmem:[#allocation2 + $0x110] sm:$0xff] %v1067_v60  ;;  %1102 = vst [vmem:[#allocation2 + $0x108] sm:$0xff] %v1066_v15  ;;  %v9413_v60 = vld [vmem:[%s11292_s3 + $0x348] sm:$0xff]   ;;  %v10441_v27 = vld [vmem:[#allocation3 + $0x92] sm:$0xff] }
 0x1ee   : > { %8259 = vmatmul.mubr.bf16.vlgmr.msra.gmra.mrb[72].mxu0 %v10370_v6  ;;  %v9415_v15 = vld [vmem:[%s11292_s3 + $0x358] sm:$0xff]  }
 0x1ef   : > { %8262 = vmatprep.mubr.bf16.mxu0 %v10376_v17 }
 0x1f0   : > { %8395 = vmatpush3.bf16.msra.mxu1 %v9400_v62  ;;  %v1068_v62 = vmax.f32 %v1029_v41, %v1032_v25  ;;  %v9408_v41 = vld [vmem:[%s11292_s3 + $0x320] sm:$0xff]   ;;  %v9414_v25 = vld [vmem:[%s11292_s3 + $0x350] sm:$0xff]  }
 0x1f1   : > { %8396 = vmatprep.subr.bf16.mxu1 %v9401_v18 }
 0x1f2   : > { %1104 = vst [vmem:[#allocation2 + $0x118] sm:$0xff] %v1068_v62  ;;  %v3044_v62 = vpack.c.bf16 %v10441_v27, %v10166_v44  ;;  %v9417_v44 = vld [vmem:[%s11292_s3 + $0x368] sm:$0xff]  }
 0x1f4   : > { %8397 = vmatpush3.bf16.msra.mxu1 %v9401_v18  ;;  %v2892_v18 = vpack.c.bf16 %v10071_v53, %v9593_v13  ;;  %v1149_v28 = vld [vmem:[#allocation2 + $0x108] ss:$2 sm:$0xff]  ;;  %v1197_v5 = vld [vmem:[#allocation2 + $0x109] ss:$2 sm:$0xff]  ;;  %v9447_v53 = vld [vmem:[%s11292_s3 + $0x458] sm:$0xff]  }
 0x1f5   : > { %8398 = vmatprep.subr.bf16.mxu1 %v9402_v30  ;;  %v10409_v43 = vmax.f32 %v1149_v28, %v1197_v5  ;;  %v9421_v13 = vld [vmem:[%s11292_s3 + $0x388] sm:$0xff]   ;;  %v10503_v28 = vld [vmem:[#allocation3 + $0x94] sm:$0xff] }
 0x1f6   : > { %8263 = vmatmul.mubr.bf16.gmra.mrb[76].mxu0 %v10387_v2  ;;  %v3344_v5 = vpack.c.bf16 %v10503_v28, %v10294_v9  ;;  %v9433_v9 = vld [vmem:[%s11292_s3 + $0x3e8] sm:$0xff]  }
 0x1f7   : > { %1246 = vst [vmem:[#allocation3 + $0xb0] sm:$0xff] %v10409_v43 }
 0x1f8   : > { %8399 = vmatpush3.bf16.msra.mxu1 %v9402_v30 }
 0x1f9   : > { %8400 = vmatprep.subr.bf16.mxu1 %v9403_v14  ;;  %v1151_v19 = vld [vmem:[#allocation2 + $0x118] ss:$2 sm:$0xf]  ;;  %v1199_v30 = vld [vmem:[#allocation2 + $0x119] ss:$2 sm:$0xf] }
 0x1fa   : > { %v1223_v26 = vmax.f32 %v1151_v19, %v1199_v30  ;;  %v9423_v19 = vld [vmem:[%s11292_s3 + $0x398] sm:$0xff]   ;;  %v9428_v30 = vld [vmem:[%s11292_s3 + $0x3c0] sm:$0xff]  }
 0x1fc   : > { %8401 = vmatpush3.bf16.msra.mxu1 %v9403_v14  ;;  %1247 = vst [vmem:[#allocation3 + $0xb8] sm:$0xf] %v1223_v26  ;;  %v9412_v14 = vld [vmem:[%s11292_s3 + $0x340] sm:$0xff]   ;;  %v9430_v26 = vld [vmem:[%s11292_s3 + $0x3d0] sm:$0xff]  }
 0x1fd   : > { %8410 = vmatprep.subr.bf16.mxu1 %v9404_v24 }
 0x1ff   : > { %8403 = vmatmul.mubr.bf16.vlgmr.msra.gmra.mrb[0].mxu1 %v2892_v18  ;;  %v9422_v18 = vld [vmem:[%s11292_s3 + $0x390] sm:$0xff]  }
 0x200   : > { %8406 = vmatprep.mubr.bf16.mxu1 %v2893_v16  ;;  %8411 = vmatpush3.bf16.msra.mxu1 %v9404_v24  ;;  %v9420_v24 = vld [vmem:[%s11292_s3 + $0x380] sm:$0xff]  }
 0x201   : > { %8412 = vmatprep.subr.bf16.mxu1 %v9405_v29 }
 0x204   : > { %8413 = vmatpush3.bf16.msra.mxu1 %v9405_v29  ;;  %v10472_v29 = vld [vmem:[#allocation3 + $0x93] sm:$0xff] }
 0x205   : > { %8414 = vmatprep.subr.bf16.mxu1 %v9406_v23  ;;  %v3194_v16 = vpack.c.bf16 %v10472_v29, %v10230_v7  ;;  %v9425_v7 = vld [vmem:[%s11292_s3 + $0x3a8] sm:$0xff]  }
 0x207   : > { %8407 = vmatmul.mubr.bf16.gmra.mrb[4].mxu1 %v2894_v47  ;;  %v9431_v47 = vld [vmem:[%s11292_s3 + $0x3d8] sm:$0xff]  }
 0x208   : > { %8415 = vmatpush3.bf16.msra.mxu1 %v9406_v23  ;;  %8426 = vmatprep.mubr.bf16.mxu1 %v10185_v4  ;;  %v9411_v4 = vld [vmem:[%s11292_s3 + $0x338] sm:$0xff]   ;;  %v9429_v23 = vld [vmem:[%s11292_s3 + $0x3c8] sm:$0xff]  }
 0x209   : > { %8416 = vmatprep.subr.bf16.mxu1 %v9407_v49 }
 0x20c   : > { %8417 = vmatpush3.bf16.msra.mxu1 %v9407_v49  ;;  %v9436_v49 = vld [vmem:[%s11292_s3 + $0x400] sm:$0xff]  }
 0x20d   : > { %8418 = vmatprep.subr.bf16.mxu1 %v9408_v41 }
 0x210   : > { %8419 = vmatpush3.bf16.msra.mxu1 %v9408_v41  ;;  %v9437_v41 = vld [vmem:[%s11292_s3 + $0x408] sm:$0xff]  }
 0x211   : > { %8420 = vmatprep.subr.bf16.mxu1 %v9409_v58 }
 0x214   : > { %8421 = vmatpush3.bf16.msra.mxu1 %v9409_v58  ;;  %v9438_v58 = vld [vmem:[%s11292_s3 + $0x410] sm:$0xff]  }
 0x215   : > { %8422 = vmatprep.subr.bf16.mxu1 %v9410_v35 }
 0x218   : > { %8423 = vmatpush3.bf16.msra.mxu1 %v9410_v35  ;;  %v10534_v35 = vld [vmem:[#allocation3 + $0xa0] sm:$0xff] }
 0x219   : > { %8424 = vmatprep.subr.bf16.mxu1 %v9411_v4 }
 0x21c   : > { %8425 = vmatpush3.bf16.msra.mxu1 %v9411_v4  ;;  %v10536_v4 = vld [vmem:[#allocation3 + $0x90] sm:$0xff] }
 0x21d   : > { %8434 = vmatprep.subr.bf16.mxu1 %v9412_v14 }
 0x21f   : > { %8427 = vmatmul.mubr.bf16.vlgmr.msra.gmra.mrb[0].mxu1 %v10190_v11  ;;  %v9416_v11 = vld [vmem:[%s11292_s3 + $0x360] sm:$0xff]  }
 0x220   : > { %8430 = vmatprep.mubr.bf16.mxu1 %v10203_v0  ;;  %8435 = vmatpush3.bf16.msra.mxu1 %v9412_v14  ;;  %v9418_v0 = vld [vmem:[%s11292_s3 + $0x370] sm:$0xff]   ;;  %v3495_v14 = vpack.c.bf16 %v10534_v35, %v10536_v4 }
 0x221   : > { %8436 = vmatprep.subr.bf16.mxu1 %v9413_v60 }
 0x224   : > { %8437 = vmatpush3.bf16.msra.mxu1 %v9413_v60  ;;  %v9441_v60 = vld [vmem:[%s11292_s3 + $0x428] sm:$0xff]  }
 0x225   : > { %8438 = vmatprep.subr.bf16.mxu1 %v9414_v25 }
 0x227   : > { %8431 = vmatmul.mubr.bf16.gmra.mrb[4].mxu1 %v3044_v62  ;;  %v9445_v62 = vld [vmem:[%s11292_s3 + $0x448] sm:$0xff]  }
 0x228   : > { %8439 = vmatpush3.bf16.msra.mxu1 %v9414_v25  ;;  %8450 = vmatprep.mubr.bf16.mxu1 %v10249_v3  ;;  %v9419_v3 = vld [vmem:[%s11292_s3 + $0x378] sm:$0xff]   ;;  %v9442_v25 = vld [vmem:[%s11292_s3 + $0x430] sm:$0xff]  }
 0x229   : > { %8440 = vmatprep.subr.bf16.mxu1 %v9415_v15 }
 0x22c   : > { %8441 = vmatpush3.bf16.msra.mxu1 %v9415_v15 }
 0x22d   : > { %8442 = vmatprep.subr.bf16.mxu1 %v9416_v11 }
 0x230   : > { %8443 = vmatpush3.bf16.msra.mxu1 %v9416_v11  ;;  %v9446_v11 = vld [vmem:[%s11292_s3 + $0x450] sm:$0xff]  }
 0x231   : > { %8444 = vmatprep.subr.bf16.mxu1 %v9417_v44 }
 0x234   : > { %8445 = vmatpush3.bf16.msra.mxu1 %v9417_v44  ;;  %v10574_v44 = vld [vmem:[#allocation3 + $0xa1] sm:$0xff] }
 0x235   : > { %8446 = vmatprep.subr.bf16.mxu1 %v9418_v0 }
 0x238   : > { %8447 = vmatpush3.bf16.msra.mxu1 %v9418_v0  ;;  %v3645_v0 = vpack.c.bf16 %v10574_v44, %v10407_v34  ;;  %v9449_v34 = vld [vmem:[%s11292_s3 + $0x468] sm:$0xff]  }
 0x239   : > { %8448 = vmatprep.subr.bf16.mxu1 %v9419_v3 }
 0x23c   : > { %8449 = vmatpush3.bf16.msra.mxu1 %v9419_v3  ;;  %v3784_v3 = vld [vmem:[#allocation3 + $0x32] sm:$0xff] }
 0x23d   : > { %8458 = vmatprep.subr.bf16.mxu1 %v9420_v24 }
 0x23f   : > { %8451 = vmatmul.mubr.bf16.vlgmr.msra.gmra.mrb[0].mxu1 %v10254_v39  ;;  %v9424_v39 = vld [vmem:[%s11292_s3 + $0x3a0] sm:$0xff]  }
 0x240   : > { %8454 = vmatprep.mubr.bf16.mxu1 %v10267_v10  ;;  %8459 = vmatpush3.bf16.msra.mxu1 %v9420_v24  ;;  %v9426_v10 = vld [vmem:[%s11292_s3 + $0x3b0] sm:$0xff]  }
 0x241   : > { %8460 = vmatprep.subr.bf16.mxu1 %v9421_v13  ;;  %v9450_v24 = vld [vmem:[%s11292_s3 + $0x470] sm:$0xff]  }
 0x244   : > { %8461 = vmatpush3.bf16.msra.mxu1 %v9421_v13  ;;  %v9451_v13 = vld [vmem:[%s11292_s3 + $0x478] sm:$0xff]  }
 0x245   : > { %8462 = vmatprep.subr.bf16.mxu1 %v9422_v18 }
 0x247   : > { %8455 = vmatmul.mubr.bf16.gmra.mrb[4].mxu1 %v3194_v16  ;;  %v10596_v16 = vld [vmem:[#allocation3 + $0x82] sm:$0xff] }
 0x248   : > { %8463 = vmatpush3.bf16.msra.mxu1 %v9422_v18  ;;  %8474 = vmatprep.mubr.bf16.mxu1 %v10313_v40  ;;  %v9427_v40 = vld [vmem:[%s11292_s3 + $0x3b8] sm:$0xff]   ;;  %v9452_v18 = vld [vmem:[%s11292_s3 + $0x480] sm:$0xff]  }
 0x249   : > { %8464 = vmatprep.subr.bf16.mxu1 %v9423_v19 }
 0x24c   : > { %8465 = vmatpush3.bf16.msra.mxu1 %v9423_v19  ;;  %v9595_v19 = vld [vmem:[#allocation3 + $0x52] sm:$0xff] }
 0x24d   : > { %8466 = vmatprep.subr.bf16.mxu1 %v9424_v39 }
 0x250   : > { %8467 = vmatpush3.bf16.msra.mxu1 %v9424_v39  ;;  %v9596_v39 = vld [vmem:[#allocation3 + $0x62] sm:$0xff] }
 0x251   : > { %8468 = vmatprep.subr.bf16.mxu1 %v9425_v7 }
 0x254   : > { %8469 = vmatpush3.bf16.msra.mxu1 %v9425_v7  ;;  %v3793_v7 = vpack.c.bf16 %v9596_v39, %v9595_v19  ;;  %v9602_v19 = vld [vmem:[#allocation3 + $0x44] sm:$0xff] }
 0x255   : > { %8470 = vmatprep.subr.bf16.mxu1 %v9426_v10 }
 0x258   : > { %8471 = vmatpush3.bf16.msra.mxu1 %v9426_v10  ;;  %v9453_v10 = vld [vmem:[%s11292_s3 + $0x488] sm:$0xff]  }
 0x259   : > { %8472 = vmatprep.subr.bf16.mxu1 %v9427_v40 }
 0x25c   : > { %8473 = vmatpush3.bf16.msra.mxu1 %v9427_v40  ;;  %v9597_v40 = vld [vmem:[#allocation3 + $0x72] sm:$0xff] }
 0x25d   : > { %8482 = vmatprep.subr.bf16.mxu1 %v9428_v30 }
 0x25f   : > { %8475 = vmatmul.mubr.bf16.vlgmr.msra.gmra.mrb[0].mxu1 %v10318_v59  ;;  %v9432_v59 = vld [vmem:[%s11292_s3 + $0x3e0] sm:$0xff]  }
 0x260   : > { %8478 = vmatprep.mubr.bf16.mxu1 %v10331_v12  ;;  %8483 = vmatpush3.bf16.msra.mxu1 %v9428_v30  ;;  %v9434_v12 = vld [vmem:[%s11292_s3 + $0x3f0] sm:$0xff]   ;;  %v3794_v30 = vpack.c.bf16 %v10596_v16, %v9597_v40  ;;  %v9467_v40 = vld [vmem:[%s11292_s3 + $0x4f8] sm:$0xff]  }
 0x261   : > { %8484 = vmatprep.subr.bf16.mxu1 %v9429_v23 }
 0x264   : > { %8485 = vmatpush3.bf16.msra.mxu1 %v9429_v23 }
 0x265   : > { %8486 = vmatprep.subr.bf16.mxu1 %v9430_v26 }
 0x267   : > { %8479 = vmatmul.mubr.bf16.gmra.mrb[4].mxu1 %v3344_v5 }
 0x268   : > { %8487 = vmatpush3.bf16.msra.mxu1 %v9430_v26  ;;  %8498 = vmatprep.mubr.bf16.mxu1 %v10370_v6  ;;  %v9435_v6 = vld [vmem:[%s11292_s3 + $0x3f8] sm:$0xff]   ;;  %v9454_v26 = vld [vmem:[%s11292_s3 + $0x490] sm:$0xff]  }
 0x269   : > { %8488 = vmatprep.subr.bf16.mxu1 %v9431_v47 }
 0x26c   : > { %8489 = vmatpush3.bf16.msra.mxu1 %v9431_v47  ;;  %v10609_v47 = vld [vmem:[#allocation3 + $0xa2] sm:$0xff] }
 0x26d   : > { %8490 = vmatprep.subr.bf16.mxu1 %v9432_v59 }
 0x270   : > { %8491 = vmatpush3.bf16.msra.mxu1 %v9432_v59 }
 0x271   : > { %8492 = vmatprep.subr.bf16.mxu1 %v9433_v9 }
 0x274   : > { %8493 = vmatpush3.bf16.msra.mxu1 %v9433_v9 }
 0x275   : > { %8494 = vmatprep.subr.bf16.mxu1 %v9434_v12 }
 0x278   : > { %8495 = vmatpush3.bf16.msra.mxu1 %v9434_v12  ;;  %v3795_v12 = vpack.c.bf16 %v10609_v47, %v10441_v27 }
 0x279   : > { %8496 = vmatprep.subr.bf16.mxu1 %v9435_v6 }
 0x27c   : > { %8497 = vmatpush3.bf16.msra.mxu1 %v9435_v6  ;;  %v3934_v6 = vld [vmem:[#allocation3 + $0x33] sm:$0xff] }
 0x27d   : > { %8506 = vmatprep.subr.bf16.mxu1 %v9436_v49 }
 0x27f   : > { %8499 = vmatmul.mubr.bf16.vlgmr.msra.gmra.mrb[0].mxu1 %v10376_v17  ;;  %v9439_v17 = vld [vmem:[%s11292_s3 + $0x418] sm:$0xff]  }
 0x280   : > { %8502 = vmatprep.mubr.bf16.mxu1 %v10387_v2  ;;  %8507 = vmatpush3.bf16.msra.mxu1 %v9436_v49  ;;  %v9440_v2 = vld [vmem:[%s11292_s3 + $0x420] sm:$0xff]   ;;  %v9455_v49 = vld [vmem:[%s11292_s3 + $0x498] sm:$0xff]  }
 0x281   : > { %8508 = vmatprep.subr.bf16.mxu1 %v9437_v41 }
 0x284   : > { %8509 = vmatpush3.bf16.msra.mxu1 %v9437_v41  ;;  %v9598_v41 = vld [vmem:[#allocation3 + $0x43] sm:$0xff] }
 0x285   : > { %8510 = vmatprep.subr.bf16.mxu1 %v9438_v58 }
 0x287   : > { %8503 = vmatmul.mubr.bf16.gmra.mrb[4].mxu1 %v3495_v14 }
 0x288   : > { %8511 = vmatpush3.bf16.msra.mxu1 %v9438_v58  ;;  %8522 = vmatprep.mubr.bf16.mxu1 %v3642_v22  ;;  %v10561_v22 = vld [vmem:[#allocation3 + $0x81] sm:$0xff]  ;;  %v3942_v58 = vpack.c.bf16 %v9598_v41, %v3934_v6 }
 0x289   : > { %8512 = vmatprep.subr.bf16.mxu1 %v9439_v17  ;;  %v3644_v15 = vpack.c.bf16 %v10561_v22, %v10396_v8  ;;  %v9448_v8 = vld [vmem:[%s11292_s3 + $0x460] sm:$0xff]   ;;  %v9469_v41 = vld [vmem:[%s11292_s3 + $0x508] sm:$0xff]  }
 0x28a   : > { %v9604_v6 = vld [vmem:[#allocation3 + $0x64] sm:$0xff] }
 0x28c   : > { %8513 = vmatpush3.bf16.msra.mxu1 %v9439_v17  ;;  %v9456_v17 = vld [vmem:[%s11292_s3 + $0x4a0] sm:$0xff]  }
 0x28d   : > { %8514 = vmatprep.subr.bf16.mxu1 %v9440_v2 }
 0x290   : > { %8515 = vmatpush3.bf16.msra.mxu1 %v9440_v2 }
 0x291   : > { %8516 = vmatprep.subr.bf16.mxu1 %v9441_v60 }
 0x294   : > { %8517 = vmatpush3.bf16.msra.mxu1 %v9441_v60 }
 0x295   : > { %8518 = vmatprep.subr.bf16.mxu1 %v9442_v25 }
 0x298   : > { %8519 = vmatpush3.bf16.msra.mxu1 %v9442_v25  ;;  %v9457_v25 = vld [vmem:[%s11292_s3 + $0x4a8] sm:$0xff]  }
 0x299   : > { %8520 = vmatprep.subr.bf16.mxu1 %v9443_v20 }
 0x29c   : > { %8521 = vmatpush3.bf16.msra.mxu1 %v9443_v20  ;;  %v9458_v20 = vld [vmem:[%s11292_s3 + $0x4b0] sm:$0xff]  }
 0x29d   : > { %8530 = vmatprep.subr.bf16.mxu1 %v9444_v21 }
 0x29f   : > { %8523 = vmatmul.mubr.bf16.vlgmr.msra.gmra.mrb[0].mxu1 %v3643_v61  ;;  %v3792_v61 = vpack.c.bf16 %v9594_v54, %v3784_v3  ;;  %v9601_v54 = vld [vmem:[#allocation3 + $0x73] sm:$0xff] }
 0x2a0   : > { %8526 = vmatprep.mubr.bf16.mxu1 %v3644_v15  ;;  %8531 = vmatpush3.bf16.msra.mxu1 %v9444_v21  ;;  %v9459_v21 = vld [vmem:[%s11292_s3 + $0x4b8] sm:$0xff]   ;;  %v10643_v15 = vld [vmem:[#allocation3 + $0x83] sm:$0xff] }
 0x2a1   : > { %8532 = vmatprep.subr.bf16.mxu1 %v9445_v62 }
 0x2a4   : > { %8533 = vmatpush3.bf16.msra.mxu1 %v9445_v62  ;;  %v9460_v62 = vld [vmem:[%s11292_s3 + $0x4c0] sm:$0xff]  }
 0x2a5   : > { %8534 = vmatprep.subr.bf16.mxu1 %v9446_v11 }
 0x2a7   : > { %8527 = vmatmul.mubr.bf16.gmra.mrb[4].mxu1 %v3645_v0  ;;  %v9600_v0 = vld [vmem:[#allocation3 + $0x63] sm:$0xff] }
 0x2a8   : > { %8535 = vmatpush3.bf16.msra.mxu1 %v9446_v11  ;;  %8546 = vmatprep.mubr.bf16.mxu1 %v3792_v61  ;;  %v9599_v11 = vld [vmem:[#allocation3 + $0x53] sm:$0xff]  ;;  %v3944_v61 = vpack.c.bf16 %v10643_v15, %v9601_v54 }
 0x2a9   : > { %8536 = vmatprep.subr.bf16.mxu1 %v9447_v53  ;;  %v3943_v3 = vpack.c.bf16 %v9600_v0, %v9599_v11  ;;  %v4235_v11 = vld [vmem:[#allocation3 + $0x40] sm:$0xff]  ;;  %v9471_v0 = vld [vmem:[%s11292_s3 + $0x518] sm:$0xff]   ;;  %v9474_v54 = vld [vmem:[%s11292_s3 + $0x530] sm:$0xff]  }
 0x2ac   : > { %8537 = vmatpush3.bf16.msra.mxu1 %v9447_v53  ;;  %v9461_v53 = vld [vmem:[%s11292_s3 + $0x4c8] sm:$0xff]  }
 0x2ad   : > { %8538 = vmatprep.subr.bf16.mxu1 %v9448_v8 }
 0x2b0   : > { %8539 = vmatpush3.bf16.msra.mxu1 %v9448_v8  ;;  %v9462_v8 = vld [vmem:[%s11292_s3 + $0x4d0] sm:$0xff]  }
 0x2b1   : > { %8540 = vmatprep.subr.bf16.mxu1 %v9449_v34 }
 0x2b4   : > { %8541 = vmatpush3.bf16.msra.mxu1 %v9449_v34  ;;  %v10652_v34 = vld [vmem:[#allocation3 + $0xa3] sm:$0xff] }
 0x2b5   : > { %8542 = vmatprep.subr.bf16.mxu1 %v9450_v24 }
 0x2b8   : > { %8543 = vmatpush3.bf16.msra.mxu1 %v9450_v24  ;;  %v3945_v24 = vpack.c.bf16 %v10652_v34, %v10472_v29  ;;  %v9465_v29 = vld [vmem:[%s11292_s3 + $0x4e8] sm:$0xff]  }
 0x2b9   : > { %8544 = vmatprep.subr.bf16.mxu1 %v9451_v13 }
 0x2bc   : > { %8545 = vmatpush3.bf16.msra.mxu1 %v9451_v13  ;;  %v4084_v13 = vld [vmem:[#allocation3 + $0x34] sm:$0xff] }
 0x2bd   : > { %8554 = vmatprep.subr.bf16.mxu1 %v9452_v18  ;;  %v4092_v39 = vpack.c.bf16 %v9602_v19, %v4084_v13  ;;  %v4237_v13 = vld [vmem:[#allocation3 + $0x60] sm:$0xff] }
 0x2be   : > { %v4239_v19 = vld [vmem:[#allocation3 + $0x80] sm:$0xff] }
 0x2bf   : > { %8547 = vmatmul.mubr.bf16.vlgmr.msra.gmra.mrb[0].mxu1 %v3793_v7  ;;  %v9464_v7 = vld [vmem:[%s11292_s3 + $0x4e0] sm:$0xff]  }
 0x2c0   : > { %8550 = vmatprep.mubr.bf16.mxu1 %v3794_v30  ;;  %8555 = vmatpush3.bf16.msra.mxu1 %v9452_v18  ;;  %v9463_v18 = vld [vmem:[%s11292_s3 + $0x4d8] sm:$0xff]   ;;  %v9468_v30 = vld [vmem:[%s11292_s3 + $0x500] sm:$0xff]  }
 0x2c1   : > { %v10602_v23 = vpop.f32.mrb[72].mxu0  ;;  %8556 = vmatprep.subr.bf16.mxu1 %v9453_v10 }
 0x2c2   : > { %v10607_v5 = vpop.f32.mrb[73].mxu0 }
 0x2c3   : > { %v10611_v59 = vpop.f32.mrb[74].mxu0 }
 0x2c4   : > { %8557 = vmatpush3.bf16.msra.mxu1 %v9453_v10  ;;  %v10613_v9 = vpop.f32.mrb[75].mxu0  ;;  %v9466_v10 = vld [vmem:[%s11292_s3 + $0x4f0] sm:$0xff]  }
 0x2c5   : > { %8558 = vmatprep.subr.bf16.mxu1 %v9454_v26 }
 0x2c7   : > { %8551 = vmatmul.mubr.bf16.gmra.mrb[4].mxu1 %v3795_v12  ;;  %v9603_v12 = vld [vmem:[#allocation3 + $0x54] sm:$0xff] }
 0x2c8   : > { %8559 = vmatpush3.bf16.msra.mxu1 %v9454_v26  ;;  %8570 = vmatprep.mubr.bf16.mxu1 %v3942_v58  ;;  %v10674_v26 = vld [vmem:[#allocation3 + $0x84] sm:$0xff]  ;;  %v9605_v58 = vld [vmem:[#allocation3 + $0x74] sm:$0xff] }
 0x2c9   : > { %v10620_v14 = vpop.f32.mrb[76].mxu0  ;;  %8560 = vmatprep.subr.bf16.mxu1 %v9455_v49 }
 0x2ca   : > { %v10625_v2 = vpop.f32.mrb[77].mxu0 }
 0x2cb   : > { %v10627_v27 = vpop.f32.mrb[78].mxu0 }
 0x2cc   : > { %8561 = vmatpush3.bf16.msra.mxu1 %v9455_v49  ;;  %v10629_v60 = vpop.f32.mrb[79].mxu0  ;;  %v4093_v49 = vpack.c.bf16 %v9604_v6, %v9603_v12  ;;  %v9479_v12 = vld [vmem:[%s11292_s3 + $0x558] sm:$0xff]   ;;  %v9480_v6 = vld [vmem:[%s11292_s3 + $0x560] sm:$0xff]  }
 0x2cd   : > { %8562 = vmatprep.subr.bf16.mxu1 %v9456_v17 }
 0x2d0   : > { %8563 = vmatpush3.bf16.msra.mxu1 %v9456_v17  ;;  %v4094_v17 = vpack.c.bf16 %v10674_v26, %v9605_v58  ;;  %v4388_v58 = vld [vmem:[#allocation3 + $0x71] sm:$0xff] }
 0x2d1   : > { %8564 = vmatprep.subr.bf16.mxu1 %v9457_v25 }
 0x2d4   : > { %8565 = vmatpush3.bf16.msra.mxu1 %v9457_v25  ;;  %v9470_v25 = vld [vmem:[%s11292_s3 + $0x510] sm:$0xff]  }
 0x2d5   : > { %8566 = vmatprep.subr.bf16.mxu1 %v9458_v20 }
 0x2d8   : > { %8567 = vmatpush3.bf16.msra.mxu1 %v9458_v20  ;;  %v10683_v20 = vld [vmem:[#allocation3 + $0xa4] sm:$0xff] }
 0x2d9   : > { %8568 = vmatprep.subr.bf16.mxu1 %v9459_v21 }
 0x2dc   : > { %8569 = vmatpush3.bf16.msra.mxu1 %v9459_v21  ;;  %v4236_v21 = vld [vmem:[#allocation3 + $0x50] sm:$0xff] }
 0x2dd   : > { %8578 = vmatprep.subr.bf16.mxu1 %v9460_v62 }
 0x2df   : > { %8571 = vmatmul.mubr.bf16.vlgmr.msra.gmra.mrb[0].mxu1 %v3943_v3  ;;  %v4243_v3 = vpack.c.bf16 %v4236_v21, %v4235_v11 }
 0x2e0   : > { %8574 = vmatprep.mubr.bf16.mxu1 %v3944_v61  ;;  %8579 = vmatpush3.bf16.msra.mxu1 %v9460_v62  ;;  %v4095_v62 = vpack.c.bf16 %v10683_v20, %v10503_v28  ;;  %v9473_v28 = vld [vmem:[%s11292_s3 + $0x528] sm:$0xff]   ;;  %v9475_v61 = vld [vmem:[%s11292_s3 + $0x538] sm:$0xff]  }
 0x2e1   : > { %8580 = vmatprep.subr.bf16.mxu1 %v9461_v53 }
 0x2e4   : > { %8581 = vmatpush3.bf16.msra.mxu1 %v9461_v53  ;;  %v9472_v53 = vld [vmem:[%s11292_s3 + $0x520] sm:$0xff]  }
 0x2e5   : > { %8582 = vmatprep.subr.bf16.mxu1 %v9462_v8 }
 0x2e7   : > { %8575 = vmatmul.mubr.bf16.gmra.mrb[4].mxu1 %v3945_v24  ;;  %v4238_v24 = vld [vmem:[#allocation3 + $0x70] sm:$0xff] }
 0x2e8   : > { %8583 = vmatpush3.bf16.msra.mxu1 %v9462_v8  ;;  %8594 = vmatprep.mubr.bf16.mxu1 %v4092_v39  ;;  %v9476_v8 = vld [vmem:[%s11292_s3 + $0x540] sm:$0xff]   ;;  %v9477_v39 = vld [vmem:[%s11292_s3 + $0x548] sm:$0xff]  }
 0x2e9   : > { %8584 = vmatprep.subr.bf16.mxu1 %v9463_v18 }
 0x2ec   : > { %8585 = vmatpush3.bf16.msra.mxu1 %v9463_v18  ;;  %v4244_v18 = vpack.c.bf16 %v4238_v24, %v4237_v13  ;;  %v9494_v24 = vld [vmem:[%s11292_s3 + $0x5d0] sm:$0xff]  }
 0x2ed   : > { %8586 = vmatprep.subr.bf16.mxu1 %v9464_v7  ;;  %v4542_v13 = vld [vmem:[#allocation3 + $0xb2] sm:$0xff] }
 0x2f0   : > { %8587 = vmatpush3.bf16.msra.mxu1 %v9464_v7  ;;  %v4245_v7 = vpack.c.bf16 %v10536_v4, %v4239_v19 }
 0x2f1   : > { %8588 = vmatprep.subr.bf16.mxu1 %v9465_v29 }
 0x2f4   : > { %8589 = vmatpush3.bf16.msra.mxu1 %v9465_v29  ;;  %v9478_v29 = vld [vmem:[%s11292_s3 + $0x550] sm:$0xff]  }
 0x2f5   : > { %8590 = vmatprep.subr.bf16.mxu1 %v9466_v10 }
 0x2f8   : > { %8591 = vmatpush3.bf16.msra.mxu1 %v9466_v10  ;;  %v4386_v10 = vld [vmem:[#allocation3 + $0x51] sm:$0xff] }
 0x2f9   : > { %8592 = vmatprep.subr.bf16.mxu1 %v9467_v40 }
 0x2fc   : > { %8593 = vmatpush3.bf16.msra.mxu1 %v9467_v40  ;;  %v4246_v40 = vpack.c.bf16 %v10409_v43, %v10534_v35  ;;  %v9481_v43 = vld [vmem:[%s11292_s3 + $0x568] sm:$0xff]   ;;  %v9482_v35 = vld [vmem:[%s11292_s3 + $0x570] sm:$0xff]  }
 0x2fd   : > { %8602 = vmatprep.subr.bf16.mxu1 %v9468_v30 }
 0x2ff   : > { %8595 = vmatmul.mubr.bf16.vlgmr.msra.gmra.mrb[0].mxu1 %v4093_v49  ;;  %v9483_v49 = vld [vmem:[%s11292_s3 + $0x578] sm:$0xff]  }
 0x300   : > { %8598 = vmatprep.mubr.bf16.mxu1 %v4094_v17  ;;  %8603 = vmatpush3.bf16.msra.mxu1 %v9468_v30  ;;  %v4385_v30 = vld [vmem:[#allocation3 + $0x41] sm:$0xff]  ;;  %v4390_v17 = vld [vmem:[#allocation3 + $0x91] sm:$0xff] }
 0x301   : > { %8604 = vmatprep.subr.bf16.mxu1 %v9469_v41  ;;  %v4393_v4 = vpack.c.bf16 %v4386_v10, %v4385_v30  ;;  %v4395_v11 = vpack.c.bf16 %v4390_v17, %v10561_v22  ;;  %v9488_v22 = vld [vmem:[%s11292_s3 + $0x5a0] sm:$0xff]  }
 0x302   : > { %v9509_v30 = vld [vmem:[%s11294_s5 + $0x20] sm:$0xff]  }
 0x304   : > { %8605 = vmatpush3.bf16.msra.mxu1 %v9469_v41  ;;  %v9484_v41 = vld [vmem:[%s11292_s3 + $0x580] sm:$0xff]  }
 0x305   : > { %8606 = vmatprep.subr.bf16.mxu1 %v9470_v25 }
 0x307   : > { %8599 = vmatmul.mubr.bf16.gmra.mrb[4].mxu1 %v4095_v62  ;;  %v9485_v62 = vld [vmem:[%s11292_s3 + $0x588] sm:$0xff]  }
 0x308   : > { %8607 = vmatpush3.bf16.msra.mxu1 %v9470_v25  ;;  %8618 = vmatprep.mubr.bf16.mxu1 %v4243_v3  ;;  %v4387_v25 = vld [vmem:[#allocation3 + $0x61] sm:$0xff]  ;;  %v4392_v3 = vld [vmem:[#allocation3 + $0xb1] sm:$0xff] }
 0x309   : > { %8608 = vmatprep.subr.bf16.mxu1 %v9471_v0  ;;  %v4394_v21 = vpack.c.bf16 %v4388_v58, %v4387_v25 }
 0x30c   : > { %8609 = vmatpush3.bf16.msra.mxu1 %v9471_v0  ;;  %v9486_v0 = vld [vmem:[%s11292_s3 + $0x590] sm:$0xff]  }
 0x30d   : > { %8610 = vmatprep.subr.bf16.mxu1 %v9472_v53 }
 0x310   : > { %8611 = vmatpush3.bf16.msra.mxu1 %v9472_v53  ;;  %v4396_v53 = vpack.c.bf16 %v4392_v3, %v10574_v44  ;;  %v9489_v44 = vld [vmem:[%s11292_s3 + $0x5a8] sm:$0xff]  }
 0x311   : > { %8612 = vmatprep.subr.bf16.mxu1 %v9473_v28 }
 0x314   : > { %8613 = vmatpush3.bf16.msra.mxu1 %v9473_v28  ;;  %v9487_v28 = vld [vmem:[%s11292_s3 + $0x598] sm:$0xff]  }
 0x315   : > { %8614 = vmatprep.subr.bf16.mxu1 %v9474_v54 }
 0x318   : > { %8615 = vmatpush3.bf16.msra.mxu1 %v9474_v54  ;;  %v9490_v54 = vld [vmem:[%s11292_s3 + $0x5b0] sm:$0xff]  }
 0x319   : > { %8616 = vmatprep.subr.bf16.mxu1 %v9475_v61 }
 0x31c   : > { %8617 = vmatpush3.bf16.msra.mxu1 %v9475_v61  ;;  %v9493_v61 = vld [vmem:[%s11292_s3 + $0x5c8] sm:$0xff]  }
 0x31d   : > { %8626 = vmatprep.subr.bf16.mxu1 %v9476_v8 }
 0x31f   : > { %8619 = vmatmul.mubr.bf16.vlgmr.msra.gmra.mrb[0].mxu1 %v4244_v18  ;;  %v4546_v18 = vpack.c.bf16 %v4542_v13, %v10609_v47  ;;  %v9501_v47 = vld [vmem:[%s11292_s3 + $0x608] sm:$0xff]  }
 0x320   : > { %8622 = vmatprep.mubr.bf16.mxu1 %v4245_v7  ;;  %8627 = vmatpush3.bf16.msra.mxu1 %v9476_v8  ;;  %v4692_v7 = vld [vmem:[#allocation3 + $0xb3] sm:$0xff] }
 0x321   : > { %8628 = vmatprep.subr.bf16.mxu1 %v9477_v39 }
 0x324   : > { %8629 = vmatpush3.bf16.msra.mxu1 %v9477_v39  ;;  %v9502_v39 = vld [vmem:[%s11292_s3 + $0x610] sm:$0xff]  }
 0x325   : > { %8630 = vmatprep.subr.bf16.mxu1 %v9478_v29 }
 0x327   : > { %8623 = vmatmul.mubr.bf16.gmra.mrb[4].mxu1 %v4246_v40  ;;  %v9508_v40 = vld [vmem:[%s11294_s5] sm:$0xff]  }
 0x328   : > { %8631 = vmatpush3.bf16.msra.mxu1 %v9478_v29  ;;  %8642 = vmatprep.mubr.bf16.mxu1 %v4393_v4  ;;  %v4696_v29 = vpack.c.bf16 %v4692_v7, %v10652_v34  ;;  %v4842_v34 = vld [vmem:[#allocation3 + $0xb4] sm:$0xff] }
 0x329   : > { %8632 = vmatprep.subr.bf16.mxu1 %v9479_v12  ;;  %v4846_v10 = vpack.c.bf16 %v4842_v34, %v10683_v20  ;;  %v9522_v7 = vld [vmem:[%s11294_s5 + $0x70] sm:$0xff]   ;;  %v9529_v34 = vld [vmem:[%s11294_s5 + $0xa8] sm:$0xff]  }
 0x32c   : > { %8633 = vmatpush3.bf16.msra.mxu1 %v9479_v12  ;;  %v9671_v12 = vmov 0.0  }
 0x32d   : > { %8634 = vmatprep.subr.bf16.mxu1 %v9480_v6  ;;  %8734 = vmatprep.subr.bf16.mxu0 %v9671_v12 }
 0x32e   : > { %8735 = vmatpush3.bf16.msra.mxu0 %v9508_v40  ;;  %8742 = vmatprep.mubr.msk.bf16.mxu0 %vm9672_vm3, %v9671_v12  ;;  %v9531_v40 = vld [vmem:[%s11294_s5 + $0xb8] sm:$0xff]  }
 0x32f   : > { %8736 = vmatprep.subr.bf16.mxu0 %v9671_v12 }
 0x330   : > { %8635 = vmatpush3.bf16.msra.mxu1 %v9480_v6  ;;  %v7352_v6 = vld [vmem:[%s11293_s4] ss:$0 sm:$0xff] }
 0x331   : > { %8636 = vmatprep.subr.bf16.mxu1 %v9481_v43 }
 0x332   : > { %8737 = vmatpush3.bf16.msra.mxu0 %v9510_v37 }
 0x333   : > { %8738 = vmatprep.subr.bf16.mxu0 %v9671_v12 }
 0x334   : > { %8637 = vmatpush3.bf16.msra.mxu1 %v9481_v43 }
 0x335   : > { %8638 = vmatprep.subr.bf16.mxu1 %v9482_v35 }
 0x338   : > { %8639 = vmatpush3.bf16.msra.mxu1 %v9482_v35 }
 0x339   : > { %8640 = vmatprep.subr.bf16.mxu1 %v9483_v49 }
 0x33c   : > { %8641 = vmatpush3.bf16.msra.mxu1 %v9483_v49 }
 0x33d   : > { %8650 = vmatprep.subr.bf16.mxu1 %v9484_v41 }
 0x33f   : > { %8643 = vmatmul.mubr.bf16.vlgmr.msra.gmra.mrb[0].mxu1 %v4394_v21 }
 0x340   : > { %8646 = vmatprep.mubr.bf16.mxu1 %v4395_v11  ;;  %8651 = vmatpush3.bf16.msra.mxu1 %v9484_v41  ;;  %v9514_v11 = vld [vmem:[%s11294_s5 + $0x18] sm:$0xff]  }
 0x341   : > { %8652 = vmatprep.subr.bf16.mxu1 %v9485_v62 }
 0x344   : > { %8653 = vmatpush3.bf16.msra.mxu1 %v9485_v62 }
 0x345   : > { %8654 = vmatprep.subr.bf16.mxu1 %v9486_v0 }
 0x347   : > { %8647 = vmatmul.mubr.bf16.gmra.mrb[4].mxu1 %v4396_v53 }
 0x348   : > { %8655 = vmatpush3.bf16.msra.mxu1 %v9486_v0  ;;  %8666 = vmatprep.mubr.bf16.mxu1 %v4543_v57  ;;  %v4540_v57 = vld [vmem:[#allocation3 + $0x92] sm:$0xff] }
 0x349   : > { %8656 = vmatprep.subr.bf16.mxu1 %v9487_v28  ;;  %v4545_v8 = vpack.c.bf16 %v4540_v57, %v10596_v16  ;;  %v9495_v16 = vld [vmem:[%s11292_s3 + $0x5d8] sm:$0xff]  }
 0x34c   : > { %8657 = vmatpush3.bf16.msra.mxu1 %v9487_v28 }
 0x34d   : > { %8658 = vmatprep.subr.bf16.mxu1 %v9488_v22 }
 0x350   : > { %8659 = vmatpush3.bf16.msra.mxu1 %v9488_v22 }
 0x351   : > { %8660 = vmatprep.subr.bf16.mxu1 %v9489_v44 }
 0x354   : > { %8661 = vmatpush3.bf16.msra.mxu1 %v9489_v44 }
 0x355   : > { %8662 = vmatprep.subr.bf16.mxu1 %v9490_v54 }
 0x358   : > { %8663 = vmatpush3.bf16.msra.mxu1 %v9490_v54 }
 0x359   : > { %8664 = vmatprep.subr.bf16.mxu1 %v9491_v48 }
 0x35c   : > { %8665 = vmatpush3.bf16.msra.mxu1 %v9491_v48 }
 0x35d   : > { %8674 = vmatprep.subr.bf16.mxu1 %v9492_v50 }
 0x35f   : > { %8667 = vmatmul.mubr.bf16.vlgmr.msra.gmra.mrb[0].mxu1 %v4544_v42  ;;  %v9498_v42 = vld [vmem:[%s11292_s3 + $0x5f0] sm:$0xff]  }
 0x360   : > { %8670 = vmatprep.mubr.bf16.mxu1 %v4545_v8  ;;  %8675 = vmatpush3.bf16.msra.mxu1 %v9492_v50 }
 0x361   : > { %8676 = vmatprep.subr.bf16.mxu1 %v9493_v61 }
 0x364   : > { %8677 = vmatpush3.bf16.msra.mxu1 %v9493_v61 }
 0x365   : > { %8678 = vmatprep.subr.bf16.mxu1 %v9494_v24 }
 0x367   : > { %8671 = vmatmul.mubr.bf16.gmra.mrb[4].mxu1 %v4546_v18 }
 0x368   : > { %8679 = vmatpush3.bf16.msra.mxu1 %v9494_v24  ;;  %8690 = vmatprep.mubr.bf16.mxu1 %v4693_v63  ;;  %v4690_v63 = vld [vmem:[#allocation3 + $0x93] sm:$0xff] }
 0x369   : > { %8680 = vmatprep.subr.bf16.mxu1 %v9495_v16  ;;  %v4695_v19 = vpack.c.bf16 %v4690_v63, %v10643_v15  ;;  %v9503_v15 = vld [vmem:[%s11292_s3 + $0x618] sm:$0xff]  }
 0x36a   : > { %v9519_v63 = vld [vmem:[%s11294_s5 + $0x58] sm:$0xff]  }
 0x36c   : > { %8681 = vmatpush3.bf16.msra.mxu1 %v9495_v16 }
 0x36d   : > { %8682 = vmatprep.subr.bf16.mxu1 %v9496_v31 }
 0x370   : > { %8683 = vmatpush3.bf16.msra.mxu1 %v9496_v31  ;;  %v9516_v31 = vld [vmem:[%s11294_s5 + $0x40] sm:$0xff]  }
 0x371   : > { %8684 = vmatprep.subr.bf16.mxu1 %v9497_v32 }
 0x374   : > { %8685 = vmatpush3.bf16.msra.mxu1 %v9497_v32 }
 0x375   : > { %8686 = vmatprep.subr.bf16.mxu1 %v9498_v42 }
 0x378   : > { %8687 = vmatpush3.bf16.msra.mxu1 %v9498_v42 }
 0x379   : > { %8688 = vmatprep.subr.bf16.mxu1 %v9499_v51 }
 0x37c   : > { %8689 = vmatpush3.bf16.msra.mxu1 %v9499_v51  ;;  %v9517_v51 = vld [vmem:[%s11294_s5 + $0x48] sm:$0xff]  }
 0x37d   : > { %8698 = vmatprep.subr.bf16.mxu1 %v9500_v55 }
 0x37f   : > { %8691 = vmatmul.mubr.bf16.vlgmr.msra.gmra.mrb[0].mxu1 %v4694_v45  ;;  %v9506_v45 = vld [vmem:[%s11292_s3 + $0x630] sm:$0xff]  }
 0x380   : > { %8694 = vmatprep.mubr.bf16.mxu1 %v4695_v19  ;;  %8699 = vmatpush3.bf16.msra.mxu1 %v9500_v55  ;;  %v9518_v55 = vld [vmem:[%s11294_s5 + $0x50] sm:$0xff]  }
 0x381   : > { %8700 = vmatprep.subr.bf16.mxu1 %v9501_v47 }
 0x384   : > { %8701 = vmatpush3.bf16.msra.mxu1 %v9501_v47  ;;  %v9520_v47 = vld [vmem:[%s11294_s5 + $0x60] sm:$0xff]  }
 0x385   : > { %8702 = vmatprep.subr.bf16.mxu1 %v9502_v39 }
 0x387   : > { %8695 = vmatmul.mubr.bf16.gmra.mrb[4].mxu1 %v4696_v29  ;;  %v9523_v29 = vld [vmem:[%s11294_s5 + $0x78] sm:$0xff]  }
 0x388   : > { %8703 = vmatpush3.bf16.msra.mxu1 %v9502_v39  ;;  %8714 = vmatprep.mubr.bf16.mxu1 %v4843_v1  ;;  %v4845_v1 = vpack.c.bf16 %v4840_v56, %v10674_v26  ;;  %v9521_v39 = vld [vmem:[%s11294_s5 + $0x68] sm:$0xff]   ;;  %v9528_v56 = vld [vmem:[%s11294_s5 + $0xa0] sm:$0xff]  }
 0x389   : > { %8704 = vmatprep.subr.bf16.mxu1 %v9503_v15 }
 0x38c   : > { %8705 = vmatpush3.bf16.msra.mxu1 %v9503_v15  ;;  %v9524_v15 = vld [vmem:[%s11294_s5 + $0x80] sm:$0xff]  }
 0x38d   : > { %8706 = vmatprep.subr.bf16.mxu1 %v9504_v33 }
 0x390   : > { %8707 = vmatpush3.bf16.msra.mxu1 %v9504_v33 }
 0x391   : > { %8708 = vmatprep.subr.bf16.mxu1 %v9505_v36 }
 0x394   : > { %8709 = vmatpush3.bf16.msra.mxu1 %v9505_v36  ;;  %v9525_v36 = vld [vmem:[%s11294_s5 + $0x88] sm:$0xff]  }
 0x395   : > { %8710 = vmatprep.subr.bf16.mxu1 %v9506_v45 }
 0x398   : > { %8711 = vmatpush3.bf16.msra.mxu1 %v9506_v45  ;;  %v9526_v45 = vld [vmem:[%s11294_s5 + $0x90] sm:$0xff]  }
 0x399   : > { %8712 = vmatprep.subr.bf16.mxu1 %v9507_v52 }
 0x39c   : > { %8713 = vmatpush3.bf16.msra.mxu1 %v9507_v52  ;;  %v9527_v52 = vld [vmem:[%s11294_s5 + $0x98] sm:$0xff]  }
 0x39d   : > { %8722 = vmatprep.subr.bf16.mxu1 %v9671_v12 }
 0x39f   : > { %8715 = vmatmul.mubr.bf16.vlgmr.msra.gmra.mrb[0].mxu1 %v4844_v46  ;;  %v9512_v46 = vld [vmem:[%s11294_s5 + $0x10] sm:$0xff]  }
 0x3a0   : > { %8718 = vmatprep.mubr.bf16.mxu1 %v4845_v1  ;;  %8723 = vmatpush3.bf16.msra.mxu1 %v9509_v30  ;;  %v9532_v30 = vld [vmem:[%s11294_s5 + $0xc0] sm:$0xff]  }
 0x3a1   : > { %8724 = vmatprep.subr.bf16.mxu1 %v9671_v12  ;;  %8739 = vmatpush3.bf16.msra.mxu0 %v9512_v46  ;;  %v9534_v46 = vld [vmem:[%s11294_s5 + $0xd0] sm:$0xff]  }
 0x3a2   : > { %8740 = vmatprep.subr.bf16.mxu0 %v9671_v12 }
 0x3a4   : > { %8725 = vmatpush3.bf16.msra.mxu1 %v9511_v38  ;;  %v9533_v38 = vld [vmem:[%s11294_s5 + $0xc8] sm:$0xff]  }
 0x3a5   : > { %8726 = vmatprep.subr.bf16.mxu1 %v9671_v12  ;;  %8741 = vmatpush3.bf16.msra.mxu0 %v9514_v11  ;;  %v9546_v11 = vld [vmem:[%s11294_s5 + $0x130] sm:$0xff]  }
 0x3a6   : > { %8746 = vmatprep.subr.bf16.mxu0 %v9671_v12 }
 0x3a7   : > { %8719 = vmatmul.mubr.bf16.gmra.mrb[4].mxu1 %v4846_v10  ;;  %v9530_v10 = vld [vmem:[%s11294_s5 + $0xb0] sm:$0xff]  }
 0x3a8   : > { %8730 = vmatprep.mubr.msk.bf16.mxu1 %vm9672_vm3, %v9671_v12 }
 0x472   : > { %v8716_v26 = vpop.f32.mrb[0].mxu1 }
 0x473   : > { %v8962_v20 = vadd.f32 %v8716_v26, %v10602_v23  ;;  %v4946_v4 = vpop.f32.mrb[1].mxu1  ;;  %v9513_v23 = vld [vmem:[%s11294_s5 + $0x30] sm:$0xff]   ;;  %v9535_v26 = vld [vmem:[%s11294_s5 + $0xd8] sm:$0xff]  }
 0x474   : > { %v8963_v43 = vadd.f32 %v4946_v4, %v10607_v5  ;;  %v8717_v35 = vpop.f32.mrb[2].mxu1  ;;  %8727 = vmatpush3.bf16.msra.mxu1 %v9513_v23  ;;  %v9545_v23 = vld [vmem:[%s11294_s5 + $0x128] sm:$0xff]  }
 0x475   : > { %v8964_v49 = vadd.f32 %v8717_v35, %v10611_v59  ;;  %v4949_v41 = vpop.f32.mrb[3].mxu1  ;;  %v4994_v53 = vadd.f32 %v8962_v20, %v7352_v6  ;;  %8728 = vmatprep.subr.bf16.mxu1 %v9671_v12  ;;  %v9536_v20 = vld [vmem:[%s11294_s5 + $0xe0] sm:$0xff]   ;;  %v9539_v35 = vld [vmem:[%s11294_s5 + $0xf8] sm:$0xff]  }
 0x476   : > { %v8965_v58 = vadd.f32 %v4949_v41, %v10613_v9  ;;  %v4992_v17 = vadd.f32 %v8963_v43, %v7352_v6  ;;  %v9538_v43 = vld [vmem:[%s11294_s5 + $0xf0] sm:$0xff]  }
 0x477   : > { %v4995_v54 = vadd.f32 %v8964_v49, %v7352_v6  ;;  %v9540_v49 = vld [vmem:[%s11294_s5 + $0x100] sm:$0xff]  }
 0x478   : > { %v5000_v25 = vmax.f32 %v4992_v17, 0.0  ;;  %v4993_v21 = vadd.f32 %v8965_v58, %v7352_v6  ;;  %v9541_v58 = vld [vmem:[%s11294_s5 + $0x108] sm:$0xff]   ;;  %v9542_v17 = vld [vmem:[%s11294_s5 + $0x110] sm:$0xff]  }
 0x47a   : > { %v8720_v62 = vpop.f32.mrb[4].mxu1  ;;  %5008 = vxpose.xlu0.b32.start [1/8] (short) (narrow) %v5000_v25, 32  ;;  %v5001_v9 = vmax.f32 %v4993_v21, 0.0  ;;  %v9543_v25 = vld [vmem:[%s11294_s5 + $0x118] sm:$0xff]   ;;  %v9544_v21 = vld [vmem:[%s11294_s5 + $0x120] sm:$0xff]  }
 0x47b   : > { %v8966_v5 = vadd.f32 %v8720_v62, %v10620_v14  ;;  %v4962_v0 = vpop.f32.mrb[5].mxu1  ;;  %v9515_v14 = vld [vmem:[%s11294_s5 + $0x38] sm:$0xff]  }
 0x47c   : > { %v8967_v59 = vadd.f32 %v4962_v0, %v10625_v2  ;;  %v8721_v3 = vpop.f32.mrb[6].mxu1  ;;  %v5002_v2 = vmax.f32 %v4994_v53, 0.0  ;;  %8729 = vmatpush3.bf16.msra.mxu1 %v9515_v14  ;;  %v9548_v0 = vld [vmem:[%s11294_s5 + $0x140] sm:$0xff]   ;;  %v9551_v53 = vld [vmem:[%s11294_s5 + $0x158] sm:$0xff]   ;;  %v9554_v14 = vld [vmem:[%s11294_s5 + $0x170] sm:$0xff]  }
 0x47d   : > { %v8968_v28 = vadd.f32 %v8721_v3, %v10627_v27  ;;  %v4965_v22 = vpop.f32.mrb[7].mxu1  ;;  %v5003_v27 = vmax.f32 %v4995_v54, 0.0  ;;  %v4998_v61 = vadd.f32 %v8966_v5, %v7352_v6  ;;  %v9547_v5 = vld [vmem:[%s11294_s5 + $0x138] sm:$0xff]   ;;  %v9549_v3 = vld [vmem:[%s11294_s5 + $0x148] sm:$0xff]   ;;  %v9556_v54 = vld [vmem:[%s11294_s5 + $0x180] sm:$0xff]  }
 0x47e   : > { %v8969_v44 = vadd.f32 %v4965_v22, %v10629_v60  ;;  %5009 = vxpose.xlu0.b32.cont [2/8] (short) (narrow) %v5001_v9, 32  ;;  %v4996_v48 = vadd.f32 %v8967_v59, %v7352_v6  ;;  %v9550_v9 = vld [vmem:[%s11294_s5 + $0x150] sm:$0xff]  }
 0x47f   : > { %v5006_v8 = vmax.f32 %v4998_v61, 0.0  ;;  %v4999_v24 = vadd.f32 %v8968_v28, %v7352_v6  ;;  %v9552_v28 = vld [vmem:[%s11294_s5 + $0x160] sm:$0xff]  }
 0x480   : > { %v5004_v60 = vmax.f32 %v4996_v48, 0.0  ;;  %v4997_v50 = vadd.f32 %v8969_v44, %v7352_v6  ;;  %v9537_v6 = vld [vmem:[%s11294_s5 + $0xe8] sm:$0xff]  }
 0x481   : > { %v5007_v13 = vmax.f32 %v4999_v24, 0.0  ;;  %v9553_v44 = vld [vmem:[%s11294_s5 + $0x168] sm:$0xff]   ;;  %v9562_v24 = vld [vmem:[%s11294_s5 + $0x1b0] sm:$0xff]  }
 0x482   : > { %5010 = vxpose.xlu0.b32.cont [3/8] (short) (narrow) %v5002_v2, 32  ;;  %v5005_v57 = vmax.f32 %v4997_v50, 0.0  ;;  %v9555_v2 = vld [vmem:[%s11294_s5 + $0x178] sm:$0xff]   ;;  %v9557_v48 = vld [vmem:[%s11294_s5 + $0x188] sm:$0xff]  }
 0x483   : > { %v9559_v50 = vld [vmem:[%s11294_s5 + $0x198] sm:$0xff]  }
 0x486   : > { %5011 = vxpose.xlu0.b32.cont [4/8] (short) (narrow) %v5003_v27, 32 }
 0x48a   : > { %5012 = vxpose.xlu0.b32.cont [5/8] (short) (narrow) %v5004_v60, 32  ;;  %v9558_v60 = vld [vmem:[%s11294_s5 + $0x190] sm:$0xff]  }
 0x48e   : > { %5013 = vxpose.xlu0.b32.cont [6/8] (short) (narrow) %v5005_v57, 32  ;;  %v9560_v57 = vld [vmem:[%s11294_s5 + $0x1a0] sm:$0xff]  }
 0x492   : > { %5014 = vxpose.xlu0.b32.cont [7/8] (short) (narrow) %v5006_v8, 32  ;;  %v9561_v8 = vld [vmem:[%s11294_s5 + $0x1a8] sm:$0xff]  }
 0x496   : > { %5015 = vxpose.xlu0.b32.end [8/8] (short) (narrow) %v5007_v13, 32  ;;  %v9563_v13 = vld [vmem:[%s11294_s5 + $0x1b8] sm:$0xff]  }
 0x4fa   : > { %v5024_v18 = vpop.trf.xlu0 }
 0x4fe   : > { %v5025_v16 = vpop.trf.xlu0 }
 0x4ff   : > { %v10878_v32 = vpack.c.bf16 %v5025_v16, %v5024_v18  ;;  %v9564_v18 = vld [vmem:[%s11294_s5 + $0x1c0] sm:$0xff]  }
 0x501   : > { %8743 = vmatmul.mubr.msk.bf16.vlgmr.msra.gmra.mrb[80].mxu0 %vm5086_vm4, %v10878_v32  ;;  %v10883_v42 = vshrl.u32 %v10878_v32, 16  ;;  %v5206_v19 = vrot.slane %v10878_v32, 1  ;;  %v5362_v1 = vrot.slane %v10878_v32, 2  ;;  %v5518_v4 = vrot.slane %v10878_v32, 3 }
 0x502   : > { %8747 = vmatpush3.bf16.msra.mxu0 %v9516_v31  ;;  %8754 = vmatprep.mubr.msk.bf16.mxu0 %vm9672_vm3, %v9671_v12  ;;  %v5674_v62 = vrot.slane %v10878_v32, 4  ;;  %v5830_v22 = vrot.slane %v10878_v32, 5  ;;  %v5986_v61 = vrot.slane %v10878_v32, 6  ;;  %v9565_v31 = vld [vmem:[%s11294_s5 + $0x1c8] sm:$0xff]  }
 0x503   : > { %8731 = vmatmul.mubr.msk.bf16.vlgmr.msra.gmra.mrb[8].mxu1 %vm5086_vm4, %v10883_v42  ;;  %8748 = vmatprep.subr.bf16.mxu0 %v9671_v12  ;;  %v5284_v33 = vrot.slane %v10883_v42, 1  ;;  %v5440_v37 = vrot.slane %v10883_v42, 2  ;;  %v5596_v41 = vrot.slane %v10883_v42, 3  ;;  %v5752_v59 = vrot.slane %v10883_v42, 4 }
 0x504   : > { %v5908_v27 = vrot.slane %v10883_v42, 5  ;;  %v6064_v16 = vrot.slane %v10883_v42, 6 }
 0x506   : > { %8749 = vmatpush3.bf16.msra.mxu0 %v9517_v51  ;;  %v9566_v51 = vld [vmem:[%s11294_s5 + $0x1d0] sm:$0xff]  }
 0x507   : > { %8750 = vmatprep.subr.bf16.mxu0 %v9671_v12 }
 0x50a   : > { %8751 = vmatpush3.bf16.msra.mxu0 %v9518_v55  ;;  %v9567_v55 = vld [vmem:[%s11294_s5 + $0x1d8] sm:$0xff]  }
 0x50b   : > { %8752 = vmatprep.subr.bf16.mxu0 %v9671_v12 }
 0x50e   : > { %8753 = vmatpush3.bf16.msra.mxu0 %v9519_v63  ;;  %v9568_v63 = vld [vmem:[%s11294_s5 + $0x1e0] sm:$0xff]  }
 0x50f   : > { %8758 = vmatprep.subr.bf16.mxu0 %v9671_v12 }
 0x511   : > { %8755 = vmatmul.mubr.msk.bf16.vlgmr.msra.gmra.mrb[80].mxu0 %vm5086_vm4, %v5206_v19  ;;  %v9569_v19 = vld [vmem:[%s11294_s5 + $0x1e8] sm:$0xff]  }
 0x512   : > { %8759 = vmatpush3.bf16.msra.mxu0 %v9520_v47  ;;  %8766 = vmatprep.mubr.msk.bf16.mxu0 %vm9672_vm3, %v9671_v12  ;;  %v6142_v47 = vrot.slane %v10878_v32, 7  ;;  %v9570_v32 = vld [vmem:[%s11294_s5 + $0x1f0] sm:$0xff]  }
 0x513   : > { %8760 = vmatprep.subr.bf16.mxu0 %v9671_v12 }
 0x516   : > { %8761 = vmatpush3.bf16.msra.mxu0 %v9521_v39 }
 0x517   : > { %8762 = vmatprep.subr.bf16.mxu0 %v9671_v12 }
 0x51a   : > { %8763 = vmatpush3.bf16.msra.mxu0 %v9522_v7 }
 0x51b   : > { %8764 = vmatprep.subr.bf16.mxu0 %v9671_v12 }
 0x51e   : > { %8765 = vmatpush3.bf16.msra.mxu0 %v9523_v29 }
 0x51f   : > { %8770 = vmatprep.subr.bf16.mxu0 %v9671_v12 }
 0x521   : > { %8767 = vmatmul.mubr.msk.bf16.vlgmr.msra.gmra.mrb[80].mxu0 %vm5086_vm4, %v5284_v33  ;;  %v9571_v33 = vld [vmem:[%s11294_s5 + $0x1f8] sm:$0xff]  }
 0x522   : > { %8771 = vmatpush3.bf16.msra.mxu0 %v9524_v15  ;;  %8778 = vmatprep.mubr.msk.bf16.mxu0 %vm9672_vm3, %v9671_v12 }
 0x523   : > { %8772 = vmatprep.subr.bf16.mxu0 %v9671_v12 }
 0x526   : > { %8773 = vmatpush3.bf16.msra.mxu0 %v9525_v36  ;;  %v9572_v36 = vld [vmem:[%s11294_s5 + $0x200] sm:$0xff]  }
 0x527   : > { %8774 = vmatprep.subr.bf16.mxu0 %v9671_v12 }
 0x52a   : > { %8775 = vmatpush3.bf16.msra.mxu0 %v9526_v45  ;;  %v6220_v45 = vrot.slane %v10883_v42, 7  ;;  %v9574_v42 = vld [vmem:[%s11294_s5 + $0x210] sm:$0xff]  }
 0x52b   : > { %8776 = vmatprep.subr.bf16.mxu0 %v9671_v12 }
 0x52e   : > { %8777 = vmatpush3.bf16.msra.mxu0 %v9527_v52  ;;  %v9573_v52 = vld [vmem:[%s11294_s5 + $0x208] sm:$0xff]  }
 0x52f   : > { %8782 = vmatprep.subr.bf16.mxu0 %v9671_v12 }
 0x531   : > { %8779 = vmatmul.mubr.msk.bf16.vlgmr.msra.gmra.mrb[80].mxu0 %vm5086_vm4, %v5362_v1  ;;  %v9575_v1 = vld [vmem:[%s11294_s5 + $0x218] sm:$0xff]  }
 0x532   : > { %8783 = vmatpush3.bf16.msra.mxu0 %v9528_v56  ;;  %8790 = vmatprep.mubr.msk.bf16.mxu0 %vm9672_vm3, %v9671_v12  ;;  %v5026_v56 = vpop.trf.xlu0 }
 0x533   : > { %8784 = vmatprep.subr.bf16.mxu0 %v9671_v12 }
 0x536   : > { %8785 = vmatpush3.bf16.msra.mxu0 %v9529_v34  ;;  %v5027_v34 = vpop.trf.xlu0 }
 0x537   : > { %8786 = vmatprep.subr.bf16.mxu0 %v9671_v12 }
 0x53a   : > { %8787 = vmatpush3.bf16.msra.mxu0 %v9530_v10  ;;  %v9576_v10 = vld [vmem:[%s11294_s5 + $0x220] sm:$0xff]  }
 0x53b   : > { %8788 = vmatprep.subr.bf16.mxu0 %v9671_v12 }
 0x53e   : > { %8789 = vmatpush3.bf16.msra.mxu0 %v9531_v40  ;;  %v5041_v40 = vpack.c.bf16 %v5027_v34, %v5026_v56 }
 0x53f   : > { %8794 = vmatprep.subr.bf16.mxu0 %v9671_v12 }
 0x541   : > { %8791 = vmatmul.mubr.msk.bf16.vlgmr.msra.gmra.mrb[80].mxu0 %vm5086_vm4, %v5440_v37  ;;  %v9578_v37 = vld [vmem:[%s11294_s5 + $0x230] sm:$0xff]  }
 0x542   : > { %8795 = vmatpush3.bf16.msra.mxu0 %v9532_v30  ;;  %8802 = vmatprep.mubr.msk.bf16.mxu0 %vm9672_vm3, %v9671_v12  ;;  %v9577_v30 = vld [vmem:[%s11294_s5 + $0x228] sm:$0xff]  }
 0x543   : > { %8796 = vmatprep.subr.bf16.mxu0 %v9671_v12 }
 0x546   : > { %8797 = vmatpush3.bf16.msra.mxu0 %v9533_v38  ;;  %v9579_v38 = vld [vmem:[%s11294_s5 + $0x238] sm:$0xff]  }
 0x547   : > { %8798 = vmatprep.subr.bf16.mxu0 %v9671_v12 }
 0x54a   : > { %8799 = vmatpush3.bf16.msra.mxu0 %v9534_v46  ;;  %v9580_v46 = vld [vmem:[%s11294_s5 + $0x240] sm:$0xff]  }
 0x54b   : > { %8800 = vmatprep.subr.bf16.mxu0 %v9671_v12 }
 0x54e   : > { %8801 = vmatpush3.bf16.msra.mxu0 %v9535_v26  ;;  %v6375_v26 = vshrl.u32 %v5041_v40, 16 }
 0x54f   : > { %8806 = vmatprep.subr.bf16.mxu0 %v9671_v12 }
 0x551   : > { %8803 = vmatmul.mubr.msk.bf16.vlgmr.msra.gmra.mrb[80].mxu0 %vm5086_vm4, %v5518_v4  ;;  %v9582_v4 = vld [vmem:[%s11294_s5 + $0x250] sm:$0xff]  }
 0x552   : > { %8807 = vmatpush3.bf16.msra.mxu0 %v9536_v20  ;;  %8814 = vmatprep.mubr.msk.bf16.mxu0 %vm9672_vm3, %v9671_v12  ;;  %v9581_v20 = vld [vmem:[%s11294_s5 + $0x248] sm:$0xff]  }
 0x553   : > { %8808 = vmatprep.subr.bf16.mxu0 %v9671_v12 }
 0x556   : > { %8809 = vmatpush3.bf16.msra.mxu0 %v9537_v6  ;;  %v9583_v6 = vld [vmem:[%s11294_s5 + $0x258] sm:$0xff]  }
 0x557   : > { %8810 = vmatprep.subr.bf16.mxu0 %v9671_v12 }
 0x55a   : > { %8811 = vmatpush3.bf16.msra.mxu0 %v9538_v43  ;;  %v9584_v43 = vld [vmem:[%s11294_s5 + $0x260] sm:$0xff]  }
 0x55b   : > { %8812 = vmatprep.subr.bf16.mxu0 %v9671_v12 }
 0x55e   : > { %8813 = vmatpush3.bf16.msra.mxu0 %v9539_v35  ;;  %v6455_v35 = vrot.slane %v5041_v40, 1 }
 0x55f   : > { %8818 = vmatprep.subr.bf16.mxu0 %v9671_v12 }
 0x561   : > { %8815 = vmatmul.mubr.msk.bf16.vlgmr.msra.gmra.mrb[80].mxu0 %vm5086_vm4, %v5596_v41  ;;  %v9586_v41 = vld [vmem:[%s11294_s5 + $0x270] sm:$0xff]  }
 0x562   : > { %8819 = vmatpush3.bf16.msra.mxu0 %v9540_v49  ;;  %8826 = vmatprep.mubr.msk.bf16.mxu0 %vm9672_vm3, %v9671_v12  ;;  %v9585_v49 = vld [vmem:[%s11294_s5 + $0x268] sm:$0xff]  }
 0x563   : > { %8820 = vmatprep.subr.bf16.mxu0 %v9671_v12 }
 0x566   : > { %8821 = vmatpush3.bf16.msra.mxu0 %v9541_v58  ;;  %v9587_v58 = vld [vmem:[%s11294_s5 + $0x278] sm:$0xff]  }
 0x567   : > { %8822 = vmatprep.subr.bf16.mxu0 %v9671_v12 }
 0x56a   : > { %8823 = vmatpush3.bf16.msra.mxu0 %v9542_v17  ;;  %v6533_v17 = vrot.slane %v6375_v26, 1 }
 0x56b   : > { %8824 = vmatprep.subr.bf16.mxu0 %v9671_v12 }
 0x56e   : > { %8825 = vmatpush3.bf16.msra.mxu0 %v9543_v25  ;;  %v6603_v25 = vlaneseq }
 0x56f   : > { %8830 = vmatprep.subr.bf16.mxu0 %v9671_v12 }
 0x571   : > { %8827 = vmatmul.mubr.msk.bf16.vlgmr.msra.gmra.mrb[80].mxu0 %vm5086_vm4, %v5674_v62 }
 0x572   : > { %8831 = vmatpush3.bf16.msra.mxu0 %v9544_v21  ;;  %8838 = vmatprep.mubr.msk.bf16.mxu0 %vm9672_vm3, %v9671_v12  ;;  %v6604_v21 = vand.u32 127, %v6603_v25 }
 0x573   : > { %8832 = vmatprep.subr.bf16.mxu0 %v9671_v12 }
 0x574   : > { %vm6605_vm5 = vcmp.lt.s32.totalorder %v6604_v21, 10 }
 0x576   : > { %8833 = vmatpush3.bf16.msra.mxu0 %v9545_v23 }
 0x577   : > { %8834 = vmatprep.subr.bf16.mxu0 %v9671_v12 }
 0x57a   : > { %8835 = vmatpush3.bf16.msra.mxu0 %v9546_v11 }
 0x57b   : > { %8836 = vmatprep.subr.bf16.mxu0 %v9671_v12 }
 0x57e   : > { %8837 = vmatpush3.bf16.msra.mxu0 %v9547_v5 }
 0x57f   : > { %8842 = vmatprep.subr.bf16.mxu0 %v9671_v12 }
 0x581   : > { %8839 = vmatmul.mubr.msk.bf16.vlgmr.msra.gmra.mrb[80].mxu0 %vm5086_vm4, %v5752_v59 }
 0x582   : > { %8843 = vmatpush3.bf16.msra.mxu0 %v9548_v0  ;;  %8850 = vmatprep.mubr.msk.bf16.mxu0 %vm9672_vm3, %v9671_v12 }
 0x583   : > { %8844 = vmatprep.subr.bf16.mxu0 %v9671_v12 }
 0x586   : > { %8845 = vmatpush3.bf16.msra.mxu0 %v9549_v3 }
 0x587   : > { %8846 = vmatprep.subr.bf16.mxu0 %v9671_v12 }
 0x58a   : > { %8847 = vmatpush3.bf16.msra.mxu0 %v9550_v9 }
 0x58b   : > { %8848 = vmatprep.subr.bf16.mxu0 %v9671_v12 }
 0x58e   : > { %8849 = vmatpush3.bf16.msra.mxu0 %v9551_v53 }
 0x58f   : > { %8854 = vmatprep.subr.bf16.mxu0 %v9671_v12 }
 0x591   : > { %8851 = vmatmul.mubr.msk.bf16.vlgmr.msra.gmra.mrb[80].mxu0 %vm5086_vm4, %v5830_v22 }
 0x592   : > { %8855 = vmatpush3.bf16.msra.mxu0 %v9552_v28  ;;  %8862 = vmatprep.mubr.msk.bf16.mxu0 %vm9672_vm3, %v9671_v12 }
 0x593   : > { %8856 = vmatprep.subr.bf16.mxu0 %v9671_v12 }
 0x596   : > { %8857 = vmatpush3.bf16.msra.mxu0 %v9553_v44 }
 0x597   : > { %8858 = vmatprep.subr.bf16.mxu0 %v9671_v12 }
 0x59a   : > { %8859 = vmatpush3.bf16.msra.mxu0 %v9554_v14 }
 0x59b   : > { %8860 = vmatprep.subr.bf16.mxu0 %v9671_v12 }
 0x59e   : > { %8861 = vmatpush3.bf16.msra.mxu0 %v9555_v2 }
 0x59f   : > { %8866 = vmatprep.subr.bf16.mxu0 %v9671_v12 }
 0x5a1   : > { %8863 = vmatmul.mubr.msk.bf16.vlgmr.msra.gmra.mrb[80].mxu0 %vm5086_vm4, %v5908_v27 }
 0x5a2   : > { %8867 = vmatpush3.bf16.msra.mxu0 %v9556_v54  ;;  %8874 = vmatprep.mubr.msk.bf16.mxu0 %vm9672_vm3, %v9671_v12 }
 0x5a3   : > { %8868 = vmatprep.subr.bf16.mxu0 %v9671_v12 }
 0x5a6   : > { %8869 = vmatpush3.bf16.msra.mxu0 %v9557_v48 }
 0x5a7   : > { %8870 = vmatprep.subr.bf16.mxu0 %v9671_v12 }
 0x5aa   : > { %8871 = vmatpush3.bf16.msra.mxu0 %v9558_v60 }
 0x5ab   : > { %8872 = vmatprep.subr.bf16.mxu0 %v9671_v12 }
 0x5ae   : > { %8873 = vmatpush3.bf16.msra.mxu0 %v9559_v50 }
 0x5af   : > { %8878 = vmatprep.subr.bf16.mxu0 %v9671_v12 }
 0x5b1   : > { %8875 = vmatmul.mubr.msk.bf16.vlgmr.msra.gmra.mrb[80].mxu0 %vm5086_vm4, %v5986_v61 }
 0x5b2   : > { %8879 = vmatpush3.bf16.msra.mxu0 %v9560_v57  ;;  %8886 = vmatprep.mubr.msk.bf16.mxu0 %vm9672_vm3, %v9671_v12 }
 0x5b3   : > { %8880 = vmatprep.subr.bf16.mxu0 %v9671_v12 }
 0x5b6   : > { %8881 = vmatpush3.bf16.msra.mxu0 %v9561_v8 }
 0x5b7   : > { %8882 = vmatprep.subr.bf16.mxu0 %v9671_v12 }
 0x5ba   : > { %8883 = vmatpush3.bf16.msra.mxu0 %v9562_v24 }
 0x5bb   : > { %8884 = vmatprep.subr.bf16.mxu0 %v9671_v12 }
 0x5be   : > { %8885 = vmatpush3.bf16.msra.mxu0 %v9563_v13 }
 0x5bf   : > { %8890 = vmatprep.subr.bf16.mxu0 %v9671_v12 }
 0x5c1   : > { %8887 = vmatmul.mubr.msk.bf16.vlgmr.msra.gmra.mrb[80].mxu0 %vm5086_vm4, %v6064_v16 }
 0x5c2   : > { %8891 = vmatpush3.bf16.msra.mxu0 %v9564_v18  ;;  %8898 = vmatprep.mubr.msk.bf16.mxu0 %vm9672_vm3, %v9671_v12 }
 0x5c3   : > { %8892 = vmatprep.subr.bf16.mxu0 %v9671_v12 }
 0x5c6   : > { %8893 = vmatpush3.bf16.msra.mxu0 %v9565_v31 }
 0x5c7   : > { %8894 = vmatprep.subr.bf16.mxu0 %v9671_v12 }
 0x5ca   : > { %8895 = vmatpush3.bf16.msra.mxu0 %v9566_v51 }
 0x5cb   : > { %8896 = vmatprep.subr.bf16.mxu0 %v9671_v12 }
 0x5ce   : > { %8897 = vmatpush3.bf16.msra.mxu0 %v9567_v55 }
 0x5cf   : > { %8902 = vmatprep.subr.bf16.mxu0 %v9671_v12 }
 0x5d1   : > { %8899 = vmatmul.mubr.msk.bf16.vlgmr.msra.gmra.mrb[80].mxu0 %vm5086_vm4, %v6142_v47 }
 0x5d2   : > { %8903 = vmatpush3.bf16.msra.mxu0 %v9568_v63  ;;  %8910 = vmatprep.mubr.msk.bf16.mxu0 %vm9672_vm3, %v9671_v12 }
 0x5d3   : > { %8904 = vmatprep.subr.bf16.mxu0 %v9671_v12 }
 0x5d6   : > { %8905 = vmatpush3.bf16.msra.mxu0 %v9569_v19  ;;  %v11153_v39 = vpop.f32.mrb[8].mxu1 }
 0x5d7   : > { %v8732_v7 = vpop.f32.mrb[9].mxu1  ;;  %8906 = vmatprep.subr.bf16.mxu0 %v9671_v12 }
 0x5d8   : > { %v5127_v29 = vpop.f32.mrb[10].mxu1 }
 0x5d9   : > { %v8733_v15 = vpop.f32.mrb[11].mxu1 }
 0x5da   : > { %8907 = vmatpush3.bf16.msra.mxu0 %v9570_v32 }
 0x5db   : > { %8908 = vmatprep.subr.bf16.mxu0 %v9671_v12 }
 0x5de   : > { %8909 = vmatpush3.bf16.msra.mxu0 %v9571_v33 }
 0x5df   : > { %8914 = vmatprep.subr.bf16.mxu0 %v9671_v12 }
 0x5e1   : > { %8911 = vmatmul.mubr.msk.bf16.vlgmr.msra.gmra.mrb[80].mxu0 %vm5086_vm4, %v6220_v45 }
 0x5e2   : > { %8915 = vmatpush3.bf16.msra.mxu0 %v9572_v36  ;;  %8922 = vmatprep.mubr.msk.bf16.mxu0 %vm9672_vm3, %v9671_v12 }
 0x5e3   : > { %8916 = vmatprep.subr.bf16.mxu0 %v9671_v12 }
 0x5e6   : > { %8917 = vmatpush3.bf16.msra.mxu0 %v9573_v52 }
 0x5e7   : > { %8918 = vmatprep.subr.bf16.mxu0 %v9671_v12 }
 0x5ea   : > { %8919 = vmatpush3.bf16.msra.mxu0 %v9574_v42 }
 0x5eb   : > { %8920 = vmatprep.subr.bf16.mxu0 %v9671_v12 }
 0x5ee   : > { %8921 = vmatpush3.bf16.msra.mxu0 %v9575_v1 }
 0x5ef   : > { %8926 = vmatprep.subr.bf16.mxu0 %v9671_v12 }
 0x5f1   : > { %8923 = vmatmul.mubr.msk.bf16.vlgmr.msra.gmra.mrb[80].mxu0 %vm5086_vm4, %v5041_v40 }
 0x5f2   : > { %8927 = vmatpush3.bf16.msra.mxu0 %v9576_v10  ;;  %8934 = vmatprep.mubr.msk.bf16.mxu0 %vm9672_vm3, %v9671_v12 }
 0x5f3   : > { %8928 = vmatprep.subr.bf16.mxu0 %v9671_v12 }
 0x5f6   : > { %8929 = vmatpush3.bf16.msra.mxu0 %v9577_v30 }
 0x5f7   : > { %8930 = vmatprep.subr.bf16.mxu0 %v9671_v12 }
 0x5fa   : > { %8931 = vmatpush3.bf16.msra.mxu0 %v9578_v37 }
 0x5fb   : > { %8932 = vmatprep.subr.bf16.mxu0 %v9671_v12 }
 0x5fe   : > { %8933 = vmatpush3.bf16.msra.mxu0 %v9579_v38 }
 0x5ff   : > { %8938 = vmatprep.subr.bf16.mxu0 %v9671_v12 }
 0x601   : > { %8935 = vmatmul.mubr.msk.bf16.vlgmr.msra.gmra.mrb[80].mxu0 %vm5086_vm4, %v6375_v26 }
 0x602   : > { %8939 = vmatpush3.bf16.msra.mxu0 %v9580_v46  ;;  %8946 = vmatprep.mubr.msk.bf16.mxu0 %vm9672_vm3, %v9671_v12 }
 0x603   : > { %8940 = vmatprep.subr.bf16.mxu0 %v9671_v12 }
 0x606   : > { %8941 = vmatpush3.bf16.msra.mxu0 %v9581_v20 }
 0x607   : > { %8942 = vmatprep.subr.bf16.mxu0 %v9671_v12 }
 0x60a   : > { %8943 = vmatpush3.bf16.msra.mxu0 %v9582_v4 }
 0x60b   : > { %8944 = vmatprep.subr.bf16.mxu0 %v9671_v12 }
 0x60e   : > { %8945 = vmatpush3.bf16.msra.mxu0 %v9583_v6 }
 0x60f   : > { %8950 = vmatprep.subr.bf16.mxu0 %v9671_v12 }
 0x611   : > { %8947 = vmatmul.mubr.msk.bf16.vlgmr.msra.gmra.mrb[80].mxu0 %vm5086_vm4, %v6455_v35 }
 0x612   : > { %8951 = vmatpush3.bf16.msra.mxu0 %v9584_v43  ;;  %8958 = vmatprep.mubr.msk.bf16.mxu0 %vm9672_vm3, %v9671_v12 }
 0x613   : > { %8952 = vmatprep.subr.bf16.mxu0 %v9671_v12 }
 0x616   : > { %8953 = vmatpush3.bf16.msra.mxu0 %v9585_v49 }
 0x617   : > { %8954 = vmatprep.subr.bf16.mxu0 %v9671_v12 }
 0x61a   : > { %8955 = vmatpush3.bf16.msra.mxu0 %v9586_v41 }
 0x61b   : > { %8956 = vmatprep.subr.bf16.mxu0 %v9671_v12 }
 0x61e   : > { %8957 = vmatpush3.bf16.msra.mxu0 %v9587_v58 }
 0x621   : > { %8959 = vmatmul.mubr.msk.bf16.vlgmr.msra.gmra.mrb[80].mxu0 %vm5086_vm4, %v6533_v17 }
 0x6f4   : > { %v6595_v62 = vpop.f32.mrb[80].mxu0 }
 0x6f5   : > { %v8970_v23 = vadd.f32 %v6595_v62, %v11153_v39  ;;  %v8960_v11 = vpop.f32.mrb[81].mxu0 }
 0x6f6   : > { %v6598_v5 = vpop.f32.mrb[82].mxu0 }
 0x6f7   : > { %v6602_v0 = vmax.f32 %v8970_v23, 0.0  ;;  %v8961_v59 = vpop.f32.mrb[83].mxu0 }
 0x6f9   : > { %v6606_v3 = vsel %vm6605_vm5, %v6602_v0, -1e+30 }
 0x6fa   : > { %v6608_v9 = vsel %vm6607_vm6, %v6606_v3, -inf }
 0x6fb   : > { %6609 = vmax.xlane.f32.xlu1 %v6608_v9 }
 0x788   : > { %v6610_v12 = vpop.xlane.xlu1 %6609 }
 0x789   : > { %v6611_v53 = vsub.f32 %v6606_v3, %v6610_v12 }
 0x78b   : > { %v6612_v28 = vmul.f32 1.442695, %v6611_v53 }
 0x78d   : > { %9588 = vpow2.f32 %v6612_v28 }
 0x797   : > { %v9589_v22 = vpop.eup %9588 }
 0x798   : > { %v6614_v44 = vsel %vm6607_vm6, %v9589_v22, 0.0 }
 0x799   : > { %6615 = vadd.xlane.f32.xlu1 %v6614_v44 }
 0x826   : > { %v6616_v14 = vpop.xlane.xlu1 %6615 }
 0x827   : > { %9590 = vrcp.f32 %v6616_v14 }
 0x831   : > { %v9591_v2 = vpop.eup %9590 }
 0x832   : > { %v6618_v54 = vmul.f32 %v9591_v2, %v9589_v22 }
 0x834   : > { %6619 = vst [vmem:[%s243_s16] sm:$0x1] %v6618_v54 }
 0x835   : > { %9619 = shalt.err (!%p9616_p3)
}
 0x836   : > { %s9620_s10 = scalar_lea.hbm %s11247_s20, 16  ;;  %s9624_s13 = scalar_lea.hbm %s11295_s6, 32 }
 0x837   : > { %p9621_p4 = scmp.ne.s32.totalorder %s11247_s20, %s9620_s10  ;;  %p9625_p9 = scmp.lt.u32.totalorder %s11247_s20, %s11295_s6 }
 0x838   : > { %p9626_p10 = scmp.lt.u32.totalorder %s9624_s13, %s9620_s10  ;;  %p9628_p12 = scmp.lt.u32.totalorder %s9620_s10, %s11247_s20 }
 0x839   : > { %p9622_p7 = pnand %p9621_p4, %p9747_p5 }
 0x83a   : > { %p9627_p11 = por %p9626_p10, %p9625_p9 }
 0x83b   : > { %p9623_p8 = pneg %p9622_p7 }
 0x83c   : > { %p9629_p13 = por %p9628_p12, %p9627_p11 }
 0x83e   : > { %p9630_p0 = pnand %p9629_p13, %p9623_p8 }
 0x840   : > { %9633 = shalt.err (!%p9630_p0)
}
 0x841   : > { %9228 = dma.vmem_to_hbm [thread:$0]  (%p9747_p5), %s11249_s17, 16, %s11247_s20, %s6621_s26  }
 0x842 PF: > { %p9234_p1 = scmp.ge.s32.totalorder %s9668_s24, 2  ;;  %s6645_s16 = sand.u32 1, %s9656_s21  }
 0x843   : > { %s6646_s18 = scalar_lea.sflag [#allocation5], %s6645_s16 }
 0x844   : > { %p9231_p2 = pnand %p9234_p1, %p9751_p6 }
 0x846   : > { %9651 = dma.done.wait (!%p9231_p2), %s6646_s18, 16  }
 0x847   : > { %9653 = vsyncadd (!%p9231_p2), %s6646_s18, 4294967280  ;;  %p16_p3 = scmp.ge.s32.totalorder %s9734_s27, 4   ;;  %s11298_s21 = smov %s9660_s22 }
 0x848   : > { %s11299_s22 = smov %s9664_s23  ;;  %s11300_s23 = smov %s9745_s30 }
 0x849   : > { %s11301_s24 = smov %s9734_s27  ;;  %18 = sbr.rel (!%p16_p3) target bundleno = 3 (0x3), region = 173 }
 0x850   :  { %6650 = vsyncpa [#allocation5], 1 }
 0x851   :  { %6652 = vsyncpa [#allocation5 + $0x1], 1 }

</bundles_post_ra>
